<compile_context>
chip_gen: v6e
topology: v6e:2x2x1
jax: 0.10.0
libtpu: 0.0.40
codegen_flags: <defaults>
</compile_context>

<pallas_src>
import jax
import jax.numpy as jnp
from jax.experimental import pallas as pl
from jax.experimental.pallas import tpu as pltpu


LANE = 128      # TPU lane width; feature dims are zero-padded to this
SUBLANE = 8
T_BLOCK = 32    # timesteps per grid step (amortizes per-step grid overhead and
                # gives the batched matmuls 32 active MXU rows)


def _round_up(x, m):
    return ((x + m - 1) // m) * m


def make_rnn_seq_kernel(t_block, seq_len):
    """Build the fused sequence kernel with static sizes baked in."""

    def kernel(tok_ref,        # scalar prefetch: (T_pad,) int32 in SMEM
               emb_ref,        # (Vr, Hp)  embedding table (VMEM resident)
               w_ih_t_ref,     # (Hp, Hp)  W_ih^T, zero padded
               w_hh_t_ref,     # (Hp, Hp)  W_hh^T, zero padded
               b_cell_ref,     # (1, Hp)   b_ih + b_hh
               w_dec_ref,      # (Hp, Vp)  W_dec^T
               b_dec_ref,      # (1, Vp)
               h0_ref,         # (1, Hp)   initial hidden
               logits_ref,     # out: (t_block, Vp) logits block for this step
               h_out_ref,      # out: (1, Hp) final hidden
               h_scr,          # scratch (1, Hp)       hidden-state carry
               pre_scr,        # scratch (t_block, Hp) x @ W_ih^T + bias
               hblk_scr):      # scratch (t_block, Hp) per-step hidden states
        i = pl.program_id(0)
        nb = pl.num_programs(0)

        @pl.when(i == 0)
        def _init():
            h_scr[...] = h0_ref[...]

        vr = emb_ref.shape[0]

        # ---------- batched, non-recurrent work (off the serial chain) -----
        # Assemble this block's token ids as a (t_block, 1) column from the
        # scalar-prefetched SMEM tokens.
        row_ids = jax.lax.broadcasted_iota(jnp.int32, (t_block, 1), 0)
        tok_col = jnp.zeros((t_block, 1), jnp.int32)
        for s in range(t_block):
            tok_col = jnp.where(row_ids == s, tok_ref[i * t_block + s],
                                tok_col)

        # One-hot gather of the whole block: (t_block, Vr) @ (Vr, Hp).
        # TODO(synk): for large vocab replace with per-row dynamic reads
        # emb_ref[pl.ds(tok, 1), :] into pre_scr (O(Hp) per token).
        col_ids = jax.lax.broadcasted_iota(jnp.int32, (t_block, vr), 1)
        onehot = (col_ids == tok_col).astype(jnp.float32)
        x_blk = jnp.dot(onehot, emb_ref[...],
                        preferred_element_type=jnp.float32)      # (t_block, Hp)

        # x_t @ W_ih^T + (b_ih + b_hh) for all t_block steps at once.
        pre_scr[...] = (jnp.dot(x_blk, w_ih_t_ref[...],
                                preferred_element_type=jnp.float32)
                        + b_cell_ref[...])

        # ---------- recurrent chain: one (1,Hp)@(Hp,Hp) matmul + tanh/step --
        h = h_scr[...]                                           # (1, Hp)
        w_hh_t = w_hh_t_ref[...]
        for s in range(t_block):                                 # static unroll
            h = jnp.tanh(jnp.dot(h, w_hh_t,
                                 preferred_element_type=jnp.float32)
                         + pre_scr[pl.ds(s, 1), :])
            hblk_scr[pl.ds(s, 1), :] = h

        # Carry = last VALID hidden row of this block. Padded tail steps (only
        # possible in the final block) never pollute the carry / final hidden.
        last = jnp.minimum(seq_len - 1 - i * t_block, t_block - 1)
        h_scr[...] = hblk_scr[pl.ds(last, 1), :]

        # ---------- batched decoder + one dense (t_block, Vp) store ---------
        logits_ref[...] = (jnp.dot(hblk_scr[...], w_dec_ref[...],
                                   preferred_element_type=jnp.float32)
                           + b_dec_ref[...])

        @pl.when(i == nb - 1)
        def _fin():
            h_out_ref[...] = h_scr[...]

    return kernel


def prepare_kernel_params(raw_params):
    """One-time param transform: transpose weights, pre-add the two cell
    biases, and zero-pad feature dims to the lane width. Zero padding keeps
    the padded hidden lanes exactly 0 (tanh(0) = 0), so results are exact."""
    emb, w_ih, w_hh, b_ih, b_hh, w_dec, b_dec = raw_params
    V, H = emb.shape
    Hp = _round_up(H, LANE)
    Vp = _round_up(V, LANE)
    Vr = _round_up(V, SUBLANE)
    f32 = jnp.float32

    emb_p = jnp.zeros((Vr, Hp), f32).at[:V, :H].set(emb.astype(f32))
    w_ih_t = jnp.zeros((Hp, Hp), f32).at[:H, :H].set(w_ih.T.astype(f32))
    w_hh_t = jnp.zeros((Hp, Hp), f32).at[:H, :H].set(w_hh.T.astype(f32))
    b_cell = jnp.zeros((1, Hp), f32).at[0, :H].set((b_ih + b_hh).astype(f32))
    w_dec_t = jnp.zeros((Hp, Vp), f32).at[:H, :V].set(w_dec.T.astype(f32))
    b_dec_p = jnp.zeros((1, Vp), f32).at[0, :V].set(b_dec.astype(f32))
    # NOTE: for non-toy sizes, emb_p / w_dec_t can be stored as bfloat16
    # (MXU-native; dots keep preferred_element_type=f32) to halve weight VMEM.
    return (emb_p, w_ih_t, w_hh_t, b_cell, w_dec_t, b_dec_p, V, H)


def rnn_forward_seq(tokens, h0, kparams, *, t_block=T_BLOCK):
    """Run a whole token sequence through the fused RNN kernel.

    tokens: (T,) int token ids (== T successive forward() calls)
    h0:     (1, H) f32 initial hidden (the (n_layers=1,1,H) hidden, squeezed)
    returns: logits (T, V) f32, h_final (1, H) f32
    """
    emb_p, w_ih_t, w_hh_t, b_cell, w_dec_t, b_dec_p, vocab, hidden = kparams
    Vr, Hp = emb_p.shape
    Vp = w_dec_t.shape[1]

    T = int(tokens.shape[0])
    num_blocks = pl.cdiv(T, t_block)
    T_pad = num_blocks * t_block

    tokens_p = jnp.zeros((T_pad,), jnp.int32).at[:T].set(
        tokens.astype(jnp.int32))
    h0_p = jnp.zeros((1, Hp), jnp.float32).at[:, :hidden].set(
        h0.astype(jnp.float32))

    kernel = make_rnn_seq_kernel(t_block, T)

    grid_spec = pltpu.PrefetchScalarGridSpec(
        num_scalar_prefetch=1,
        grid=(num_blocks,),
        in_specs=[
            pl.BlockSpec((Vr, Hp), lambda i, toks: (0, 0)),      # emb table
            pl.BlockSpec((Hp, Hp), lambda i, toks: (0, 0)),      # W_ih^T
            pl.BlockSpec((Hp, Hp), lambda i, toks: (0, 0)),      # W_hh^T
            pl.BlockSpec((1, Hp), lambda i, toks: (0, 0)),       # b_ih + b_hh
            pl.BlockSpec((Hp, Vp), lambda i, toks: (0, 0)),      # W_dec^T
            pl.BlockSpec((1, Vp), lambda i, toks: (0, 0)),       # b_dec
            pl.BlockSpec((1, Hp), lambda i, toks: (0, 0)),       # h0
        ],
        out_specs=[
            pl.BlockSpec((t_block, Vp), lambda i, toks: (i, 0)),  # logits
            pl.BlockSpec((1, Hp), lambda i, toks: (0, 0)),        # final h
        ],
        scratch_shapes=[
            pltpu.VMEM((1, Hp), jnp.float32),        # hidden carry
            pltpu.VMEM((t_block, Hp), jnp.float32),  # x @ W_ih^T + bias
            pltpu.VMEM((t_block, Hp), jnp.float32),  # per-step hidden states
        ],
    )

    logits_p, h_fin_p = pl.pallas_call(
        kernel,
        out_shape=(jax.ShapeDtypeStruct((T_pad, Vp), jnp.float32),
                   jax.ShapeDtypeStruct((1, Hp), jnp.float32)),
        grid_spec=grid_spec,
        compiler_params=pltpu.CompilerParams(
            dimension_semantics=("arbitrary",),      # sequential recurrence
            vmem_limit_bytes=64 * 1024 * 1024),
    )(tokens_p, emb_p, w_ih_t, w_hh_t, b_cell, w_dec_t, b_dec_p, h0_p)

    return logits_p[:T, :vocab], h_fin_p[:, :hidden]


def init_params(key, vocab_size, hidden_size):
    """Deterministic parameter init matching the PyTorch module's shapes."""
    ks = jax.random.split(key, 7)
    bound = 1.0 / jnp.sqrt(jnp.float32(hidden_size))
    emb = jax.random.normal(ks[0], (vocab_size, hidden_size), jnp.float32)
    w_ih = jax.random.uniform(ks[1], (hidden_size, hidden_size), jnp.float32,
                              -bound, bound)
    w_hh = jax.random.uniform(ks[2], (hidden_size, hidden_size), jnp.float32,
                              -bound, bound)
    b_ih = jax.random.uniform(ks[3], (hidden_size,), jnp.float32, -bound, bound)
    b_hh = jax.random.uniform(ks[4], (hidden_size,), jnp.float32, -bound, bound)
    w_dec = jax.random.uniform(ks[5], (vocab_size, hidden_size), jnp.float32,
                               -bound, bound)
    b_dec = jax.random.uniform(ks[6], (vocab_size,), jnp.float32, -bound, bound)
    return (emb, w_ih, w_hh, b_ih, b_hh, w_dec, b_dec)


def rnn_forward_seq_ref(tokens, h0, raw_params):
    """Pure-JAX reference: scan of the PyTorch-exact per-step forward."""
    emb, w_ih, w_hh, b_ih, b_hh, w_dec, b_dec = raw_params

    def step(h, tok):
        x = emb[tok][None, :]
        h_new = jnp.tanh(x @ w_ih.T + b_ih[None, :]
                         + h @ w_hh.T + b_hh[None, :])
        logits = h_new @ w_dec.T + b_dec[None, :]
        return h_new, logits[0]

    h_final, logits = jax.lax.scan(step, h0, tokens.astype(jnp.int32))
    return logits, h_final


if __name__ == "__main__":
    vocab_size, hidden_size = 64, 32
    seq_len = 70   # not a multiple of T_BLOCK: exercises the multi-block carry
                   # and the padded-tail handling in the last block

    key = jax.random.PRNGKey(0)
    k_param, k_tok = jax.random.split(key)
    raw_params = init_params(k_param, vocab_size, hidden_size)
    kparams = prepare_kernel_params(raw_params)

    # init_hidden(): zeros of shape (n_layers=1, 1, hidden) -> carried as (1, H)
    h0 = jnp.zeros((1, hidden_size), jnp.float32)
    tokens = jax.random.randint(k_tok, (seq_len,), 0, vocab_size,
                                dtype=jnp.int32)

    logits, h_fin = rnn_forward_seq(tokens, h0, kparams)
    jax.block_until_ready((logits, h_fin))

    # correctness check vs. pure-JAX reference of the unfused, unpadded model
    logits_ref, h_fin_ref = rnn_forward_seq_ref(tokens, h0, raw_params)
    assert logits.shape == (seq_len, vocab_size)
    assert h_fin.shape == (1, hidden_size)
    assert jnp.allclose(logits, logits_ref, atol=1e-4, rtol=1e-4), \
        float(jnp.max(jnp.abs(logits - logits_ref)))
    assert jnp.allclose(h_fin, h_fin_ref, atol=1e-4, rtol=1e-4), \
        float(jnp.max(jnp.abs(h_fin - h_fin_ref)))

    print("KERNEL_OK")
</pallas_src>

<mosaic_0001>
module attributes {stable_mosaic.version = 11 : i64} {
  func.func @kernel(%arg0: i32, %arg1: memref<96xi32, #tpu.memory_space<smem>>, %arg2: memref<64x128xf32, #tpu.memory_space<vmem>>, %arg3: memref<128x128xf32, #tpu.memory_space<vmem>>, %arg4: memref<128x128xf32, #tpu.memory_space<vmem>>, %arg5: memref<1x128xf32, #tpu.memory_space<vmem>>, %arg6: memref<128x128xf32, #tpu.memory_space<vmem>>, %arg7: memref<1x128xf32, #tpu.memory_space<vmem>>, %arg8: memref<1x128xf32, #tpu.memory_space<vmem>>, %arg9: memref<32x128xf32, #tpu.memory_space<vmem>>, %arg10: memref<1x128xf32, #tpu.memory_space<vmem>>, %arg11: memref<1x128xf32, #tpu.memory_space<vmem>>, %arg12: memref<32x128xf32, #tpu.memory_space<vmem>>, %arg13: memref<32x128xf32, #tpu.memory_space<vmem>>) attributes {dimension_semantics = [#tpu.dimension_semantics<arbitrary>], iteration_bounds = array<i64: 3>, scalar_prefetch = 1 : i64, scratch_operands = 3 : i64, tpu.core_type = #tpu.core_type<tc>, window_params = [{pipeline_mode = #tpu.pipeline_mode<synchronous>, transform_indices = @transform_0, window_bounds = array<i64: 64, 128>}, {pipeline_mode = #tpu.pipeline_mode<synchronous>, transform_indices = @transform_1, window_bounds = array<i64: 128, 128>}, {pipeline_mode = #tpu.pipeline_mode<synchronous>, transform_indices = @transform_2, window_bounds = array<i64: 128, 128>}, {pipeline_mode = #tpu.pipeline_mode<synchronous>, transform_indices = @transform_3, window_bounds = array<i64: 1, 128>}, {pipeline_mode = #tpu.pipeline_mode<synchronous>, transform_indices = @transform_4, window_bounds = array<i64: 128, 128>}, {pipeline_mode = #tpu.pipeline_mode<synchronous>, transform_indices = @transform_5, window_bounds = array<i64: 1, 128>}, {pipeline_mode = #tpu.pipeline_mode<synchronous>, transform_indices = @transform_6, window_bounds = array<i64: 1, 128>}, {transform_indices = @transform_7, window_bounds = array<i64: 32, 128>}, {pipeline_mode = #tpu.pipeline_mode<synchronous>, transform_indices = @transform_8, window_bounds = array<i64: 1, 128>}]} {
    %c0_i32 = arith.constant 0 : i32
    %0 = arith.cmpi eq, %arg0, %c0_i32 : i32
    %1 = arith.extui %0 : i1 to i32
    %c0_i32_0 = arith.constant 0 : i32
    %2 = arith.cmpi ne, %1, %c0_i32_0 : i32
    scf.if %2 {
      %c0_223 = arith.constant 0 : index
      %c0_224 = arith.constant 0 : index
      %452 = vector.load %arg8[%c0_223, %c0_224] : memref<1x128xf32, #tpu.memory_space<vmem>>, vector<1x128xf32>
      %c0_225 = arith.constant 0 : index
      %c0_226 = arith.constant 0 : index
      %453 = vector.load %arg11[%c0_225, %c0_226] : memref<1x128xf32, #tpu.memory_space<vmem>>, vector<1x128xf32>
      tpu.vector_store %arg11[%c0_225, %c0_226], %452 {strides = array<i32>} : memref<1x128xf32, #tpu.memory_space<vmem>>, vector<1x128xf32>,
    } else {
    }
    %3 = tpu.iota {dimensions = array<i32: 0>} : vector<32x1xi32>
    %c0_i32_1 = arith.constant 0 : i32
    %4 = vector.broadcast %c0_i32_1 : i32 to vector<32x1xi32>
    %c0_i32_2 = arith.constant 0 : i32
    %5 = vector.broadcast %c0_i32_2 : i32 to vector<32x1xi32>
    %6 = arith.cmpi eq, %3, %5 : vector<32x1xi32>
    %c32_i32 = arith.constant 32 : i32
    %7 = arith.muli %arg0, %c32_i32 : i32
    %c0_i32_3 = arith.constant 0 : i32
    %8 = arith.addi %7, %c0_i32_3 : i32
    %9 = arith.index_cast %8 : i32 to index
    %10 = memref.load %arg1[%9] : memref<96xi32, #tpu.memory_space<smem>>
    %11 = vector.broadcast %10 : i32 to vector<32x1xi32>
    %12 = arith.select %6, %11, %4 : vector<32x1xi1>, vector<32x1xi32>
    %c1_i32 = arith.constant 1 : i32
    %13 = vector.broadcast %c1_i32 : i32 to vector<32x1xi32>
    %14 = arith.cmpi eq, %3, %13 : vector<32x1xi32>
    %c32_i32_4 = arith.constant 32 : i32
    %15 = arith.muli %arg0, %c32_i32_4 : i32
    %c1_i32_5 = arith.constant 1 : i32
    %16 = arith.addi %15, %c1_i32_5 : i32
    %17 = arith.index_cast %16 : i32 to index
    %18 = memref.load %arg1[%17] : memref<96xi32, #tpu.memory_space<smem>>
    %19 = vector.broadcast %18 : i32 to vector<32x1xi32>
    %20 = arith.select %14, %19, %12 : vector<32x1xi1>, vector<32x1xi32>
    %c2_i32 = arith.constant 2 : i32
    %21 = vector.broadcast %c2_i32 : i32 to vector<32x1xi32>
    %22 = arith.cmpi eq, %3, %21 : vector<32x1xi32>
    %c32_i32_6 = arith.constant 32 : i32
    %23 = arith.muli %arg0, %c32_i32_6 : i32
    %c2_i32_7 = arith.constant 2 : i32
    %24 = arith.addi %23, %c2_i32_7 : i32
    %25 = arith.index_cast %24 : i32 to index
    %26 = memref.load %arg1[%25] : memref<96xi32, #tpu.memory_space<smem>>
    %27 = vector.broadcast %26 : i32 to vector<32x1xi32>
    %28 = arith.select %22, %27, %20 : vector<32x1xi1>, vector<32x1xi32>
    %c3_i32 = arith.constant 3 : i32
    %29 = vector.broadcast %c3_i32 : i32 to vector<32x1xi32>
    %30 = arith.cmpi eq, %3, %29 : vector<32x1xi32>
    %c32_i32_8 = arith.constant 32 : i32
    %31 = arith.muli %arg0, %c32_i32_8 : i32
    %c3_i32_9 = arith.constant 3 : i32
    %32 = arith.addi %31, %c3_i32_9 : i32
    %33 = arith.index_cast %32 : i32 to index
    %34 = memref.load %arg1[%33] : memref<96xi32, #tpu.memory_space<smem>>
    %35 = vector.broadcast %34 : i32 to vector<32x1xi32>
    %36 = arith.select %30, %35, %28 : vector<32x1xi1>, vector<32x1xi32>
    %c4_i32 = arith.constant 4 : i32
    %37 = vector.broadcast %c4_i32 : i32 to vector<32x1xi32>
    %38 = arith.cmpi eq, %3, %37 : vector<32x1xi32>
    %c32_i32_10 = arith.constant 32 : i32
    %39 = arith.muli %arg0, %c32_i32_10 : i32
    %c4_i32_11 = arith.constant 4 : i32
    %40 = arith.addi %39, %c4_i32_11 : i32
    %41 = arith.index_cast %40 : i32 to index
    %42 = memref.load %arg1[%41] : memref<96xi32, #tpu.memory_space<smem>>
    %43 = vector.broadcast %42 : i32 to vector<32x1xi32>
    %44 = arith.select %38, %43, %36 : vector<32x1xi1>, vector<32x1xi32>
    %c5_i32 = arith.constant 5 : i32
    %45 = vector.broadcast %c5_i32 : i32 to vector<32x1xi32>
    %46 = arith.cmpi eq, %3, %45 : vector<32x1xi32>
    %c32_i32_12 = arith.constant 32 : i32
    %47 = arith.muli %arg0, %c32_i32_12 : i32
    %c5_i32_13 = arith.constant 5 : i32
    %48 = arith.addi %47, %c5_i32_13 : i32
    %49 = arith.index_cast %48 : i32 to index
    %50 = memref.load %arg1[%49] : memref<96xi32, #tpu.memory_space<smem>>
    %51 = vector.broadcast %50 : i32 to vector<32x1xi32>
    %52 = arith.select %46, %51, %44 : vector<32x1xi1>, vector<32x1xi32>
    %c6_i32 = arith.constant 6 : i32
    %53 = vector.broadcast %c6_i32 : i32 to vector<32x1xi32>
    %54 = arith.cmpi eq, %3, %53 : vector<32x1xi32>
    %c32_i32_14 = arith.constant 32 : i32
    %55 = arith.muli %arg0, %c32_i32_14 : i32
    %c6_i32_15 = arith.constant 6 : i32
    %56 = arith.addi %55, %c6_i32_15 : i32
    %57 = arith.index_cast %56 : i32 to index
    %58 = memref.load %arg1[%57] : memref<96xi32, #tpu.memory_space<smem>>
    %59 = vector.broadcast %58 : i32 to vector<32x1xi32>
    %60 = arith.select %54, %59, %52 : vector<32x1xi1>, vector<32x1xi32>
    %c7_i32 = arith.constant 7 : i32
    %61 = vector.broadcast %c7_i32 : i32 to vector<32x1xi32>
    %62 = arith.cmpi eq, %3, %61 : vector<32x1xi32>
    %c32_i32_16 = arith.constant 32 : i32
    %63 = arith.muli %arg0, %c32_i32_16 : i32
    %c7_i32_17 = arith.constant 7 : i32
    %64 = arith.addi %63, %c7_i32_17 : i32
    %65 = arith.index_cast %64 : i32 to index
    %66 = memref.load %arg1[%65] : memref<96xi32, #tpu.memory_space<smem>>
    %67 = vector.broadcast %66 : i32 to vector<32x1xi32>
    %68 = arith.select %62, %67, %60 : vector<32x1xi1>, vector<32x1xi32>
    %c8_i32 = arith.constant 8 : i32
    %69 = vector.broadcast %c8_i32 : i32 to vector<32x1xi32>
    %70 = arith.cmpi eq, %3, %69 : vector<32x1xi32>
    %c32_i32_18 = arith.constant 32 : i32
    %71 = arith.muli %arg0, %c32_i32_18 : i32
    %c8_i32_19 = arith.constant 8 : i32
    %72 = arith.addi %71, %c8_i32_19 : i32
    %73 = arith.index_cast %72 : i32 to index
    %74 = memref.load %arg1[%73] : memref<96xi32, #tpu.memory_space<smem>>
    %75 = vector.broadcast %74 : i32 to vector<32x1xi32>
    %76 = arith.select %70, %75, %68 : vector<32x1xi1>, vector<32x1xi32>
    %c9_i32 = arith.constant 9 : i32
    %77 = vector.broadcast %c9_i32 : i32 to vector<32x1xi32>
    %78 = arith.cmpi eq, %3, %77 : vector<32x1xi32>
    %c32_i32_20 = arith.constant 32 : i32
    %79 = arith.muli %arg0, %c32_i32_20 : i32
    %c9_i32_21 = arith.constant 9 : i32
    %80 = arith.addi %79, %c9_i32_21 : i32
    %81 = arith.index_cast %80 : i32 to index
    %82 = memref.load %arg1[%81] : memref<96xi32, #tpu.memory_space<smem>>
    %83 = vector.broadcast %82 : i32 to vector<32x1xi32>
    %84 = arith.select %78, %83, %76 : vector<32x1xi1>, vector<32x1xi32>
    %c10_i32 = arith.constant 10 : i32
    %85 = vector.broadcast %c10_i32 : i32 to vector<32x1xi32>
    %86 = arith.cmpi eq, %3, %85 : vector<32x1xi32>
    %c32_i32_22 = arith.constant 32 : i32
    %87 = arith.muli %arg0, %c32_i32_22 : i32
    %c10_i32_23 = arith.constant 10 : i32
    %88 = arith.addi %87, %c10_i32_23 : i32
    %89 = arith.index_cast %88 : i32 to index
    %90 = memref.load %arg1[%89] : memref<96xi32, #tpu.memory_space<smem>>
    %91 = vector.broadcast %90 : i32 to vector<32x1xi32>
    %92 = arith.select %86, %91, %84 : vector<32x1xi1>, vector<32x1xi32>
    %c11_i32 = arith.constant 11 : i32
    %93 = vector.broadcast %c11_i32 : i32 to vector<32x1xi32>
    %94 = arith.cmpi eq, %3, %93 : vector<32x1xi32>
    %c32_i32_24 = arith.constant 32 : i32
    %95 = arith.muli %arg0, %c32_i32_24 : i32
    %c11_i32_25 = arith.constant 11 : i32
    %96 = arith.addi %95, %c11_i32_25 : i32
    %97 = arith.index_cast %96 : i32 to index
    %98 = memref.load %arg1[%97] : memref<96xi32, #tpu.memory_space<smem>>
    %99 = vector.broadcast %98 : i32 to vector<32x1xi32>
    %100 = arith.select %94, %99, %92 : vector<32x1xi1>, vector<32x1xi32>
    %c12_i32 = arith.constant 12 : i32
    %101 = vector.broadcast %c12_i32 : i32 to vector<32x1xi32>
    %102 = arith.cmpi eq, %3, %101 : vector<32x1xi32>
    %c32_i32_26 = arith.constant 32 : i32
    %103 = arith.muli %arg0, %c32_i32_26 : i32
    %c12_i32_27 = arith.constant 12 : i32
    %104 = arith.addi %103, %c12_i32_27 : i32
    %105 = arith.index_cast %104 : i32 to index
    %106 = memref.load %arg1[%105] : memref<96xi32, #tpu.memory_space<smem>>
    %107 = vector.broadcast %106 : i32 to vector<32x1xi32>
    %108 = arith.select %102, %107, %100 : vector<32x1xi1>, vector<32x1xi32>
    %c13_i32 = arith.constant 13 : i32
    %109 = vector.broadcast %c13_i32 : i32 to vector<32x1xi32>
    %110 = arith.cmpi eq, %3, %109 : vector<32x1xi32>
    %c32_i32_28 = arith.constant 32 : i32
    %111 = arith.muli %arg0, %c32_i32_28 : i32
    %c13_i32_29 = arith.constant 13 : i32
    %112 = arith.addi %111, %c13_i32_29 : i32
    %113 = arith.index_cast %112 : i32 to index
    %114 = memref.load %arg1[%113] : memref<96xi32, #tpu.memory_space<smem>>
    %115 = vector.broadcast %114 : i32 to vector<32x1xi32>
    %116 = arith.select %110, %115, %108 : vector<32x1xi1>, vector<32x1xi32>
    %c14_i32 = arith.constant 14 : i32
    %117 = vector.broadcast %c14_i32 : i32 to vector<32x1xi32>
    %118 = arith.cmpi eq, %3, %117 : vector<32x1xi32>
    %c32_i32_30 = arith.constant 32 : i32
    %119 = arith.muli %arg0, %c32_i32_30 : i32
    %c14_i32_31 = arith.constant 14 : i32
    %120 = arith.addi %119, %c14_i32_31 : i32
    %121 = arith.index_cast %120 : i32 to index
    %122 = memref.load %arg1[%121] : memref<96xi32, #tpu.memory_space<smem>>
    %123 = vector.broadcast %122 : i32 to vector<32x1xi32>
    %124 = arith.select %118, %123, %116 : vector<32x1xi1>, vector<32x1xi32>
    %c15_i32 = arith.constant 15 : i32
    %125 = vector.broadcast %c15_i32 : i32 to vector<32x1xi32>
    %126 = arith.cmpi eq, %3, %125 : vector<32x1xi32>
    %c32_i32_32 = arith.constant 32 : i32
    %127 = arith.muli %arg0, %c32_i32_32 : i32
    %c15_i32_33 = arith.constant 15 : i32
    %128 = arith.addi %127, %c15_i32_33 : i32
    %129 = arith.index_cast %128 : i32 to index
    %130 = memref.load %arg1[%129] : memref<96xi32, #tpu.memory_space<smem>>
    %131 = vector.broadcast %130 : i32 to vector<32x1xi32>
    %132 = arith.select %126, %131, %124 : vector<32x1xi1>, vector<32x1xi32>
    %c16_i32 = arith.constant 16 : i32
    %133 = vector.broadcast %c16_i32 : i32 to vector<32x1xi32>
    %134 = arith.cmpi eq, %3, %133 : vector<32x1xi32>
    %c32_i32_34 = arith.constant 32 : i32
    %135 = arith.muli %arg0, %c32_i32_34 : i32
    %c16_i32_35 = arith.constant 16 : i32
    %136 = arith.addi %135, %c16_i32_35 : i32
    %137 = arith.index_cast %136 : i32 to index
    %138 = memref.load %arg1[%137] : memref<96xi32, #tpu.memory_space<smem>>
    %139 = vector.broadcast %138 : i32 to vector<32x1xi32>
    %140 = arith.select %134, %139, %132 : vector<32x1xi1>, vector<32x1xi32>
    %c17_i32 = arith.constant 17 : i32
    %141 = vector.broadcast %c17_i32 : i32 to vector<32x1xi32>
    %142 = arith.cmpi eq, %3, %141 : vector<32x1xi32>
    %c32_i32_36 = arith.constant 32 : i32
    %143 = arith.muli %arg0, %c32_i32_36 : i32
    %c17_i32_37 = arith.constant 17 : i32
    %144 = arith.addi %143, %c17_i32_37 : i32
    %145 = arith.index_cast %144 : i32 to index
    %146 = memref.load %arg1[%145] : memref<96xi32, #tpu.memory_space<smem>>
    %147 = vector.broadcast %146 : i32 to vector<32x1xi32>
    %148 = arith.select %142, %147, %140 : vector<32x1xi1>, vector<32x1xi32>
    %c18_i32 = arith.constant 18 : i32
    %149 = vector.broadcast %c18_i32 : i32 to vector<32x1xi32>
    %150 = arith.cmpi eq, %3, %149 : vector<32x1xi32>
    %c32_i32_38 = arith.constant 32 : i32
    %151 = arith.muli %arg0, %c32_i32_38 : i32
    %c18_i32_39 = arith.constant 18 : i32
    %152 = arith.addi %151, %c18_i32_39 : i32
    %153 = arith.index_cast %152 : i32 to index
    %154 = memref.load %arg1[%153] : memref<96xi32, #tpu.memory_space<smem>>
    %155 = vector.broadcast %154 : i32 to vector<32x1xi32>
    %156 = arith.select %150, %155, %148 : vector<32x1xi1>, vector<32x1xi32>
    %c19_i32 = arith.constant 19 : i32
    %157 = vector.broadcast %c19_i32 : i32 to vector<32x1xi32>
    %158 = arith.cmpi eq, %3, %157 : vector<32x1xi32>
    %c32_i32_40 = arith.constant 32 : i32
    %159 = arith.muli %arg0, %c32_i32_40 : i32
    %c19_i32_41 = arith.constant 19 : i32
    %160 = arith.addi %159, %c19_i32_41 : i32
    %161 = arith.index_cast %160 : i32 to index
    %162 = memref.load %arg1[%161] : memref<96xi32, #tpu.memory_space<smem>>
    %163 = vector.broadcast %162 : i32 to vector<32x1xi32>
    %164 = arith.select %158, %163, %156 : vector<32x1xi1>, vector<32x1xi32>
    %c20_i32 = arith.constant 20 : i32
    %165 = vector.broadcast %c20_i32 : i32 to vector<32x1xi32>
    %166 = arith.cmpi eq, %3, %165 : vector<32x1xi32>
    %c32_i32_42 = arith.constant 32 : i32
    %167 = arith.muli %arg0, %c32_i32_42 : i32
    %c20_i32_43 = arith.constant 20 : i32
    %168 = arith.addi %167, %c20_i32_43 : i32
    %169 = arith.index_cast %168 : i32 to index
    %170 = memref.load %arg1[%169] : memref<96xi32, #tpu.memory_space<smem>>
    %171 = vector.broadcast %170 : i32 to vector<32x1xi32>
    %172 = arith.select %166, %171, %164 : vector<32x1xi1>, vector<32x1xi32>
    %c21_i32 = arith.constant 21 : i32
    %173 = vector.broadcast %c21_i32 : i32 to vector<32x1xi32>
    %174 = arith.cmpi eq, %3, %173 : vector<32x1xi32>
    %c32_i32_44 = arith.constant 32 : i32
    %175 = arith.muli %arg0, %c32_i32_44 : i32
    %c21_i32_45 = arith.constant 21 : i32
    %176 = arith.addi %175, %c21_i32_45 : i32
    %177 = arith.index_cast %176 : i32 to index
    %178 = memref.load %arg1[%177] : memref<96xi32, #tpu.memory_space<smem>>
    %179 = vector.broadcast %178 : i32 to vector<32x1xi32>
    %180 = arith.select %174, %179, %172 : vector<32x1xi1>, vector<32x1xi32>
    %c22_i32 = arith.constant 22 : i32
    %181 = vector.broadcast %c22_i32 : i32 to vector<32x1xi32>
    %182 = arith.cmpi eq, %3, %181 : vector<32x1xi32>
    %c32_i32_46 = arith.constant 32 : i32
    %183 = arith.muli %arg0, %c32_i32_46 : i32
    %c22_i32_47 = arith.constant 22 : i32
    %184 = arith.addi %183, %c22_i32_47 : i32
    %185 = arith.index_cast %184 : i32 to index
    %186 = memref.load %arg1[%185] : memref<96xi32, #tpu.memory_space<smem>>
    %187 = vector.broadcast %186 : i32 to vector<32x1xi32>
    %188 = arith.select %182, %187, %180 : vector<32x1xi1>, vector<32x1xi32>
    %c23_i32 = arith.constant 23 : i32
    %189 = vector.broadcast %c23_i32 : i32 to vector<32x1xi32>
    %190 = arith.cmpi eq, %3, %189 : vector<32x1xi32>
    %c32_i32_48 = arith.constant 32 : i32
    %191 = arith.muli %arg0, %c32_i32_48 : i32
    %c23_i32_49 = arith.constant 23 : i32
    %192 = arith.addi %191, %c23_i32_49 : i32
    %193 = arith.index_cast %192 : i32 to index
    %194 = memref.load %arg1[%193] : memref<96xi32, #tpu.memory_space<smem>>
    %195 = vector.broadcast %194 : i32 to vector<32x1xi32>
    %196 = arith.select %190, %195, %188 : vector<32x1xi1>, vector<32x1xi32>
    %c24_i32 = arith.constant 24 : i32
    %197 = vector.broadcast %c24_i32 : i32 to vector<32x1xi32>
    %198 = arith.cmpi eq, %3, %197 : vector<32x1xi32>
    %c32_i32_50 = arith.constant 32 : i32
    %199 = arith.muli %arg0, %c32_i32_50 : i32
    %c24_i32_51 = arith.constant 24 : i32
    %200 = arith.addi %199, %c24_i32_51 : i32
    %201 = arith.index_cast %200 : i32 to index
    %202 = memref.load %arg1[%201] : memref<96xi32, #tpu.memory_space<smem>>
    %203 = vector.broadcast %202 : i32 to vector<32x1xi32>
    %204 = arith.select %198, %203, %196 : vector<32x1xi1>, vector<32x1xi32>
    %c25_i32 = arith.constant 25 : i32
    %205 = vector.broadcast %c25_i32 : i32 to vector<32x1xi32>
    %206 = arith.cmpi eq, %3, %205 : vector<32x1xi32>
    %c32_i32_52 = arith.constant 32 : i32
    %207 = arith.muli %arg0, %c32_i32_52 : i32
    %c25_i32_53 = arith.constant 25 : i32
    %208 = arith.addi %207, %c25_i32_53 : i32
    %209 = arith.index_cast %208 : i32 to index
    %210 = memref.load %arg1[%209] : memref<96xi32, #tpu.memory_space<smem>>
    %211 = vector.broadcast %210 : i32 to vector<32x1xi32>
    %212 = arith.select %206, %211, %204 : vector<32x1xi1>, vector<32x1xi32>
    %c26_i32 = arith.constant 26 : i32
    %213 = vector.broadcast %c26_i32 : i32 to vector<32x1xi32>
    %214 = arith.cmpi eq, %3, %213 : vector<32x1xi32>
    %c32_i32_54 = arith.constant 32 : i32
    %215 = arith.muli %arg0, %c32_i32_54 : i32
    %c26_i32_55 = arith.constant 26 : i32
    %216 = arith.addi %215, %c26_i32_55 : i32
    %217 = arith.index_cast %216 : i32 to index
    %218 = memref.load %arg1[%217] : memref<96xi32, #tpu.memory_space<smem>>
    %219 = vector.broadcast %218 : i32 to vector<32x1xi32>
    %220 = arith.select %214, %219, %212 : vector<32x1xi1>, vector<32x1xi32>
    %c27_i32 = arith.constant 27 : i32
    %221 = vector.broadcast %c27_i32 : i32 to vector<32x1xi32>
    %222 = arith.cmpi eq, %3, %221 : vector<32x1xi32>
    %c32_i32_56 = arith.constant 32 : i32
    %223 = arith.muli %arg0, %c32_i32_56 : i32
    %c27_i32_57 = arith.constant 27 : i32
    %224 = arith.addi %223, %c27_i32_57 : i32
    %225 = arith.index_cast %224 : i32 to index
    %226 = memref.load %arg1[%225] : memref<96xi32, #tpu.memory_space<smem>>
    %227 = vector.broadcast %226 : i32 to vector<32x1xi32>
    %228 = arith.select %222, %227, %220 : vector<32x1xi1>, vector<32x1xi32>
    %c28_i32 = arith.constant 28 : i32
    %229 = vector.broadcast %c28_i32 : i32 to vector<32x1xi32>
    %230 = arith.cmpi eq, %3, %229 : vector<32x1xi32>
    %c32_i32_58 = arith.constant 32 : i32
    %231 = arith.muli %arg0, %c32_i32_58 : i32
    %c28_i32_59 = arith.constant 28 : i32
    %232 = arith.addi %231, %c28_i32_59 : i32
    %233 = arith.index_cast %232 : i32 to index
    %234 = memref.load %arg1[%233] : memref<96xi32, #tpu.memory_space<smem>>
    %235 = vector.broadcast %234 : i32 to vector<32x1xi32>
    %236 = arith.select %230, %235, %228 : vector<32x1xi1>, vector<32x1xi32>
    %c29_i32 = arith.constant 29 : i32
    %237 = vector.broadcast %c29_i32 : i32 to vector<32x1xi32>
    %238 = arith.cmpi eq, %3, %237 : vector<32x1xi32>
    %c32_i32_60 = arith.constant 32 : i32
    %239 = arith.muli %arg0, %c32_i32_60 : i32
    %c29_i32_61 = arith.constant 29 : i32
    %240 = arith.addi %239, %c29_i32_61 : i32
    %241 = arith.index_cast %240 : i32 to index
    %242 = memref.load %arg1[%241] : memref<96xi32, #tpu.memory_space<smem>>
    %243 = vector.broadcast %242 : i32 to vector<32x1xi32>
    %244 = arith.select %238, %243, %236 : vector<32x1xi1>, vector<32x1xi32>
    %c30_i32 = arith.constant 30 : i32
    %245 = vector.broadcast %c30_i32 : i32 to vector<32x1xi32>
    %246 = arith.cmpi eq, %3, %245 : vector<32x1xi32>
    %c32_i32_62 = arith.constant 32 : i32
    %247 = arith.muli %arg0, %c32_i32_62 : i32
    %c30_i32_63 = arith.constant 30 : i32
    %248 = arith.addi %247, %c30_i32_63 : i32
    %249 = arith.index_cast %248 : i32 to index
    %250 = memref.load %arg1[%249] : memref<96xi32, #tpu.memory_space<smem>>
    %251 = vector.broadcast %250 : i32 to vector<32x1xi32>
    %252 = arith.select %246, %251, %244 : vector<32x1xi1>, vector<32x1xi32>
    %c31_i32 = arith.constant 31 : i32
    %253 = vector.broadcast %c31_i32 : i32 to vector<32x1xi32>
    %254 = arith.cmpi eq, %3, %253 : vector<32x1xi32>
    %c32_i32_64 = arith.constant 32 : i32
    %255 = arith.muli %arg0, %c32_i32_64 : i32
    %c31_i32_65 = arith.constant 31 : i32
    %256 = arith.addi %255, %c31_i32_65 : i32
    %257 = arith.index_cast %256 : i32 to index
    %258 = memref.load %arg1[%257] : memref<96xi32, #tpu.memory_space<smem>>
    %259 = vector.broadcast %258 : i32 to vector<32x1xi32>
    %260 = arith.select %254, %259, %252 : vector<32x1xi1>, vector<32x1xi32>
    %261 = tpu.iota {dimensions = array<i32: 1>} : vector<32x64xi32>
    %262 = vector.broadcast %260 : vector<32x1xi32> to vector<32x64xi32>
    %263 = arith.cmpi eq, %261, %262 : vector<32x64xi32>
    %264 = arith.extui %263 : vector<32x64xi1> to vector<32x64xi32>
    %265 = arith.sitofp %264 : vector<32x64xi32> to vector<32x64xf32>
    %c0 = arith.constant 0 : index
    %c0_66 = arith.constant 0 : index
    %266 = vector.load %arg2[%c0, %c0_66] : memref<64x128xf32, #tpu.memory_space<vmem>>, vector<64x128xf32>
    %cst = arith.constant dense<0.000000e+00> : vector<32x128xf32>
    %267 = tpu.matmul %265, %266, %cst {dimension_numbers = #tpu.dot_dimension_numbers<[1], [0], [0], [1], [0, 0, 1, 1], [], []>} : vector<32x64xf32>, vector<64x128xf32>, vector<32x128xf32> -> vector<32x128xf32>
    %c0_67 = arith.constant 0 : index
    %c0_68 = arith.constant 0 : index
    %268 = vector.load %arg3[%c0_67, %c0_68] : memref<128x128xf32, #tpu.memory_space<vmem>>, vector<128x128xf32>
    %cst_69 = arith.constant dense<0.000000e+00> : vector<32x128xf32>
    %269 = tpu.matmul %267, %268, %cst_69 {dimension_numbers = #tpu.dot_dimension_numbers<[1], [0], [0], [1], [0, 0, 1, 1], [], []>} : vector<32x128xf32>, vector<128x128xf32>, vector<32x128xf32> -> vector<32x128xf32>
    %c0_70 = arith.constant 0 : index
    %c0_71 = arith.constant 0 : index
    %270 = vector.load %arg5[%c0_70, %c0_71] : memref<1x128xf32, #tpu.memory_space<vmem>>, vector<1x128xf32>
    %271 = vector.broadcast %270 : vector<1x128xf32> to vector<32x128xf32>
    %272 = arith.addf %269, %271 : vector<32x128xf32>
    %c0_72 = arith.constant 0 : index
    %c0_73 = arith.constant 0 : index
    %273 = vector.load %arg12[%c0_72, %c0_73] : memref<32x128xf32, #tpu.memory_space<vmem>>, vector<32x128xf32>
    tpu.vector_store %arg12[%c0_72, %c0_73], %272 {strides = array<i32>} : memref<32x128xf32, #tpu.memory_space<vmem>>, vector<32x128xf32>,
    %c0_74 = arith.constant 0 : index
    %c0_75 = arith.constant 0 : index
    %274 = vector.load %arg11[%c0_74, %c0_75] : memref<1x128xf32, #tpu.memory_space<vmem>>, vector<1x128xf32>
    %c0_76 = arith.constant 0 : index
    %c0_77 = arith.constant 0 : index
    %275 = vector.load %arg4[%c0_76, %c0_77] : memref<128x128xf32, #tpu.memory_space<vmem>>, vector<128x128xf32>
    %cst_78 = arith.constant dense<0.000000e+00> : vector<1x128xf32>
    %276 = tpu.matmul %274, %275, %cst_78 {dimension_numbers = #tpu.dot_dimension_numbers<[1], [0], [0], [1], [0, 0, 1, 1], [], []>} : vector<1x128xf32>, vector<128x128xf32>, vector<1x128xf32> -> vector<1x128xf32>
    %c0_79 = arith.constant 0 : index
    %c0_80 = arith.constant 0 : index
    %277 = vector.load %arg12[%c0_79, %c0_80] : memref<32x128xf32, #tpu.memory_space<vmem>>, vector<1x128xf32>
    %278 = arith.addf %276, %277 : vector<1x128xf32>
    %279 = math.tanh %278 : vector<1x128xf32>
    %c0_81 = arith.constant 0 : index
    %c0_82 = arith.constant 0 : index
    %280 = vector.load %arg13[%c0_81, %c0_82] : memref<32x128xf32, #tpu.memory_space<vmem>>, vector<1x128xf32>
    tpu.vector_store %arg13[%c0_81, %c0_82], %279 {strides = array<i32>} : memref<32x128xf32, #tpu.memory_space<vmem>>, vector<1x128xf32>,
    %cst_83 = arith.constant dense<0.000000e+00> : vector<1x128xf32>
    %281 = tpu.matmul %279, %275, %cst_83 {dimension_numbers = #tpu.dot_dimension_numbers<[1], [0], [0], [1], [0, 0, 1, 1], [], []>} : vector<1x128xf32>, vector<128x128xf32>, vector<1x128xf32> -> vector<1x128xf32>
    %c1 = arith.constant 1 : index
    %c0_84 = arith.constant 0 : index
    %282 = vector.load %arg12[%c1, %c0_84] : memref<32x128xf32, #tpu.memory_space<vmem>>, vector<1x128xf32>
    %283 = arith.addf %281, %282 : vector<1x128xf32>
    %284 = math.tanh %283 : vector<1x128xf32>
    %c1_85 = arith.constant 1 : index
    %c0_86 = arith.constant 0 : index
    %285 = vector.load %arg13[%c1_85, %c0_86] : memref<32x128xf32, #tpu.memory_space<vmem>>, vector<1x128xf32>
    tpu.vector_store %arg13[%c1_85, %c0_86], %284 {strides = array<i32>} : memref<32x128xf32, #tpu.memory_space<vmem>>, vector<1x128xf32>,
    %cst_87 = arith.constant dense<0.000000e+00> : vector<1x128xf32>
    %286 = tpu.matmul %284, %275, %cst_87 {dimension_numbers = #tpu.dot_dimension_numbers<[1], [0], [0], [1], [0, 0, 1, 1], [], []>} : vector<1x128xf32>, vector<128x128xf32>, vector<1x128xf32> -> vector<1x128xf32>
    %c2 = arith.constant 2 : index
    %c0_88 = arith.constant 0 : index
    %287 = vector.load %arg12[%c2, %c0_88] : memref<32x128xf32, #tpu.memory_space<vmem>>, vector<1x128xf32>
    %288 = arith.addf %286, %287 : vector<1x128xf32>
    %289 = math.tanh %288 : vector<1x128xf32>
    %c2_89 = arith.constant 2 : index
    %c0_90 = arith.constant 0 : index
    %290 = vector.load %arg13[%c2_89, %c0_90] : memref<32x128xf32, #tpu.memory_space<vmem>>, vector<1x128xf32>
    tpu.vector_store %arg13[%c2_89, %c0_90], %289 {strides = array<i32>} : memref<32x128xf32, #tpu.memory_space<vmem>>, vector<1x128xf32>,
    %cst_91 = arith.constant dense<0.000000e+00> : vector<1x128xf32>
    %291 = tpu.matmul %289, %275, %cst_91 {dimension_numbers = #tpu.dot_dimension_numbers<[1], [0], [0], [1], [0, 0, 1, 1], [], []>} : vector<1x128xf32>, vector<128x128xf32>, vector<1x128xf32> -> vector<1x128xf32>
    %c3 = arith.constant 3 : index
    %c0_92 = arith.constant 0 : index
    %292 = vector.load %arg12[%c3, %c0_92] : memref<32x128xf32, #tpu.memory_space<vmem>>, vector<1x128xf32>
    %293 = arith.addf %291, %292 : vector<1x128xf32>
    %294 = math.tanh %293 : vector<1x128xf32>
    %c3_93 = arith.constant 3 : index
    %c0_94 = arith.constant 0 : index
    %295 = vector.load %arg13[%c3_93, %c0_94] : memref<32x128xf32, #tpu.memory_space<vmem>>, vector<1x128xf32>
    tpu.vector_store %arg13[%c3_93, %c0_94], %294 {strides = array<i32>} : memref<32x128xf32, #tpu.memory_space<vmem>>, vector<1x128xf32>,
    %cst_95 = arith.constant dense<0.000000e+00> : vector<1x128xf32>
    %296 = tpu.matmul %294, %275, %cst_95 {dimension_numbers = #tpu.dot_dimension_numbers<[1], [0], [0], [1], [0, 0, 1, 1], [], []>} : vector<1x128xf32>, vector<128x128xf32>, vector<1x128xf32> -> vector<1x128xf32>
    %c4 = arith.constant 4 : index
    %c0_96 = arith.constant 0 : index
    %297 = vector.load %arg12[%c4, %c0_96] : memref<32x128xf32, #tpu.memory_space<vmem>>, vector<1x128xf32>
    %298 = arith.addf %296, %297 : vector<1x128xf32>
    %299 = math.tanh %298 : vector<1x128xf32>
    %c4_97 = arith.constant 4 : index
    %c0_98 = arith.constant 0 : index
    %300 = vector.load %arg13[%c4_97, %c0_98] : memref<32x128xf32, #tpu.memory_space<vmem>>, vector<1x128xf32>
    tpu.vector_store %arg13[%c4_97, %c0_98], %299 {strides = array<i32>} : memref<32x128xf32, #tpu.memory_space<vmem>>, vector<1x128xf32>,
    %cst_99 = arith.constant dense<0.000000e+00> : vector<1x128xf32>
    %301 = tpu.matmul %299, %275, %cst_99 {dimension_numbers = #tpu.dot_dimension_numbers<[1], [0], [0], [1], [0, 0, 1, 1], [], []>} : vector<1x128xf32>, vector<128x128xf32>, vector<1x128xf32> -> vector<1x128xf32>
    %c5 = arith.constant 5 : index
    %c0_100 = arith.constant 0 : index
    %302 = vector.load %arg12[%c5, %c0_100] : memref<32x128xf32, #tpu.memory_space<vmem>>, vector<1x128xf32>
    %303 = arith.addf %301, %302 : vector<1x128xf32>
    %304 = math.tanh %303 : vector<1x128xf32>
    %c5_101 = arith.constant 5 : index
    %c0_102 = arith.constant 0 : index
    %305 = vector.load %arg13[%c5_101, %c0_102] : memref<32x128xf32, #tpu.memory_space<vmem>>, vector<1x128xf32>
    tpu.vector_store %arg13[%c5_101, %c0_102], %304 {strides = array<i32>} : memref<32x128xf32, #tpu.memory_space<vmem>>, vector<1x128xf32>,
    %cst_103 = arith.constant dense<0.000000e+00> : vector<1x128xf32>
    %306 = tpu.matmul %304, %275, %cst_103 {dimension_numbers = #tpu.dot_dimension_numbers<[1], [0], [0], [1], [0, 0, 1, 1], [], []>} : vector<1x128xf32>, vector<128x128xf32>, vector<1x128xf32> -> vector<1x128xf32>
    %c6 = arith.constant 6 : index
    %c0_104 = arith.constant 0 : index
    %307 = vector.load %arg12[%c6, %c0_104] : memref<32x128xf32, #tpu.memory_space<vmem>>, vector<1x128xf32>
    %308 = arith.addf %306, %307 : vector<1x128xf32>
    %309 = math.tanh %308 : vector<1x128xf32>
    %c6_105 = arith.constant 6 : index
    %c0_106 = arith.constant 0 : index
    %310 = vector.load %arg13[%c6_105, %c0_106] : memref<32x128xf32, #tpu.memory_space<vmem>>, vector<1x128xf32>
    tpu.vector_store %arg13[%c6_105, %c0_106], %309 {strides = array<i32>} : memref<32x128xf32, #tpu.memory_space<vmem>>, vector<1x128xf32>,
    %cst_107 = arith.constant dense<0.000000e+00> : vector<1x128xf32>
    %311 = tpu.matmul %309, %275, %cst_107 {dimension_numbers = #tpu.dot_dimension_numbers<[1], [0], [0], [1], [0, 0, 1, 1], [], []>} : vector<1x128xf32>, vector<128x128xf32>, vector<1x128xf32> -> vector<1x128xf32>
    %c7 = arith.constant 7 : index
    %c0_108 = arith.constant 0 : index
    %312 = vector.load %arg12[%c7, %c0_108] : memref<32x128xf32, #tpu.memory_space<vmem>>, vector<1x128xf32>
    %313 = arith.addf %311, %312 : vector<1x128xf32>
    %314 = math.tanh %313 : vector<1x128xf32>
    %c7_109 = arith.constant 7 : index
    %c0_110 = arith.constant 0 : index
    %315 = vector.load %arg13[%c7_109, %c0_110] : memref<32x128xf32, #tpu.memory_space<vmem>>, vector<1x128xf32>
    tpu.vector_store %arg13[%c7_109, %c0_110], %314 {strides = array<i32>} : memref<32x128xf32, #tpu.memory_space<vmem>>, vector<1x128xf32>,
    %cst_111 = arith.constant dense<0.000000e+00> : vector<1x128xf32>
    %316 = tpu.matmul %314, %275, %cst_111 {dimension_numbers = #tpu.dot_dimension_numbers<[1], [0], [0], [1], [0, 0, 1, 1], [], []>} : vector<1x128xf32>, vector<128x128xf32>, vector<1x128xf32> -> vector<1x128xf32>
    %c8 = arith.constant 8 : index
    %c0_112 = arith.constant 0 : index
    %317 = vector.load %arg12[%c8, %c0_112] : memref<32x128xf32, #tpu.memory_space<vmem>>, vector<1x128xf32>
    %318 = arith.addf %316, %317 : vector<1x128xf32>
    %319 = math.tanh %318 : vector<1x128xf32>
    %c8_113 = arith.constant 8 : index
    %c0_114 = arith.constant 0 : index
    %320 = vector.load %arg13[%c8_113, %c0_114] : memref<32x128xf32, #tpu.memory_space<vmem>>, vector<1x128xf32>
    tpu.vector_store %arg13[%c8_113, %c0_114], %319 {strides = array<i32>} : memref<32x128xf32, #tpu.memory_space<vmem>>, vector<1x128xf32>,
    %cst_115 = arith.constant dense<0.000000e+00> : vector<1x128xf32>
    %321 = tpu.matmul %319, %275, %cst_115 {dimension_numbers = #tpu.dot_dimension_numbers<[1], [0], [0], [1], [0, 0, 1, 1], [], []>} : vector<1x128xf32>, vector<128x128xf32>, vector<1x128xf32> -> vector<1x128xf32>
    %c9 = arith.constant 9 : index
    %c0_116 = arith.constant 0 : index
    %322 = vector.load %arg12[%c9, %c0_116] : memref<32x128xf32, #tpu.memory_space<vmem>>, vector<1x128xf32>
    %323 = arith.addf %321, %322 : vector<1x128xf32>
    %324 = math.tanh %323 : vector<1x128xf32>
    %c9_117 = arith.constant 9 : index
    %c0_118 = arith.constant 0 : index
    %325 = vector.load %arg13[%c9_117, %c0_118] : memref<32x128xf32, #tpu.memory_space<vmem>>, vector<1x128xf32>
    tpu.vector_store %arg13[%c9_117, %c0_118], %324 {strides = array<i32>} : memref<32x128xf32, #tpu.memory_space<vmem>>, vector<1x128xf32>,
    %cst_119 = arith.constant dense<0.000000e+00> : vector<1x128xf32>
    %326 = tpu.matmul %324, %275, %cst_119 {dimension_numbers = #tpu.dot_dimension_numbers<[1], [0], [0], [1], [0, 0, 1, 1], [], []>} : vector<1x128xf32>, vector<128x128xf32>, vector<1x128xf32> -> vector<1x128xf32>
    %c10 = arith.constant 10 : index
    %c0_120 = arith.constant 0 : index
    %327 = vector.load %arg12[%c10, %c0_120] : memref<32x128xf32, #tpu.memory_space<vmem>>, vector<1x128xf32>
    %328 = arith.addf %326, %327 : vector<1x128xf32>
    %329 = math.tanh %328 : vector<1x128xf32>
    %c10_121 = arith.constant 10 : index
    %c0_122 = arith.constant 0 : index
    %330 = vector.load %arg13[%c10_121, %c0_122] : memref<32x128xf32, #tpu.memory_space<vmem>>, vector<1x128xf32>
    tpu.vector_store %arg13[%c10_121, %c0_122], %329 {strides = array<i32>} : memref<32x128xf32, #tpu.memory_space<vmem>>, vector<1x128xf32>,
    %cst_123 = arith.constant dense<0.000000e+00> : vector<1x128xf32>
    %331 = tpu.matmul %329, %275, %cst_123 {dimension_numbers = #tpu.dot_dimension_numbers<[1], [0], [0], [1], [0, 0, 1, 1], [], []>} : vector<1x128xf32>, vector<128x128xf32>, vector<1x128xf32> -> vector<1x128xf32>
    %c11 = arith.constant 11 : index
    %c0_124 = arith.constant 0 : index
    %332 = vector.load %arg12[%c11, %c0_124] : memref<32x128xf32, #tpu.memory_space<vmem>>, vector<1x128xf32>
    %333 = arith.addf %331, %332 : vector<1x128xf32>
    %334 = math.tanh %333 : vector<1x128xf32>
    %c11_125 = arith.constant 11 : index
    %c0_126 = arith.constant 0 : index
    %335 = vector.load %arg13[%c11_125, %c0_126] : memref<32x128xf32, #tpu.memory_space<vmem>>, vector<1x128xf32>
    tpu.vector_store %arg13[%c11_125, %c0_126], %334 {strides = array<i32>} : memref<32x128xf32, #tpu.memory_space<vmem>>, vector<1x128xf32>,
    %cst_127 = arith.constant dense<0.000000e+00> : vector<1x128xf32>
    %336 = tpu.matmul %334, %275, %cst_127 {dimension_numbers = #tpu.dot_dimension_numbers<[1], [0], [0], [1], [0, 0, 1, 1], [], []>} : vector<1x128xf32>, vector<128x128xf32>, vector<1x128xf32> -> vector<1x128xf32>
    %c12 = arith.constant 12 : index
    %c0_128 = arith.constant 0 : index
    %337 = vector.load %arg12[%c12, %c0_128] : memref<32x128xf32, #tpu.memory_space<vmem>>, vector<1x128xf32>
    %338 = arith.addf %336, %337 : vector<1x128xf32>
    %339 = math.tanh %338 : vector<1x128xf32>
    %c12_129 = arith.constant 12 : index
    %c0_130 = arith.constant 0 : index
    %340 = vector.load %arg13[%c12_129, %c0_130] : memref<32x128xf32, #tpu.memory_space<vmem>>, vector<1x128xf32>
    tpu.vector_store %arg13[%c12_129, %c0_130], %339 {strides = array<i32>} : memref<32x128xf32, #tpu.memory_space<vmem>>, vector<1x128xf32>,
    %cst_131 = arith.constant dense<0.000000e+00> : vector<1x128xf32>
    %341 = tpu.matmul %339, %275, %cst_131 {dimension_numbers = #tpu.dot_dimension_numbers<[1], [0], [0], [1], [0, 0, 1, 1], [], []>} : vector<1x128xf32>, vector<128x128xf32>, vector<1x128xf32> -> vector<1x128xf32>
    %c13 = arith.constant 13 : index
    %c0_132 = arith.constant 0 : index
    %342 = vector.load %arg12[%c13, %c0_132] : memref<32x128xf32, #tpu.memory_space<vmem>>, vector<1x128xf32>
    %343 = arith.addf %341, %342 : vector<1x128xf32>
    %344 = math.tanh %343 : vector<1x128xf32>
    %c13_133 = arith.constant 13 : index
    %c0_134 = arith.constant 0 : index
    %345 = vector.load %arg13[%c13_133, %c0_134] : memref<32x128xf32, #tpu.memory_space<vmem>>, vector<1x128xf32>
    tpu.vector_store %arg13[%c13_133, %c0_134], %344 {strides = array<i32>} : memref<32x128xf32, #tpu.memory_space<vmem>>, vector<1x128xf32>,
    %cst_135 = arith.constant dense<0.000000e+00> : vector<1x128xf32>
    %346 = tpu.matmul %344, %275, %cst_135 {dimension_numbers = #tpu.dot_dimension_numbers<[1], [0], [0], [1], [0, 0, 1, 1], [], []>} : vector<1x128xf32>, vector<128x128xf32>, vector<1x128xf32> -> vector<1x128xf32>
    %c14 = arith.constant 14 : index
    %c0_136 = arith.constant 0 : index
    %347 = vector.load %arg12[%c14, %c0_136] : memref<32x128xf32, #tpu.memory_space<vmem>>, vector<1x128xf32>
    %348 = arith.addf %346, %347 : vector<1x128xf32>
    %349 = math.tanh %348 : vector<1x128xf32>
    %c14_137 = arith.constant 14 : index
    %c0_138 = arith.constant 0 : index
    %350 = vector.load %arg13[%c14_137, %c0_138] : memref<32x128xf32, #tpu.memory_space<vmem>>, vector<1x128xf32>
    tpu.vector_store %arg13[%c14_137, %c0_138], %349 {strides = array<i32>} : memref<32x128xf32, #tpu.memory_space<vmem>>, vector<1x128xf32>,
    %cst_139 = arith.constant dense<0.000000e+00> : vector<1x128xf32>
    %351 = tpu.matmul %349, %275, %cst_139 {dimension_numbers = #tpu.dot_dimension_numbers<[1], [0], [0], [1], [0, 0, 1, 1], [], []>} : vector<1x128xf32>, vector<128x128xf32>, vector<1x128xf32> -> vector<1x128xf32>
    %c15 = arith.constant 15 : index
    %c0_140 = arith.constant 0 : index
    %352 = vector.load %arg12[%c15, %c0_140] : memref<32x128xf32, #tpu.memory_space<vmem>>, vector<1x128xf32>
    %353 = arith.addf %351, %352 : vector<1x128xf32>
    %354 = math.tanh %353 : vector<1x128xf32>
    %c15_141 = arith.constant 15 : index
    %c0_142 = arith.constant 0 : index
    %355 = vector.load %arg13[%c15_141, %c0_142] : memref<32x128xf32, #tpu.memory_space<vmem>>, vector<1x128xf32>
    tpu.vector_store %arg13[%c15_141, %c0_142], %354 {strides = array<i32>} : memref<32x128xf32, #tpu.memory_space<vmem>>, vector<1x128xf32>,
    %cst_143 = arith.constant dense<0.000000e+00> : vector<1x128xf32>
    %356 = tpu.matmul %354, %275, %cst_143 {dimension_numbers = #tpu.dot_dimension_numbers<[1], [0], [0], [1], [0, 0, 1, 1], [], []>} : vector<1x128xf32>, vector<128x128xf32>, vector<1x128xf32> -> vector<1x128xf32>
    %c16 = arith.constant 16 : index
    %c0_144 = arith.constant 0 : index
    %357 = vector.load %arg12[%c16, %c0_144] : memref<32x128xf32, #tpu.memory_space<vmem>>, vector<1x128xf32>
    %358 = arith.addf %356, %357 : vector<1x128xf32>
    %359 = math.tanh %358 : vector<1x128xf32>
    %c16_145 = arith.constant 16 : index
    %c0_146 = arith.constant 0 : index
    %360 = vector.load %arg13[%c16_145, %c0_146] : memref<32x128xf32, #tpu.memory_space<vmem>>, vector<1x128xf32>
    tpu.vector_store %arg13[%c16_145, %c0_146], %359 {strides = array<i32>} : memref<32x128xf32, #tpu.memory_space<vmem>>, vector<1x128xf32>,
    %cst_147 = arith.constant dense<0.000000e+00> : vector<1x128xf32>
    %361 = tpu.matmul %359, %275, %cst_147 {dimension_numbers = #tpu.dot_dimension_numbers<[1], [0], [0], [1], [0, 0, 1, 1], [], []>} : vector<1x128xf32>, vector<128x128xf32>, vector<1x128xf32> -> vector<1x128xf32>
    %c17 = arith.constant 17 : index
    %c0_148 = arith.constant 0 : index
    %362 = vector.load %arg12[%c17, %c0_148] : memref<32x128xf32, #tpu.memory_space<vmem>>, vector<1x128xf32>
    %363 = arith.addf %361, %362 : vector<1x128xf32>
    %364 = math.tanh %363 : vector<1x128xf32>
    %c17_149 = arith.constant 17 : index
    %c0_150 = arith.constant 0 : index
    %365 = vector.load %arg13[%c17_149, %c0_150] : memref<32x128xf32, #tpu.memory_space<vmem>>, vector<1x128xf32>
    tpu.vector_store %arg13[%c17_149, %c0_150], %364 {strides = array<i32>} : memref<32x128xf32, #tpu.memory_space<vmem>>, vector<1x128xf32>,
    %cst_151 = arith.constant dense<0.000000e+00> : vector<1x128xf32>
    %366 = tpu.matmul %364, %275, %cst_151 {dimension_numbers = #tpu.dot_dimension_numbers<[1], [0], [0], [1], [0, 0, 1, 1], [], []>} : vector<1x128xf32>, vector<128x128xf32>, vector<1x128xf32> -> vector<1x128xf32>
    %c18 = arith.constant 18 : index
    %c0_152 = arith.constant 0 : index
    %367 = vector.load %arg12[%c18, %c0_152] : memref<32x128xf32, #tpu.memory_space<vmem>>, vector<1x128xf32>
    %368 = arith.addf %366, %367 : vector<1x128xf32>
    %369 = math.tanh %368 : vector<1x128xf32>
    %c18_153 = arith.constant 18 : index
    %c0_154 = arith.constant 0 : index
    %370 = vector.load %arg13[%c18_153, %c0_154] : memref<32x128xf32, #tpu.memory_space<vmem>>, vector<1x128xf32>
    tpu.vector_store %arg13[%c18_153, %c0_154], %369 {strides = array<i32>} : memref<32x128xf32, #tpu.memory_space<vmem>>, vector<1x128xf32>,
    %cst_155 = arith.constant dense<0.000000e+00> : vector<1x128xf32>
    %371 = tpu.matmul %369, %275, %cst_155 {dimension_numbers = #tpu.dot_dimension_numbers<[1], [0], [0], [1], [0, 0, 1, 1], [], []>} : vector<1x128xf32>, vector<128x128xf32>, vector<1x128xf32> -> vector<1x128xf32>
    %c19 = arith.constant 19 : index
    %c0_156 = arith.constant 0 : index
    %372 = vector.load %arg12[%c19, %c0_156] : memref<32x128xf32, #tpu.memory_space<vmem>>, vector<1x128xf32>
    %373 = arith.addf %371, %372 : vector<1x128xf32>
    %374 = math.tanh %373 : vector<1x128xf32>
    %c19_157 = arith.constant 19 : index
    %c0_158 = arith.constant 0 : index
    %375 = vector.load %arg13[%c19_157, %c0_158] : memref<32x128xf32, #tpu.memory_space<vmem>>, vector<1x128xf32>
    tpu.vector_store %arg13[%c19_157, %c0_158], %374 {strides = array<i32>} : memref<32x128xf32, #tpu.memory_space<vmem>>, vector<1x128xf32>,
    %cst_159 = arith.constant dense<0.000000e+00> : vector<1x128xf32>
    %376 = tpu.matmul %374, %275, %cst_159 {dimension_numbers = #tpu.dot_dimension_numbers<[1], [0], [0], [1], [0, 0, 1, 1], [], []>} : vector<1x128xf32>, vector<128x128xf32>, vector<1x128xf32> -> vector<1x128xf32>
    %c20 = arith.constant 20 : index
    %c0_160 = arith.constant 0 : index
    %377 = vector.load %arg12[%c20, %c0_160] : memref<32x128xf32, #tpu.memory_space<vmem>>, vector<1x128xf32>
    %378 = arith.addf %376, %377 : vector<1x128xf32>
    %379 = math.tanh %378 : vector<1x128xf32>
    %c20_161 = arith.constant 20 : index
    %c0_162 = arith.constant 0 : index
    %380 = vector.load %arg13[%c20_161, %c0_162] : memref<32x128xf32, #tpu.memory_space<vmem>>, vector<1x128xf32>
    tpu.vector_store %arg13[%c20_161, %c0_162], %379 {strides = array<i32>} : memref<32x128xf32, #tpu.memory_space<vmem>>, vector<1x128xf32>,
    %cst_163 = arith.constant dense<0.000000e+00> : vector<1x128xf32>
    %381 = tpu.matmul %379, %275, %cst_163 {dimension_numbers = #tpu.dot_dimension_numbers<[1], [0], [0], [1], [0, 0, 1, 1], [], []>} : vector<1x128xf32>, vector<128x128xf32>, vector<1x128xf32> -> vector<1x128xf32>
    %c21 = arith.constant 21 : index
    %c0_164 = arith.constant 0 : index
    %382 = vector.load %arg12[%c21, %c0_164] : memref<32x128xf32, #tpu.memory_space<vmem>>, vector<1x128xf32>
    %383 = arith.addf %381, %382 : vector<1x128xf32>
    %384 = math.tanh %383 : vector<1x128xf32>
    %c21_165 = arith.constant 21 : index
    %c0_166 = arith.constant 0 : index
    %385 = vector.load %arg13[%c21_165, %c0_166] : memref<32x128xf32, #tpu.memory_space<vmem>>, vector<1x128xf32>
    tpu.vector_store %arg13[%c21_165, %c0_166], %384 {strides = array<i32>} : memref<32x128xf32, #tpu.memory_space<vmem>>, vector<1x128xf32>,
    %cst_167 = arith.constant dense<0.000000e+00> : vector<1x128xf32>
    %386 = tpu.matmul %384, %275, %cst_167 {dimension_numbers = #tpu.dot_dimension_numbers<[1], [0], [0], [1], [0, 0, 1, 1], [], []>} : vector<1x128xf32>, vector<128x128xf32>, vector<1x128xf32> -> vector<1x128xf32>
    %c22 = arith.constant 22 : index
    %c0_168 = arith.constant 0 : index
    %387 = vector.load %arg12[%c22, %c0_168] : memref<32x128xf32, #tpu.memory_space<vmem>>, vector<1x128xf32>
    %388 = arith.addf %386, %387 : vector<1x128xf32>
    %389 = math.tanh %388 : vector<1x128xf32>
    %c22_169 = arith.constant 22 : index
    %c0_170 = arith.constant 0 : index
    %390 = vector.load %arg13[%c22_169, %c0_170] : memref<32x128xf32, #tpu.memory_space<vmem>>, vector<1x128xf32>
    tpu.vector_store %arg13[%c22_169, %c0_170], %389 {strides = array<i32>} : memref<32x128xf32, #tpu.memory_space<vmem>>, vector<1x128xf32>,
    %cst_171 = arith.constant dense<0.000000e+00> : vector<1x128xf32>
    %391 = tpu.matmul %389, %275, %cst_171 {dimension_numbers = #tpu.dot_dimension_numbers<[1], [0], [0], [1], [0, 0, 1, 1], [], []>} : vector<1x128xf32>, vector<128x128xf32>, vector<1x128xf32> -> vector<1x128xf32>
    %c23 = arith.constant 23 : index
    %c0_172 = arith.constant 0 : index
    %392 = vector.load %arg12[%c23, %c0_172] : memref<32x128xf32, #tpu.memory_space<vmem>>, vector<1x128xf32>
    %393 = arith.addf %391, %392 : vector<1x128xf32>
    %394 = math.tanh %393 : vector<1x128xf32>
    %c23_173 = arith.constant 23 : index
    %c0_174 = arith.constant 0 : index
    %395 = vector.load %arg13[%c23_173, %c0_174] : memref<32x128xf32, #tpu.memory_space<vmem>>, vector<1x128xf32>
    tpu.vector_store %arg13[%c23_173, %c0_174], %394 {strides = array<i32>} : memref<32x128xf32, #tpu.memory_space<vmem>>, vector<1x128xf32>,
    %cst_175 = arith.constant dense<0.000000e+00> : vector<1x128xf32>
    %396 = tpu.matmul %394, %275, %cst_175 {dimension_numbers = #tpu.dot_dimension_numbers<[1], [0], [0], [1], [0, 0, 1, 1], [], []>} : vector<1x128xf32>, vector<128x128xf32>, vector<1x128xf32> -> vector<1x128xf32>
    %c24 = arith.constant 24 : index
    %c0_176 = arith.constant 0 : index
    %397 = vector.load %arg12[%c24, %c0_176] : memref<32x128xf32, #tpu.memory_space<vmem>>, vector<1x128xf32>
    %398 = arith.addf %396, %397 : vector<1x128xf32>
    %399 = math.tanh %398 : vector<1x128xf32>
    %c24_177 = arith.constant 24 : index
    %c0_178 = arith.constant 0 : index
    %400 = vector.load %arg13[%c24_177, %c0_178] : memref<32x128xf32, #tpu.memory_space<vmem>>, vector<1x128xf32>
    tpu.vector_store %arg13[%c24_177, %c0_178], %399 {strides = array<i32>} : memref<32x128xf32, #tpu.memory_space<vmem>>, vector<1x128xf32>,
    %cst_179 = arith.constant dense<0.000000e+00> : vector<1x128xf32>
    %401 = tpu.matmul %399, %275, %cst_179 {dimension_numbers = #tpu.dot_dimension_numbers<[1], [0], [0], [1], [0, 0, 1, 1], [], []>} : vector<1x128xf32>, vector<128x128xf32>, vector<1x128xf32> -> vector<1x128xf32>
    %c25 = arith.constant 25 : index
    %c0_180 = arith.constant 0 : index
    %402 = vector.load %arg12[%c25, %c0_180] : memref<32x128xf32, #tpu.memory_space<vmem>>, vector<1x128xf32>
    %403 = arith.addf %401, %402 : vector<1x128xf32>
    %404 = math.tanh %403 : vector<1x128xf32>
    %c25_181 = arith.constant 25 : index
    %c0_182 = arith.constant 0 : index
    %405 = vector.load %arg13[%c25_181, %c0_182] : memref<32x128xf32, #tpu.memory_space<vmem>>, vector<1x128xf32>
    tpu.vector_store %arg13[%c25_181, %c0_182], %404 {strides = array<i32>} : memref<32x128xf32, #tpu.memory_space<vmem>>, vector<1x128xf32>,
    %cst_183 = arith.constant dense<0.000000e+00> : vector<1x128xf32>
    %406 = tpu.matmul %404, %275, %cst_183 {dimension_numbers = #tpu.dot_dimension_numbers<[1], [0], [0], [1], [0, 0, 1, 1], [], []>} : vector<1x128xf32>, vector<128x128xf32>, vector<1x128xf32> -> vector<1x128xf32>
    %c26 = arith.constant 26 : index
    %c0_184 = arith.constant 0 : index
    %407 = vector.load %arg12[%c26, %c0_184] : memref<32x128xf32, #tpu.memory_space<vmem>>, vector<1x128xf32>
    %408 = arith.addf %406, %407 : vector<1x128xf32>
    %409 = math.tanh %408 : vector<1x128xf32>
    %c26_185 = arith.constant 26 : index
    %c0_186 = arith.constant 0 : index
    %410 = vector.load %arg13[%c26_185, %c0_186] : memref<32x128xf32, #tpu.memory_space<vmem>>, vector<1x128xf32>
    tpu.vector_store %arg13[%c26_185, %c0_186], %409 {strides = array<i32>} : memref<32x128xf32, #tpu.memory_space<vmem>>, vector<1x128xf32>,
    %cst_187 = arith.constant dense<0.000000e+00> : vector<1x128xf32>
    %411 = tpu.matmul %409, %275, %cst_187 {dimension_numbers = #tpu.dot_dimension_numbers<[1], [0], [0], [1], [0, 0, 1, 1], [], []>} : vector<1x128xf32>, vector<128x128xf32>, vector<1x128xf32> -> vector<1x128xf32>
    %c27 = arith.constant 27 : index
    %c0_188 = arith.constant 0 : index
    %412 = vector.load %arg12[%c27, %c0_188] : memref<32x128xf32, #tpu.memory_space<vmem>>, vector<1x128xf32>
    %413 = arith.addf %411, %412 : vector<1x128xf32>
    %414 = math.tanh %413 : vector<1x128xf32>
    %c27_189 = arith.constant 27 : index
    %c0_190 = arith.constant 0 : index
    %415 = vector.load %arg13[%c27_189, %c0_190] : memref<32x128xf32, #tpu.memory_space<vmem>>, vector<1x128xf32>
    tpu.vector_store %arg13[%c27_189, %c0_190], %414 {strides = array<i32>} : memref<32x128xf32, #tpu.memory_space<vmem>>, vector<1x128xf32>,
    %cst_191 = arith.constant dense<0.000000e+00> : vector<1x128xf32>
    %416 = tpu.matmul %414, %275, %cst_191 {dimension_numbers = #tpu.dot_dimension_numbers<[1], [0], [0], [1], [0, 0, 1, 1], [], []>} : vector<1x128xf32>, vector<128x128xf32>, vector<1x128xf32> -> vector<1x128xf32>
    %c28 = arith.constant 28 : index
    %c0_192 = arith.constant 0 : index
    %417 = vector.load %arg12[%c28, %c0_192] : memref<32x128xf32, #tpu.memory_space<vmem>>, vector<1x128xf32>
    %418 = arith.addf %416, %417 : vector<1x128xf32>
    %419 = math.tanh %418 : vector<1x128xf32>
    %c28_193 = arith.constant 28 : index
    %c0_194 = arith.constant 0 : index
    %420 = vector.load %arg13[%c28_193, %c0_194] : memref<32x128xf32, #tpu.memory_space<vmem>>, vector<1x128xf32>
    tpu.vector_store %arg13[%c28_193, %c0_194], %419 {strides = array<i32>} : memref<32x128xf32, #tpu.memory_space<vmem>>, vector<1x128xf32>,
    %cst_195 = arith.constant dense<0.000000e+00> : vector<1x128xf32>
    %421 = tpu.matmul %419, %275, %cst_195 {dimension_numbers = #tpu.dot_dimension_numbers<[1], [0], [0], [1], [0, 0, 1, 1], [], []>} : vector<1x128xf32>, vector<128x128xf32>, vector<1x128xf32> -> vector<1x128xf32>
    %c29 = arith.constant 29 : index
    %c0_196 = arith.constant 0 : index
    %422 = vector.load %arg12[%c29, %c0_196] : memref<32x128xf32, #tpu.memory_space<vmem>>, vector<1x128xf32>
    %423 = arith.addf %421, %422 : vector<1x128xf32>
    %424 = math.tanh %423 : vector<1x128xf32>
    %c29_197 = arith.constant 29 : index
    %c0_198 = arith.constant 0 : index
    %425 = vector.load %arg13[%c29_197, %c0_198] : memref<32x128xf32, #tpu.memory_space<vmem>>, vector<1x128xf32>
    tpu.vector_store %arg13[%c29_197, %c0_198], %424 {strides = array<i32>} : memref<32x128xf32, #tpu.memory_space<vmem>>, vector<1x128xf32>,
    %cst_199 = arith.constant dense<0.000000e+00> : vector<1x128xf32>
    %426 = tpu.matmul %424, %275, %cst_199 {dimension_numbers = #tpu.dot_dimension_numbers<[1], [0], [0], [1], [0, 0, 1, 1], [], []>} : vector<1x128xf32>, vector<128x128xf32>, vector<1x128xf32> -> vector<1x128xf32>
    %c30 = arith.constant 30 : index
    %c0_200 = arith.constant 0 : index
    %427 = vector.load %arg12[%c30, %c0_200] : memref<32x128xf32, #tpu.memory_space<vmem>>, vector<1x128xf32>
    %428 = arith.addf %426, %427 : vector<1x128xf32>
    %429 = math.tanh %428 : vector<1x128xf32>
    %c30_201 = arith.constant 30 : index
    %c0_202 = arith.constant 0 : index
    %430 = vector.load %arg13[%c30_201, %c0_202] : memref<32x128xf32, #tpu.memory_space<vmem>>, vector<1x128xf32>
    tpu.vector_store %arg13[%c30_201, %c0_202], %429 {strides = array<i32>} : memref<32x128xf32, #tpu.memory_space<vmem>>, vector<1x128xf32>,
    %cst_203 = arith.constant dense<0.000000e+00> : vector<1x128xf32>
    %431 = tpu.matmul %429, %275, %cst_203 {dimension_numbers = #tpu.dot_dimension_numbers<[1], [0], [0], [1], [0, 0, 1, 1], [], []>} : vector<1x128xf32>, vector<128x128xf32>, vector<1x128xf32> -> vector<1x128xf32>
    %c31 = arith.constant 31 : index
    %c0_204 = arith.constant 0 : index
    %432 = vector.load %arg12[%c31, %c0_204] : memref<32x128xf32, #tpu.memory_space<vmem>>, vector<1x128xf32>
    %433 = arith.addf %431, %432 : vector<1x128xf32>
    %434 = math.tanh %433 : vector<1x128xf32>
    %c31_205 = arith.constant 31 : index
    %c0_206 = arith.constant 0 : index
    %435 = vector.load %arg13[%c31_205, %c0_206] : memref<32x128xf32, #tpu.memory_space<vmem>>, vector<1x128xf32>
    tpu.vector_store %arg13[%c31_205, %c0_206], %434 {strides = array<i32>} : memref<32x128xf32, #tpu.memory_space<vmem>>, vector<1x128xf32>,
    %c32_i32_207 = arith.constant 32 : i32
    %436 = arith.muli %arg0, %c32_i32_207 : i32
    %c69_i32 = arith.constant 69 : i32
    %437 = arith.subi %c69_i32, %436 : i32
    %c31_i32_208 = arith.constant 31 : i32
    %438 = arith.minsi %437, %c31_i32_208 : i32
    %439 = arith.index_cast %438 : i32 to index
    %c0_209 = arith.constant 0 : index
    %440 = vector.load %arg13[%439, %c0_209] : memref<32x128xf32, #tpu.memory_space<vmem>>, vector<1x128xf32>
    %c0_210 = arith.constant 0 : index
    %c0_211 = arith.constant 0 : index
    %441 = vector.load %arg11[%c0_210, %c0_211] : memref<1x128xf32, #tpu.memory_space<vmem>>, vector<1x128xf32>
    tpu.vector_store %arg11[%c0_210, %c0_211], %440 {strides = array<i32>} : memref<1x128xf32, #tpu.memory_space<vmem>>, vector<1x128xf32>,
    %c0_212 = arith.constant 0 : index
    %c0_213 = arith.constant 0 : index
    %442 = vector.load %arg13[%c0_212, %c0_213] : memref<32x128xf32, #tpu.memory_space<vmem>>, vector<32x128xf32>
    %c0_214 = arith.constant 0 : index
    %c0_215 = arith.constant 0 : index
    %443 = vector.load %arg6[%c0_214, %c0_215] : memref<128x128xf32, #tpu.memory_space<vmem>>, vector<128x128xf32>
    %cst_216 = arith.constant dense<0.000000e+00> : vector<32x128xf32>
    %444 = tpu.matmul %442, %443, %cst_216 {dimension_numbers = #tpu.dot_dimension_numbers<[1], [0], [0], [1], [0, 0, 1, 1], [], []>} : vector<32x128xf32>, vector<128x128xf32>, vector<32x128xf32> -> vector<32x128xf32>
    %c0_217 = arith.constant 0 : index
    %c0_218 = arith.constant 0 : index
    %445 = vector.load %arg7[%c0_217, %c0_218] : memref<1x128xf32, #tpu.memory_space<vmem>>, vector<1x128xf32>
    %446 = vector.broadcast %445 : vector<1x128xf32> to vector<32x128xf32>
    %447 = arith.addf %444, %446 : vector<32x128xf32>
    %c0_219 = arith.constant 0 : index
    %c0_220 = arith.constant 0 : index
    %448 = vector.load %arg9[%c0_219, %c0_220] : memref<32x128xf32, #tpu.memory_space<vmem>>, vector<32x128xf32>
    tpu.vector_store %arg9[%c0_219, %c0_220], %447 {strides = array<i32>} : memref<32x128xf32, #tpu.memory_space<vmem>>, vector<32x128xf32>,
    %c2_i32_221 = arith.constant 2 : i32
    %449 = arith.cmpi eq, %arg0, %c2_i32_221 : i32
    %450 = arith.extui %449 : i1 to i32
    %c0_i32_222 = arith.constant 0 : i32
    %451 = arith.cmpi ne, %450, %c0_i32_222 : i32
    scf.if %451 {
      %c0_223 = arith.constant 0 : index
      %c0_224 = arith.constant 0 : index
      %452 = vector.load %arg11[%c0_223, %c0_224] : memref<1x128xf32, #tpu.memory_space<vmem>>, vector<1x128xf32>
      %c0_225 = arith.constant 0 : index
      %c0_226 = arith.constant 0 : index
      %453 = vector.load %arg10[%c0_225, %c0_226] : memref<1x128xf32, #tpu.memory_space<vmem>>, vector<1x128xf32>
      tpu.vector_store %arg10[%c0_225, %c0_226], %452 {strides = array<i32>} : memref<1x128xf32, #tpu.memory_space<vmem>>, vector<1x128xf32>,
    } else {
    }
    return
  }
  func.func @transform_0(%arg0: i32, %arg1: memref<96xi32, #tpu.memory_space<smem>>) -> (i32, i32) {
    %c0_i32 = arith.constant 0 : i32
    %c0_i32_0 = arith.constant 0 : i32
    %c0_i32_1 = arith.constant 0 : i32
    return %c0_i32, %c0_i32_0 : i32, i32
  }
  func.func @transform_1(%arg0: i32, %arg1: memref<96xi32, #tpu.memory_space<smem>>) -> (i32, i32) {
    %c0_i32 = arith.constant 0 : i32
    %c0_i32_0 = arith.constant 0 : i32
    %c0_i32_1 = arith.constant 0 : i32
    return %c0_i32, %c0_i32_0 : i32, i32
  }
  func.func @transform_2(%arg0: i32, %arg1: memref<96xi32, #tpu.memory_space<smem>>) -> (i32, i32) {
    %c0_i32 = arith.constant 0 : i32
    %c0_i32_0 = arith.constant 0 : i32
    %c0_i32_1 = arith.constant 0 : i32
    return %c0_i32, %c0_i32_0 : i32, i32
  }
  func.func @transform_3(%arg0: i32, %arg1: memref<96xi32, #tpu.memory_space<smem>>) -> (i32, i32) {
    %c0_i32 = arith.constant 0 : i32
    %c0_i32_0 = arith.constant 0 : i32
    %c0_i32_1 = arith.constant 0 : i32
    return %c0_i32, %c0_i32_0 : i32, i32
  }
  func.func @transform_4(%arg0: i32, %arg1: memref<96xi32, #tpu.memory_space<smem>>) -> (i32, i32) {
    %c0_i32 = arith.constant 0 : i32
    %c0_i32_0 = arith.constant 0 : i32
    %c0_i32_1 = arith.constant 0 : i32
    return %c0_i32, %c0_i32_0 : i32, i32
  }
  func.func @transform_5(%arg0: i32, %arg1: memref<96xi32, #tpu.memory_space<smem>>) -> (i32, i32) {
    %c0_i32 = arith.constant 0 : i32
    %c0_i32_0 = arith.constant 0 : i32
    %c0_i32_1 = arith.constant 0 : i32
    return %c0_i32, %c0_i32_0 : i32, i32
  }
  func.func @transform_6(%arg0: i32, %arg1: memref<96xi32, #tpu.memory_space<smem>>) -> (i32, i32) {
    %c0_i32 = arith.constant 0 : i32
    %c0_i32_0 = arith.constant 0 : i32
    %c0_i32_1 = arith.constant 0 : i32
    return %c0_i32, %c0_i32_0 : i32, i32
  }
  func.func @transform_7(%arg0: i32, %arg1: memref<96xi32, #tpu.memory_space<smem>>) -> (i32, i32) {
    %c0_i32 = arith.constant 0 : i32
    %c0_i32_0 = arith.constant 0 : i32
    return %arg0, %c0_i32 : i32, i32
  }
  func.func @transform_8(%arg0: i32, %arg1: memref<96xi32, #tpu.memory_space<smem>>) -> (i32, i32) {
    %c0_i32 = arith.constant 0 : i32
    %c0_i32_0 = arith.constant 0 : i32
    %c0_i32_1 = arith.constant 0 : i32
    return %c0_i32, %c0_i32_0 : i32, i32
  }
}

</mosaic_0001>

<bundles_post_ra>
// kernel: tpu_custom_call.1
= control target key start
LH: loop header
LB: loop body
LE: loop exit
PB: predicated region body
PF: predicated region fallthrough
CT: control target
= control target key end

     0   :  { %s5805_s30 = smov [#allocation6]   ;;  %s7508_s0 = inlined_call_operand.hbm [shape: s32[96], index: 0, kind: input, shape index: {}]   ;;  %s7509_s1 = inlined_call_operand.hbm [shape: f32[64,128], index: 1, kind: input, shape index: {}]   ;;  %s7510_s2 = inlined_call_operand.hbm [shape: f32[128,128], index: 2, kind: input, shape index: {}]   ;;  %s7511_s3 = inlined_call_operand.hbm [shape: f32[128,128], index: 3, kind: input, shape index: {}]   ;;  %s7512_s4 = inlined_call_operand.vmem [shape: f32[1,128], index: 4, kind: input, shape index: {}]   ;;  %s7513_s5 = inlined_call_operand.hbm [shape: f32[128,128], index: 5, kind: input, shape index: {}]   ;;  %s7514_s6 = inlined_call_operand.vmem [shape: f32[1,128], index: 6, kind: input, shape index: {}]   ;;  %s7515_s7 = inlined_call_operand.vmem [shape: f32[1,128], index: 7, kind: input, shape index: {}]   ;;  %s7516_s8 = inlined_call_operand.hbm [shape: f32[96,128], index: 8, kind: output, shape index: {0}]   ;;  %s7517_s9 = inlined_call_operand.hbm [shape: f32[1,128], index: 9, kind: output, shape index: {1}]  }
   0x1   :  { %16 = dma.hbm_to_smem %s7508_s0, 16, %s5805_s30, [#allocation5] }
   0x2   :  { %5767 = dma.done.wait [#allocation5], 16 }
   0x3   :  { %5768 = vsyncadd [#allocation5], 4294967280 }
   0x4   :  { %18 = sfence }
   0x5   :  { %19 = vsyncpa [#allocation8], 0 }
   0x6   :  { %20 = vsyncpa [#allocation11], 0 }
   0x7   :  { %21 = vsyncpa [#allocation14], 0 }
   0x8   :  { %22 = vsyncpa [#allocation9], 0 }
   0x9   :  { %24 = vsyncpa [#allocation9 + $0x1], 0 }
   0xa   :  { %25 = vsyncpa [#allocation17], 0  ;;  %s5871_s12 = smov 0   ;;  %s5873_s13 = smov 0  }
   0xb   :  { %s5875_s14 = smov 0   ;;  %s5877_s15 = smov 0  }
   0xc LB: > { %s5892_s0 = sadd.s32 4294967295, %s5803_s15   ;;  %s3552_s16 = sadd.s32 4294967294, %s5803_s15   ;;  %s5803_s15 = sphi %s5877_s15, %s7533_s15   ;;  %s5799_s14 = sphi %s5875_s14, %s7532_s14   ;;  %s5795_s13 = sphi %s5873_s13, %s7531_s13   ;;  %s5791_s12 = sphi %s5871_s12, %s7530_s12  }
   0xd   : > { %s5896_s17 = sadd.s32 1, %s5803_s15   ;;  %s185_s18 = sadd.s32 1, %s5799_s14 }
   0xe   : > { %s182_s19 = ssub.s32 %s5803_s15, %s5896_s17  ;;  %p195_p0 = scmp.ne.s32.totalorder %s5799_s14, %s5795_s13 }
   0xf   : > { %p183_p1 = scmp.eq.s32.totalorder %s182_s19, 0  ;;  %p7518_p2 = scmp.eq.s32.totalorder %s5892_s0, 2 }
  0x10   : > { %p201_p3 = scmp.ne.s32.totalorder %s5795_s13, %s5791_s12  ;;  %p202_p4 = scmp.eq.s32.totalorder %s3552_s16, 2 }
  0x11   : > { %s5907_s20 = scalar_select %p183_p1, %s5799_s14, %s185_s18  }
  0x12   : > { %p5911_p5 = por %p7518_p2, %p195_p0  ;;  %p5915_p6 = por %p202_p4, %p201_p3 }
  0x13   : > { %p3553_p7 = scmp.ge.s32.totalorder %s5803_s15, 1  ;;  %p230_p8 = scmp.lt.s32.totalorder %s5803_s15, 4 }
  0x14   : > { %p5438_p10 = scmp.eq.s32.totalorder %s5892_s0, 0  ;;  %s5806_s24 = smov [#allocation10]  }
  0x15   : > { %p5923_p11 = pnand %p3553_p7, %p230_p8  ;;  %s255_s25 = sshll.u32 %s5806_s24, 4  ;;  %s256_s25 = int_to_ptr.vmem [resolvable:$true] %s255_s25 }
  0x16   : > { %s5807_s27 = smov [#allocation7]   ;;  %s5808_s29 = smov [#allocation12]  }
  0x17   : > { %p5421_p12 = pneg %p5923_p11  ;;  %s242_s28 = sshll.u32 %s5807_s27, 4  ;;  %s243_s28 = int_to_ptr.vmem [resolvable:$true] %s242_s28 }
  0x18   : > { %s268_s30 = sshll.u32 %s5808_s29, 4  ;;  %s5608_s10 = scalar_lea.vmem %s256_s25, 2048  ;;  %s269_s30 = int_to_ptr.vmem [resolvable:$true] %s268_s30 }
  0x19   : > { %p5931_p13 = pnand %p5438_p10, %p5421_p12  ;;  %p5609_p1 = scmp.ne.s32.totalorder %s256_s25, %s5608_s10 }
  0x1a   : > { %p5616_p7 = scmp.lt.s32.totalorder %s256_s25, %s256_s25  ;;  %p5617_p8 = scmp.lt.s32.totalorder %s5608_s10, %s5608_s10 }
  0x1b   : > { %p5599_p0 = pneg %p5931_p13 }
  0x1c   : > { %p5618_p12 = por %p5617_p8, %p5616_p7 }
  0x1d   : > { %p5611_p3 = pnand %p5609_p1, %p5599_p0 }
  0x1f   : > { %p5612_p4 = pneg %p5611_p3 }
  0x21   : > { %p5619_p2 = pnand %p5618_p12, %p5612_p4 }
  0x23   : > { %5622 = shalt.err (!%p5619_p2)
}
  0x24   : > { %s5809_s11 = smov 128   ;;  %s5810_s16 = smov 8  }
  0x25   : > { %5427 = dma.hbm_to_vmem [thread:$0]  (!%p5931_p13), %s7510_s2, 2048, %s256_s25, [#allocation11], %s5809_s11, %s5809_s11, %s5810_s16  }
  0x26   : > { %s5634_s24 = scalar_lea.vmem %s243_s28, 1024  ;;  %p5642_p4 = scmp.lt.s32.totalorder %s243_s28, %s243_s28 }
  0x27   : > { %p5635_p1 = scmp.ne.s32.totalorder %s243_s28, %s5634_s24  ;;  %p5643_p2 = scmp.lt.s32.totalorder %s5634_s24, %s5634_s24 }
  0x29   : > { %p5637_p3 = pnand %p5635_p1, %p5599_p0  ;;  %p5644_p8 = por %p5643_p2, %p5642_p4 }
  0x2b   : > { %p5638_p7 = pneg %p5637_p3 }
  0x2d   : > { %p5645_p12 = pnand %p5644_p8, %p5638_p7 }
  0x2f   : > { %5648 = shalt.err (!%p5645_p12)
}
  0x30   : > { %5424 = dma.hbm_to_vmem [thread:$0]  (!%p5931_p13), %s7509_s1, 1024, %s243_s28, [#allocation8], %s5809_s11, %s5809_s11, %s5810_s16  }
  0x31   : > { %s5660_s25 = scalar_lea.vmem %s269_s30, 2048  ;;  %p5668_p4 = scmp.lt.s32.totalorder %s269_s30, %s269_s30 }
  0x32   : > { %p5661_p9 = scmp.ne.s32.totalorder %s269_s30, %s5660_s25  ;;  %p5669_p7 = scmp.lt.s32.totalorder %s5660_s25, %s5660_s25 }
  0x34   : > { %p5663_p1 = pnand %p5661_p9, %p5599_p0  ;;  %p5670_p2 = por %p5669_p7, %p5668_p4 }
  0x36   : > { %p5664_p3 = pneg %p5663_p1 }
  0x38   : > { %p5671_p8 = pnand %p5670_p2, %p5664_p3 }
  0x3a   : > { %5674 = shalt.err (!%p5671_p8)
}
  0x3b   : > { %5430 = dma.hbm_to_vmem [thread:$0]  (!%p5931_p13), %s7511_s3, 2048, %s269_s30, [#allocation11], %s5809_s11, %s5809_s11, %s5810_s16  }
  0x3c   : > { %s5811_s28 = smov [#allocation13]  }
  0x3d   : > { %s284_s19 = sshll.u32 %s5811_s28, 4  ;;  %s285_s19 = int_to_ptr.vmem [resolvable:$true] %s284_s19 }
  0x3e   : > { %s5686_s24 = scalar_lea.vmem %s285_s19, 2048  ;;  %p5694_p3 = scmp.lt.s32.totalorder %s285_s19, %s285_s19 }
  0x3f   : > { %p5687_p9 = scmp.ne.s32.totalorder %s285_s19, %s5686_s24  ;;  %p5695_p4 = scmp.lt.s32.totalorder %s5686_s24, %s5686_s24 }
  0x41   : > { %p5689_p12 = pnand %p5687_p9, %p5599_p0  ;;  %p5696_p7 = por %p5695_p4, %p5694_p3 }
  0x43   : > { %p5690_p1 = pneg %p5689_p12 }
  0x45   : > { %p5697_p2 = pnand %p5696_p7, %p5690_p1 }
  0x47   : > { %5700 = shalt.err (!%p5697_p2)
}
  0x48   : > { %5433 = dma.hbm_to_vmem [thread:$0]  (!%p5931_p13), %s7513_s5, 2048, %s285_s19, [#allocation14], %s5809_s11, %s5809_s11, %s5810_s16  }
  0x49   : > { %306 = sbr.rel (%p5923_p11) target bundleno = 7268 (0x1c64), region = 48 }
  0x4e   : > { %5770 = dma.done.wait (%p5438_p10), [#allocation8], 1024  }
  0x4f   : > { %5772 = vsyncadd (%p5438_p10), [#allocation8], 4294966272 }
  0x50   : > { %5774 = dma.done.wait (%p5438_p10), [#allocation11], 4096  }
  0x51   : > { %5776 = vsyncadd (%p5438_p10), [#allocation11], 4294963200 }
  0x52   : > { %5778 = dma.done.wait (%p5438_p10), [#allocation14], 2048  }
  0x53   : > { %5780 = vsyncadd (%p5438_p10), [#allocation14], 4294965248  ;;  %s7519_s23 = sand.u32 1, %s5795_s13   ;;  %p7524_p11 = scmp.ne.s32.totalorder %s5892_s0, 0 }
  0x54   : > { %s3563_s26 = sshll.u32 %s7519_s23, 5 }
  0x55   : > { %s5998_s11 = scalar_lea.vmem [#allocation15], %s3563_s26  ;;  %351 = sbr.rel (%p7524_p11) target bundleno = 92 (0x5c), region = 68 }
  0x5a   : > { %v352_v0 = vld [vmem:[%s7515_s7] sm:$0x1] }
  0x5b   : > { %353 = vst [vmem:[#allocation2] sm:$0x1] %v352_v0 }
  0x5c PF: > { %v732_v1 = vld [vmem:[#allocation7 + $0x38] sm:$0xff]  ;;  %v731_v2 = vld [vmem:[#allocation7 + $0x30] sm:$0xff]  ;;  %v354_v3 = vlaneseq  ;;  %s6006_s25 = sshll.u32 %s5892_s0, 5  ;;  %v5812_v4 = vmov 0.0   ;;  %v730_v5 = vld [vmem:[#allocation7 + $0x28] sm:$0xff]  ;;  %vm733_vm9 = vcmask 523264  }
  0x5d   : > { %4181 = vmatprep.subr.mxu1 %v732_v1  ;;  %s6009_s10 = sld [smem:[#allocation6 + %s6006_s25]]  ;;  %s374_s18 = sadd.s32 1, %s6006_s25  ;;  %4241 = vmatprep.subr.mxu0 %v5812_v4  ;;  %v729_v7 = vld [vmem:[#allocation7 + $0x20] sm:$0xff]  ;;  %v728_v8 = vld [vmem:[#allocation7 + $0x18] sm:$0xff]  ;;  %v6040_v11 = vld [vmem:[#allocation12 + $0x70] sm:$0xff] }
  0x5e   : > { %4182 = vmatpush3.msra.mxu1 %v732_v1  ;;  %v6014_v6 = vshrl.u32 %v354_v3, 7  ;;  %s6016_s28 = sld [smem:[#allocation6 + %s374_s18]]  ;;  %s385_s19 = sadd.s32 2, %s6006_s25  ;;  %v6038_v10 = vld [vmem:[#allocation12 + $0x78] sm:$0xff]  ;;  %v727_v12 = vld [vmem:[#allocation7 + $0x10] sm:$0xff]  ;;  %v6061_v18 = vld [vmem:[#allocation12 + $0x68] sm:$0xff] }
  0x5f   : > { %4183 = vmatprep.subr.mxu1 %v731_v2  ;;  %s6019_s24 = sld [smem:[#allocation6 + %s385_s19]]  ;;  %s396_s30 = sadd.s32 3, %s6006_s25  ;;  %4242 = vmatpush3.msra.mxu0 %v6038_v10  ;;  %v726_v19 = vld [vmem:[#allocation7 + $0x8] sm:$0xff]  ;;  %v6079_v24 = vld [vmem:[#allocation12 + $0x60] sm:$0xff]  ;;  %v6086_v28 = vand.u32 127, %v354_v3  ;;  %v6100_v31 = vld [vmem:[#allocation12 + $0x58] sm:$0xff] }
  0x60   : > { %4184 = vmatpush3.msra.mxu1 %v731_v2  ;;  %s6022_s27 = sld [smem:[#allocation6 + %s396_s30]]  ;;  %s407_s26 = sadd.s32 4, %s6006_s25  ;;  %vm359_vm0 = vcmp.eq.s32.totalorder %v6014_v6, 0  ;;  %vm370_vm1 = vcmp.eq.s32.totalorder %v6014_v6, 1  ;;  %vm381_vm2 = vcmp.eq.s32.totalorder %v6014_v6, 2  ;;  %vm392_vm3 = vcmp.eq.s32.totalorder %v6014_v6, 3  ;;  %4243 = vmatprep.subr.mxu0 %v5812_v4 }
  0x61   : > { %4185 = vmatprep.subr.mxu1 %v730_v5  ;;  %s6026_s16 = sld [smem:[#allocation6 + %s407_s26]]  ;;  %s418_s29 = sadd.s32 5, %s6006_s25  ;;  %vm403_vm4 = vcmp.eq.s32.totalorder %v6014_v6, 4  ;;  %v6055_v17 = vadd.s32 8, %v6014_v6  ;;  %vm414_vm5 = vcmp.eq.s32.totalorder %v6014_v6, 5  ;;  %4244 = vmatpush3.msra.mxu0 %v6040_v11  ;;  %vm425_vm6 = vcmp.eq.s32.totalorder %v6014_v6, 6 }
  0x62   : > { %4186 = vmatpush3.msra.mxu1 %v730_v5  ;;  %s6030_s18 = sld [smem:[#allocation6 + %s418_s29]]  ;;  %s429_s19 = sadd.s32 6, %s6006_s25  ;;  %4245 = vmatprep.subr.mxu0 %v5812_v4  ;;  %v725_v25 = vld [vmem:[#allocation7] sm:$0xff]  ;;  %vm436_vm7 = vcmp.eq.s32.totalorder %v6014_v6, 7  ;;  %v6109_v34 = vld [vmem:[#allocation10 + $0x78] sm:$0xff]  ;;  %v6120_v37 = vld [vmem:[#allocation12 + $0x50] sm:$0xff] }
  0x63   : > { %4187 = vmatprep.subr.mxu1 %v729_v7  ;;  %v365_v9 = vstv %s6009_s10  ;;  %s6035_s30 = sld [smem:[#allocation6 + %s429_s19]]  ;;  %s440_s23 = sadd.s32 7, %s6006_s25  ;;  %4246 = vmatpush3.msra.mxu0 %v6061_v18  ;;  %vm448_vm8 = vcmp.eq.s32.totalorder %v6055_v17, 8  ;;  %vm459_vm10 = vcmp.eq.s32.totalorder %v6055_v17, 9  ;;  %vm470_vm11 = vcmp.eq.s32.totalorder %v6055_v17, 10  ;;  %v6144_v44 = vld [vmem:[#allocation12 + $0x48] sm:$0xff] }
  0x64   : > { %4188 = vmatpush3.msra.mxu1 %v729_v7  ;;  %v366_v13 = vsel %vm359_vm0, %v365_v9, 0  ;;  %v376_v14 = vstv %s6016_s28  ;;  %s6046_s10 = sld [smem:[#allocation6 + %s440_s23]]  ;;  %s451_s26 = sadd.s32 8, %s6006_s25  ;;  %4247 = vmatprep.subr.mxu0 %v5812_v4  ;;  %v6123_v38 = vadd.s32 16, %v6014_v6  ;;  %vm481_vm13 = vcmp.eq.s32.totalorder %v6055_v17, 11  ;;  %v6163_v49 = vld [vmem:[#allocation12 + $0x40] sm:$0xff] }
  0x65   : > { %4189 = vmatprep.subr.mxu1 %v728_v8  ;;  %v377_v15 = vsel %vm370_vm1, %v376_v14, %v366_v13  ;;  %v387_v16 = vstv %s6019_s24  ;;  %s6057_s28 = sld [smem:[#allocation6 + %s451_s26]]  ;;  %s462_s29 = sadd.s32 9, %s6006_s25  ;;  %4248 = vmatpush3.msra.mxu0 %v6079_v24  ;;  %vm492_vm14 = vcmp.eq.s32.totalorder %v6055_v17, 12  ;;  %vm503_vm15 = vcmp.eq.s32.totalorder %v6055_v17, 13  ;;  %v6181_v54 = vld [vmem:[#allocation12 + $0x38] sm:$0xff]  ;;  %v845_v62 = vld [vmem:[#allocation10 + $0x70] sm:$0xff] }
  0x66   : > { %4190 = vmatpush3.msra.mxu1 %v728_v8  ;;  %v388_v20 = vsel %vm381_vm2, %v387_v16, %v377_v15  ;;  %v398_v21 = vstv %s6022_s27  ;;  %s6067_s23 = sld [smem:[#allocation6 + %s462_s29]]  ;;  %s473_s24 = sadd.s32 10, %s6006_s25  ;;  %4249 = vmatprep.subr.mxu0 %v5812_v4  ;;  %vm514_vm0 = vcmp.eq.s32.totalorder %v6055_v17, 14  ;;  %vm525_vm1 = vcmp.eq.s32.totalorder %v6055_v17, 15  ;;  %v844_v5 = vld [vmem:[#allocation10 + $0x68] sm:$0xff]  ;;  %v842_v17 = vld [vmem:[#allocation10 + $0x58] sm:$0xff] }
  0x67   : > { %4191 = vmatprep.subr.mxu1 %v727_v12  ;;  %v399_v22 = vsel %vm392_vm3, %v398_v21, %v388_v20  ;;  %v409_v23 = vstv %s6026_s16  ;;  %s6075_s19 = sld [smem:[#allocation6 + %s473_s24]]  ;;  %s484_s27 = sadd.s32 11, %s6006_s25  ;;  %4250 = vmatpush3.msra.mxu0 %v6100_v31  ;;  %vm537_vm2 = vcmp.eq.s32.totalorder %v6123_v38, 16  ;;  %vm548_vm3 = vcmp.eq.s32.totalorder %v6123_v38, 17 }
  0x68   : > { %4192 = vmatpush3.msra.mxu1 %v727_v12  ;;  %v410_v26 = vsel %vm403_vm4, %v409_v23, %v399_v22  ;;  %v420_v27 = vstv %s6030_s18  ;;  %s6088_s16 = sld [smem:[#allocation6 + %s484_s27]]  ;;  %s495_s26 = sadd.s32 12, %s6006_s25  ;;  %4251 = vmatprep.subr.mxu0 %v5812_v4  ;;  %vm559_vm4 = vcmp.eq.s32.totalorder %v6123_v38, 18  ;;  %v6214_v1 = vadd.s32 24, %v6014_v6  ;;  %v843_v12 = vld [vmem:[#allocation10 + $0x60] sm:$0xff]  ;;  %v841_v23 = vld [vmem:[#allocation10 + $0x50] sm:$0xff] }
  0x69   : > { %4193 = vmatprep.subr.mxu1 %v726_v19  ;;  %v421_v29 = vsel %vm414_vm5, %v420_v27, %v410_v26  ;;  %v431_v30 = vstv %s6035_s30  ;;  %s6096_s18 = sld [smem:[#allocation6 + %s495_s26]]  ;;  %s506_s29 = sadd.s32 13, %s6006_s25  ;;  %4252 = vmatpush3.msra.mxu0 %v6120_v37  ;;  %vm570_vm5 = vcmp.eq.s32.totalorder %v6123_v38, 19 }
  0x6a   : > { %4194 = vmatpush3.msra.mxu1 %v726_v19  ;;  %v432_v32 = vsel %vm425_vm6, %v431_v30, %v421_v29  ;;  %v442_v33 = vstv %s6046_s10  ;;  %s6106_s30 = sld [smem:[#allocation6 + %s506_s29]]  ;;  %s517_s24 = sadd.s32 14, %s6006_s25  ;;  %4253 = vmatprep.subr.mxu0 %v5812_v4 }
  0x6b   : > { %4195 = vmatprep.subr.mxu1 %v725_v25  ;;  %v443_v35 = vsel %vm436_vm7, %v442_v33, %v432_v32  ;;  %v453_v36 = vstv %s6057_s28  ;;  %s6116_s10 = sld [smem:[#allocation6 + %s517_s24]]  ;;  %s528_s27 = sadd.s32 15, %s6006_s25  ;;  %4254 = vmatpush3.msra.mxu0 %v6144_v44  ;;  %vm581_vm7 = vcmp.eq.s32.totalorder %v6123_v38, 20  ;;  %v840_v32 = vld [vmem:[#allocation10 + $0x48] sm:$0xff] }
  0x6c   : > { %4196 = vmatpush3.msra.mxu1 %v725_v25  ;;  %vm713_vm12 = vcmp.eq.s32.totalorder %v6086_v28, %v443_v35  ;;  %v455_v39 = vsel %vm448_vm8, %v453_v36, 0  ;;  %v464_v40 = vstv %s6067_s23  ;;  %s6130_s28 = sld [smem:[#allocation6 + %s528_s27]]  ;;  %s539_s26 = sadd.s32 16, %s6006_s25  ;;  %4255 = vmatprep.subr.mxu0 %v5812_v4  ;;  %vm592_vm8 = vcmp.eq.s32.totalorder %v6123_v38, 21 }
  0x6d   : > { %v3566_v41 = vsel %vm713_vm12, 1.0, %v5812_v4  ;;  %v466_v42 = vsel %vm459_vm10, %v464_v40, %v455_v39  ;;  %v475_v43 = vstv %s6075_s19  ;;  %4203 = vmatprep.subr.mxu1 %v6109_v34  ;;  %s6141_s23 = sld [smem:[#allocation6 + %s539_s26]]  ;;  %s550_s29 = sadd.s32 17, %s6006_s25  ;;  %4256 = vmatpush3.msra.mxu0 %v6163_v49  ;;  %vm603_vm10 = vcmp.eq.s32.totalorder %v6123_v38, 22 }
  0x6e   : > { %4197 = vmatprep.mubr.msk.f32.mxu1 %vm733_vm9, %v3566_v41  ;;  %v477_v45 = vsel %vm470_vm11, %v475_v43, %v466_v42  ;;  %v486_v46 = vstv %s6088_s16  ;;  %s6152_s19 = sld [smem:[#allocation6 + %s550_s29]]  ;;  %s561_s24 = sadd.s32 18, %s6006_s25  ;;  %4257 = vmatprep.subr.mxu0 %v5812_v4  ;;  %vm614_vm11 = vcmp.eq.s32.totalorder %v6123_v38, 23  ;;  %vm626_vm12 = vcmp.eq.s32.totalorder %v6214_v1, 24  ;;  %v839_v38 = vld [vmem:[#allocation10 + $0x40] sm:$0xff]  ;;  %v838_v43 = vld [vmem:[#allocation10 + $0x38] sm:$0xff] }
  0x6f   : > { %v488_v47 = vsel %vm481_vm13, %v486_v46, %v477_v45  ;;  %v497_v48 = vstv %s6096_s18  ;;  %s6159_s27 = sld [smem:[#allocation6 + %s561_s24]]  ;;  %s572_s26 = sadd.s32 19, %s6006_s25  ;;  %4258 = vmatpush3.msra.mxu0 %v6181_v54  ;;  %vm637_vm13 = vcmp.eq.s32.totalorder %v6214_v1, 25  ;;  %v837_v46 = vld [vmem:[#allocation10 + $0x30] sm:$0xff] }
  0x70   : > { %v499_v50 = vsel %vm492_vm14, %v497_v48, %v488_v47  ;;  %v508_v51 = vstv %s6106_s30  ;;  %s6169_s16 = sld [smem:[#allocation6 + %s572_s26]]  ;;  %s583_s18 = sadd.s32 20, %s6006_s25  ;;  %4259 = vmatprep.subr.mxu0 %v5812_v4  ;;  %vm648_vm14 = vcmp.eq.s32.totalorder %v6214_v1, 26  ;;  %v836_v48 = vld [vmem:[#allocation10 + $0x28] sm:$0xff] }
  0x71   : > { %v510_v52 = vsel %vm503_vm15, %v508_v51, %v499_v50  ;;  %v519_v53 = vstv %s6116_s10  ;;  %s6177_s29 = sld [smem:[#allocation6 + %s583_s18]]  ;;  %s594_s24 = sadd.s32 21, %s6006_s25  ;;  %v835_v50 = vld [vmem:[#allocation10 + $0x20] sm:$0xff]  ;;  %v834_v51 = vld [vmem:[#allocation10 + $0x18] sm:$0xff] }
  0x72   : > { %v521_v55 = vsel %vm514_vm0, %v519_v53, %v510_v52  ;;  %v530_v56 = vstv %s6130_s28  ;;  %s6187_s30 = sld [smem:[#allocation6 + %s594_s24]]  ;;  %s605_s10 = sadd.s32 22, %s6006_s25  ;;  %vm659_vm0 = vcmp.eq.s32.totalorder %v6214_v1, 27  ;;  %v833_v52 = vld [vmem:[#allocation10 + $0x10] sm:$0xff] }
  0x73   : > { %v532_v57 = vsel %vm525_vm1, %v530_v56, %v521_v55  ;;  %v541_v58 = vstv %s6141_s23  ;;  %s6196_s26 = sld [smem:[#allocation6 + %s605_s10]]  ;;  %s616_s28 = sadd.s32 23, %s6006_s25  ;;  %vm670_vm1 = vcmp.eq.s32.totalorder %v6214_v1, 28  ;;  %v6287_v53 = vld [vmem:[#allocation12 + $0x30] sm:$0xff]  ;;  %v831_v55 = vld [vmem:[#allocation10] sm:$0xff]  ;;  %v6291_v56 = vld [vmem:[#allocation12 + $0x28] sm:$0xff] }
  0x74   : > { %vm714_vm6 = vcmp.eq.s32.totalorder %v6086_v28, %v532_v57  ;;  %v544_v59 = vsel %vm537_vm2, %v541_v58, 0  ;;  %v552_v60 = vstv %s6152_s19  ;;  %s6205_s23 = sld [smem:[#allocation6 + %s616_s28]]  ;;  %s627_s18 = sadd.s32 24, %s6006_s25  ;;  %vm681_vm2 = vcmp.eq.s32.totalorder %v6214_v1, 29  ;;  %4260 = vmatpush3.msra.mxu0 %v6287_v53  ;;  %v6295_v57 = vld [vmem:[#allocation12 + $0x20] sm:$0xff]  ;;  %v6297_v58 = vld [vmem:[#allocation12 + $0x18] sm:$0xff] }
  0x75   : > { %v3567_v61 = vsel %vm714_vm6, 1.0, %v5812_v4  ;;  %v555_v63 = vsel %vm548_vm3, %v552_v60, %v544_v59  ;;  %v563_v0 = vstv %s6159_s27  ;;  %s6216_s19 = sld [smem:[#allocation6 + %s627_s18]]  ;;  %s638_s24 = sadd.s32 25, %s6006_s25  ;;  %vm692_vm3 = vcmp.eq.s32.totalorder %v6214_v1, 30  ;;  %4261 = vmatprep.subr.mxu0 %v5812_v4  ;;  %v6304_v59 = vld [vmem:[#allocation12 + $0x10] sm:$0xff]  ;;  %v6308_v60 = vld [vmem:[#allocation12 + $0x8] sm:$0xff] }
  0x76   : > { %4198 = vmatmul.mubr.msk.f32.vlgmr.msra.gmra.mxu1 %vm733_vm9, %v3567_v61  ;;  %v566_v2 = vsel %vm559_vm4, %v563_v0, %v555_v63  ;;  %v574_v3 = vstv %s6169_s16  ;;  %s6225_s27 = sld [smem:[#allocation6 + %s638_s24]]  ;;  %s649_s10 = sadd.s32 26, %s6006_s25  ;;  %vm703_vm4 = vcmp.eq.s32.totalorder %v6214_v1, 31  ;;  %4262 = vmatpush3.msra.mxu0 %v6291_v56  ;;  %v6312_v61 = vld [vmem:[#allocation12] sm:$0xff] }
  0x77   : > { %4204 = vmatpush3.msra.mxu1 %v6109_v34  ;;  %v577_v6 = vsel %vm570_vm5, %v574_v3, %v566_v2  ;;  %v585_v7 = vstv %s6177_s29  ;;  %s6233_s28 = sld [smem:[#allocation6 + %s649_s10]]  ;;  %s660_s16 = sadd.s32 27, %s6006_s25  ;;  %4263 = vmatprep.subr.mxu0 %v5812_v4 }
  0x78   : > { %4205 = vmatprep.subr.mxu1 %v845_v62  ;;  %v588_v8 = vsel %vm581_vm7, %v585_v7, %v577_v6  ;;  %v596_v9 = vstv %s6187_s30  ;;  %s6240_s18 = sld [smem:[#allocation6 + %s660_s16]]  ;;  %s671_s24 = sadd.s32 28, %s6006_s25  ;;  %4264 = vmatpush3.msra.mxu0 %v6295_v57  ;;  %v3574_v6 = vld [vmem:[%s7512_s4] ss:$0 sm:$0xff] }
  0x79   : > { %4206 = vmatpush3.msra.mxu1 %v845_v62  ;;  %v599_v13 = vsel %vm592_vm8, %v596_v9, %v588_v8  ;;  %v607_v14 = vstv %s6196_s26  ;;  %s6247_s29 = sld [smem:[#allocation6 + %s671_s24]]  ;;  %s682_s10 = sadd.s32 29, %s6006_s25  ;;  %4265 = vmatprep.subr.mxu0 %v5812_v4  ;;  %v943_v62 = vld [vmem:[#allocation2] sm:$0x1] }
  0x7a   : > { %4207 = vmatprep.subr.mxu1 %v844_v5  ;;  %v610_v15 = vsel %vm603_vm10, %v607_v14, %v599_v13  ;;  %v618_v16 = vstv %s6205_s23  ;;  %s6254_s30 = sld [smem:[#allocation6 + %s682_s10]]  ;;  %s693_s16 = sadd.s32 30, %s6006_s25  ;;  %4266 = vmatpush3.msra.mxu0 %v6297_v58 }
  0x7b   : > { %4208 = vmatpush3.msra.mxu1 %v844_v5  ;;  %v621_v19 = vsel %vm614_vm11, %v618_v16, %v610_v15  ;;  %v629_v20 = vstv %s6216_s19  ;;  %s6261_s26 = sld [smem:[#allocation6 + %s693_s16]]  ;;  %s704_s24 = sadd.s32 31, %s6006_s25  ;;  %4267 = vmatprep.subr.mxu0 %v5812_v4 }
  0x7c   : > { %4209 = vmatprep.subr.mxu1 %v843_v12  ;;  %vm715_vm15 = vcmp.eq.s32.totalorder %v6086_v28, %v621_v19  ;;  %v633_v21 = vsel %vm626_vm12, %v629_v20, 0  ;;  %v640_v22 = vstv %s6225_s27  ;;  %s705_s23 = sld [smem:[#allocation6 + %s704_s24]]  ;;  %4268 = vmatpush3.msra.mxu0 %v6304_v59  ;;  %p3576_p13 = scmp.ne.s32.totalorder %s5892_s0, 2 }
  0x7d   : > { %4210 = vmatpush3.msra.mxu1 %v843_v12  ;;  %v3568_v25 = vsel %vm715_vm15, 1.0, %v5812_v4  ;;  %v644_v26 = vsel %vm637_vm13, %v640_v22, %v633_v21  ;;  %v651_v27 = vstv %s6233_s28  ;;  %4269 = vmatprep.subr.mxu0 %v5812_v4 }
  0x7e   : > { %4211 = vmatprep.subr.mxu1 %v842_v17  ;;  %4200 = vmatprep.mubr.msk.f32.mxu1 %vm733_vm9, %v3568_v25  ;;  %v655_v29 = vsel %vm648_vm14, %v651_v27, %v644_v26  ;;  %v662_v30 = vstv %s6240_s18 }
  0x7f   : > { %4212 = vmatpush3.msra.mxu1 %v842_v17  ;;  %v666_v33 = vsel %vm659_vm0, %v662_v30, %v655_v29  ;;  %v673_v34 = vstv %s6247_s29  ;;  %4270 = vmatpush3.msra.mxu0 %v6308_v60  ;;  %s3296_s29 = ssub.s32 69, %s6006_s25 }
  0x80   : > { %4213 = vmatprep.subr.mxu1 %v841_v23  ;;  %v677_v35 = vsel %vm670_vm1, %v673_v34, %v666_v33  ;;  %v684_v36 = vstv %s6254_s30  ;;  %4271 = vmatprep.subr.mxu0 %v5812_v4  ;;  %p3297_p10 = scmp.lt.s32.totalorder %s3296_s29, 31 }
  0x81   : > { %4214 = vmatpush3.msra.mxu1 %v841_v23  ;;  %v688_v39 = vsel %vm681_vm2, %v684_v36, %v677_v35  ;;  %v695_v40 = vstv %s6261_s26  ;;  %4272 = vmatpush3.msra.mxu0 %v6312_v61 }
  0x82   : > { %4215 = vmatprep.subr.mxu1 %v840_v32  ;;  %v699_v41 = vsel %vm692_vm3, %v695_v40, %v688_v39  ;;  %v706_v42 = vstv %s705_s23  ;;  %4311 = vmatprep.subr.mxu0 %v5812_v4  ;;  %s7535_s29 = smov (!%p3297_p10, %s3296_s29), 31 }
  0x83   : > { %4216 = vmatpush3.msra.mxu1 %v840_v32  ;;  %v710_v45 = vsel %vm703_vm4, %v706_v42, %v699_v41  ;;  %v6525_v42 = vld [vmem:[#allocation12 + $0x78] sm:$0xff]  ;;  %s3299_s10 = scalar_lea.vmem [#allocation4], %s7535_s29 }
  0x84   : > { %4217 = vmatprep.subr.mxu1 %v839_v38  ;;  %vm716_vm5 = vcmp.eq.s32.totalorder %v6086_v28, %v710_v45  ;;  %v832_v28 = vld [vmem:[#allocation10 + $0x8] sm:$0xff] }
  0x85   : > { %4218 = vmatpush3.msra.mxu1 %v839_v38  ;;  %v3569_v47 = vsel %vm716_vm5, 1.0, %v5812_v4  ;;  %v6535_v45 = vld [vmem:[#allocation12 + $0x68] sm:$0xff] }
  0x86   : > { %4219 = vmatprep.subr.mxu1 %v838_v43  ;;  %4201 = vmatmul.mubr.msk.f32.gmra.mxu1 %vm733_vm9, %v3569_v47  ;;  %vm5813_vm9 = vmmov 0  }
  0x87   : > { %4220 = vmatpush3.msra.mxu1 %v838_v43  ;;  %4273 = vmatprep.mubr.msk.f32.mxu0 %vm5813_vm9, %v5812_v4  ;;  %v6531_v43 = vld [vmem:[#allocation12 + $0x70] sm:$0xff] }
  0x88   : > { %4221 = vmatprep.subr.mxu1 %v837_v46  ;;  %4274 = vmatmul.mubr.f32.vlgmr.msra.gmra.mxu0 %v943_v62  ;;  %v6623_v62 = vld [vmem:[#allocation12 + $0x40] sm:$0xff] }
  0x89   : > { %4222 = vmatpush3.msra.mxu1 %v837_v46  ;;  %4312 = vmatpush3.msra.mxu0 %v6038_v10 }
  0x8a   : > { %4223 = vmatprep.subr.mxu1 %v836_v48  ;;  %4343 = vmatprep.mubr.msk.f32.mxu0 %vm5813_vm9, %v5812_v4 }
  0x8b   : > { %4224 = vmatpush3.msra.mxu1 %v836_v48  ;;  %4313 = vmatprep.subr.mxu0 %v5812_v4  ;;  %v6573_v48 = vld [vmem:[#allocation12 + $0x60] sm:$0xff] }
  0x8c   : > { %4225 = vmatprep.subr.mxu1 %v835_v50  ;;  %4314 = vmatpush3.msra.mxu0 %v6040_v11 }
  0x8d   : > { %4226 = vmatpush3.msra.mxu1 %v835_v50  ;;  %4315 = vmatprep.subr.mxu0 %v5812_v4  ;;  %v6577_v50 = vld [vmem:[#allocation12 + $0x58] sm:$0xff] }
  0x8e   : > { %4227 = vmatprep.subr.mxu1 %v834_v51  ;;  %4316 = vmatpush3.msra.mxu0 %v6061_v18 }
  0x8f   : > { %4228 = vmatpush3.msra.mxu1 %v834_v51  ;;  %4317 = vmatprep.subr.mxu0 %v5812_v4  ;;  %v6581_v51 = vld [vmem:[#allocation12 + $0x50] sm:$0xff] }
  0x90   : > { %4229 = vmatprep.subr.mxu1 %v833_v52  ;;  %4318 = vmatpush3.msra.mxu0 %v6079_v24 }
  0x91   : > { %4230 = vmatpush3.msra.mxu1 %v833_v52  ;;  %4319 = vmatprep.subr.mxu0 %v5812_v4 }
  0x92   : > { %4231 = vmatprep.subr.mxu1 %v832_v28  ;;  %4320 = vmatpush3.msra.mxu0 %v6100_v31 }
  0x93   : > { %4232 = vmatpush3.msra.mxu1 %v832_v28  ;;  %4321 = vmatprep.subr.mxu0 %v5812_v4 }
  0x94   : > { %4233 = vmatprep.subr.mxu1 %v831_v55  ;;  %4322 = vmatpush3.msra.mxu0 %v6120_v37 }
  0x95   : > { %4234 = vmatpush3.msra.mxu1 %v831_v55  ;;  %4323 = vmatprep.subr.mxu0 %v5812_v4  ;;  %v6619_v55 = vld [vmem:[#allocation12 + $0x48] sm:$0xff] }
  0x96   : > { %4276 = vmatprep.subr.mxu1 %v5812_v4  ;;  %4324 = vmatpush3.msra.mxu0 %v6144_v44 }
  0x97   : > { %4325 = vmatprep.subr.mxu0 %v5812_v4 }
  0x98   : > { %4326 = vmatpush3.msra.mxu0 %v6163_v49 }
  0x99   : > { %4327 = vmatprep.subr.mxu0 %v5812_v4 }
  0x9a   : > { %4328 = vmatpush3.msra.mxu0 %v6181_v54 }
  0x9b   : > { %4329 = vmatprep.subr.mxu0 %v5812_v4 }
  0x9c   : > { %4330 = vmatpush3.msra.mxu0 %v6287_v53 }
  0x9d   : > { %4331 = vmatprep.subr.mxu0 %v5812_v4 }
  0x9e   : > { %4332 = vmatpush3.msra.mxu0 %v6291_v56 }
  0x9f   : > { %4333 = vmatprep.subr.mxu0 %v5812_v4 }
  0xa0   : > { %4334 = vmatpush3.msra.mxu0 %v6295_v57 }
  0xa1   : > { %4335 = vmatprep.subr.mxu0 %v5812_v4 }
  0xa2   : > { %4336 = vmatpush3.msra.mxu0 %v6297_v58 }
  0xa3   : > { %4337 = vmatprep.subr.mxu0 %v5812_v4 }
  0xa4   : > { %4338 = vmatpush3.msra.mxu0 %v6304_v59 }
  0xa5   : > { %4339 = vmatprep.subr.mxu0 %v5812_v4 }
  0xa6   : > { %4340 = vmatpush3.msra.mxu0 %v6308_v60 }
  0xa7   : > { %4341 = vmatprep.subr.mxu0 %v5812_v4 }
  0xa8   : > { %4342 = vmatpush3.msra.mxu0 %v6312_v61 }
  0xa9   : > { %4381 = vmatprep.subr.mxu0 %v5812_v4 }
 0x136   : > { %v4199_v63 = vpop.f32.mrf.mxu1 }
 0x138   : > { %v812_v0 = vpop.f32.mrf.mxu1 }
 0x139   : > { %4235 = vmatprep.mubr.f32.mxu1 %v812_v0 }
 0x13a   : > { %4236 = vmatmul.mubr.f32.vlgmr.msra.gmra.mxu1 %v4199_v63  ;;  %v6627_v63 = vld [vmem:[#allocation12 + $0x38] sm:$0xff] }
 0x13b   : > { %4277 = vmatpush3.msra.mxu1 %v6038_v10 }
 0x13c   : > { %4278 = vmatprep.subr.mxu1 %v5812_v4 }
 0x13d   : > { %4279 = vmatpush3.msra.mxu1 %v6040_v11 }
 0x13e   : > { %4280 = vmatprep.subr.mxu1 %v5812_v4 }
 0x13f   : > { %4281 = vmatpush3.msra.mxu1 %v6061_v18 }
 0x140   : > { %4282 = vmatprep.subr.mxu1 %v5812_v4 }
 0x141   : > { %4283 = vmatpush3.msra.mxu1 %v6079_v24 }
 0x142   : > { %4284 = vmatprep.subr.mxu1 %v5812_v4 }
 0x143   : > { %4285 = vmatpush3.msra.mxu1 %v6100_v31 }
 0x144   : > { %4286 = vmatprep.subr.mxu1 %v5812_v4 }
 0x145   : > { %4287 = vmatpush3.msra.mxu1 %v6120_v37 }
 0x146   : > { %v4202_v1 = vpop.f32.mrf.mxu1  ;;  %4288 = vmatprep.subr.mxu1 %v5812_v4 }
 0x147   : > { %4289 = vmatpush3.msra.mxu1 %v6144_v44 }
 0x148   : > { %v822_v2 = vpop.f32.mrf.mxu1  ;;  %4290 = vmatprep.subr.mxu1 %v5812_v4  ;;  %v1027_v3 = vpop.f32.mrf.mxu0 }
 0x149   : > { %4238 = vmatprep.mubr.f32.mxu1 %v822_v2  ;;  %4291 = vmatpush3.msra.mxu1 %v6163_v49 }
 0x14a   : > { %4239 = vmatmul.mubr.f32.gmra.mxu1 %v4202_v1  ;;  %4292 = vmatprep.subr.mxu1 %v5812_v4  ;;  %v4275_v5 = vpop.f32.mrf.mxu0 }
 0x14b   : > { %4293 = vmatpush3.msra.mxu1 %v6181_v54  ;;  %4308 = vmatprep.mubr.msk.f32.mxu1 %vm5813_vm9, %v5812_v4 }
 0x14c   : > { %4294 = vmatprep.subr.mxu1 %v5812_v4 }
 0x14d   : > { %4295 = vmatpush3.msra.mxu1 %v6287_v53 }
 0x14e   : > { %4296 = vmatprep.subr.mxu1 %v5812_v4 }
 0x14f   : > { %4297 = vmatpush3.msra.mxu1 %v6291_v56 }
 0x150   : > { %4298 = vmatprep.subr.mxu1 %v5812_v4 }
 0x151   : > { %4299 = vmatpush3.msra.mxu1 %v6295_v57 }
 0x152   : > { %4300 = vmatprep.subr.mxu1 %v5812_v4 }
 0x153   : > { %4301 = vmatpush3.msra.mxu1 %v6297_v58 }
 0x154   : > { %4302 = vmatprep.subr.mxu1 %v5812_v4 }
 0x155   : > { %4303 = vmatpush3.msra.mxu1 %v6304_v59 }
 0x156   : > { %4304 = vmatprep.subr.mxu1 %v5812_v4 }
 0x157   : > { %4305 = vmatpush3.msra.mxu1 %v6308_v60 }
 0x158   : > { %4306 = vmatprep.subr.mxu1 %v5812_v4 }
 0x159   : > { %4307 = vmatpush3.msra.mxu1 %v6312_v61 }
 0x15a   : > { %4346 = vmatprep.subr.mxu1 %v5812_v4 }
 0x1fa   : > { %v4237_v7 = vpop.f32.mrf.mxu1 }
 0x1fb   : > { %v926_v8 = vadd.f32 %v4237_v7, %v3574_v6 }
 0x1fc   : > { %v920_v9 = vpop.f32.mrf.mxu1 }
 0x1fd   : > { %940 = vst [vmem:[#allocation3 + $0x8] sm:$0xff] %v926_v8  ;;  %v921_v12 = vadd.f32 %v3574_v6, %v920_v9 }
 0x1ff   : > { %939 = vst [vmem:[#allocation3] sm:$0xff] %v921_v12 }
 0x206   : > { %v960_v13 = vld [vmem:[#allocation3] sm:$0x1]  ;;  %v1033_v21 = vld [vmem:[#allocation3 + $0x1] sm:$0x1]  ;;  %v1106_v27 = vld [vmem:[#allocation3 + $0x2] sm:$0x1] }
 0x207   : > { %v1028_v14 = vadd.f32 %v1027_v3, %v960_v13  ;;  %v1179_v34 = vld [vmem:[#allocation3 + $0x3] sm:$0x1]  ;;  %v1471_v0 = vld [vmem:[#allocation3 + $0x7] sm:$0x1] }
 0x209   : > { %5493 = vtanh.f32 %v1028_v14 }
 0x20a   : > { %v4240_v15 = vpop.f32.mrf.mxu1 }
 0x20b   : > { %v936_v16 = vadd.f32 %v4240_v15, %v3574_v6 }
 0x20c   : > { %v930_v17 = vpop.f32.mrf.mxu1 }
 0x20d   : > { %942 = vst [vmem:[#allocation3 + $0x18] sm:$0xff] %v936_v16  ;;  %v931_v19 = vadd.f32 %v3574_v6, %v930_v17  ;;  %v1544_v6 = vld [vmem:[#allocation3 + $0x8] sm:$0x1]  ;;  %v6733_v17 = vld [vmem:[#allocation12 + $0x30] sm:$0xff] }
 0x20f   : > { %941 = vst [vmem:[#allocation3 + $0x10] sm:$0xff] %v931_v19 }
 0x216   : > { %v5494_v20 = vpop.eup %5493 }
 0x217   : > { %1032 = vst [vmem:[#allocation4] sm:$0x1] %v5494_v20  ;;  %4309 = vmatmul.mubr.f32.vlgmr.msra.gmra.mxu1 %v5494_v20 }
 0x218   : > { %4347 = vmatpush3.msra.mxu1 %v6038_v10  ;;  %4378 = vmatprep.mubr.msk.f32.mxu1 %vm5813_vm9, %v5812_v4 }
 0x219   : > { %4348 = vmatprep.subr.mxu1 %v5812_v4 }
 0x21a   : > { %4349 = vmatpush3.msra.mxu1 %v6040_v11 }
 0x21b   : > { %4350 = vmatprep.subr.mxu1 %v5812_v4 }
 0x21c   : > { %4351 = vmatpush3.msra.mxu1 %v6061_v18 }
 0x21d   : > { %4352 = vmatprep.subr.mxu1 %v5812_v4 }
 0x21e   : > { %4353 = vmatpush3.msra.mxu1 %v6079_v24 }
 0x21f   : > { %4354 = vmatprep.subr.mxu1 %v5812_v4 }
 0x220   : > { %4355 = vmatpush3.msra.mxu1 %v6100_v31 }
 0x221   : > { %4356 = vmatprep.subr.mxu1 %v5812_v4 }
 0x222   : > { %4357 = vmatpush3.msra.mxu1 %v6120_v37 }
 0x223   : > { %4358 = vmatprep.subr.mxu1 %v5812_v4 }
 0x224   : > { %4359 = vmatpush3.msra.mxu1 %v6144_v44 }
 0x225   : > { %4360 = vmatprep.subr.mxu1 %v5812_v4 }
 0x226   : > { %4361 = vmatpush3.msra.mxu1 %v6163_v49 }
 0x227   : > { %4362 = vmatprep.subr.mxu1 %v5812_v4 }
 0x228   : > { %4363 = vmatpush3.msra.mxu1 %v6181_v54 }
 0x229   : > { %4364 = vmatprep.subr.mxu1 %v5812_v4 }
 0x22a   : > { %4365 = vmatpush3.msra.mxu1 %v6287_v53 }
 0x22b   : > { %4366 = vmatprep.subr.mxu1 %v5812_v4 }
 0x22c   : > { %4367 = vmatpush3.msra.mxu1 %v6291_v56 }
 0x22d   : > { %4368 = vmatprep.subr.mxu1 %v5812_v4 }
 0x22e   : > { %4369 = vmatpush3.msra.mxu1 %v6295_v57 }
 0x22f   : > { %4370 = vmatprep.subr.mxu1 %v5812_v4 }
 0x230   : > { %4371 = vmatpush3.msra.mxu1 %v6297_v58 }
 0x231   : > { %4372 = vmatprep.subr.mxu1 %v5812_v4 }
 0x232   : > { %4373 = vmatpush3.msra.mxu1 %v6304_v59 }
 0x233   : > { %4374 = vmatprep.subr.mxu1 %v5812_v4 }
 0x234   : > { %4375 = vmatpush3.msra.mxu1 %v6308_v60 }
 0x235   : > { %4376 = vmatprep.subr.mxu1 %v5812_v4 }
 0x236   : > { %4377 = vmatpush3.msra.mxu1 %v6312_v61 }
 0x237   : > { %4416 = vmatprep.subr.mxu1 %v5812_v4 }
 0x2d7   : > { %v1100_v22 = vpop.f32.mrf.mxu1 }
 0x2d8   : > { %v1101_v23 = vadd.f32 %v1100_v22, %v1033_v21  ;;  %v6783_v21 = vld [vmem:[#allocation12 + $0x10] sm:$0xff]  ;;  %v6787_v22 = vld [vmem:[#allocation12 + $0x8] sm:$0xff] }
 0x2d9   : > { %v4310_v25 = vpop.f32.mrf.mxu1 }
 0x2da   : > { %5495 = vtanh.f32 %v1101_v23  ;;  %v6791_v23 = vld [vmem:[#allocation12] sm:$0xff]  ;;  %v1763_v25 = vld [vmem:[#allocation3 + $0xb] sm:$0x1] }
 0x2e7   : > { %v5496_v26 = vpop.eup %5495 }
 0x2e8   : > { %1105 = vst [vmem:[#allocation4 + $0x1] sm:$0x1] %v5496_v26  ;;  %4344 = vmatmul.mubr.f32.vlgmr.msra.gmra.mxu0 %v5496_v26 }
 0x2e9   : > { %4382 = vmatpush3.msra.mxu0 %v6038_v10  ;;  %4413 = vmatprep.mubr.msk.f32.mxu0 %vm5813_vm9, %v5812_v4 }
 0x2ea   : > { %4383 = vmatprep.subr.mxu0 %v5812_v4 }
 0x2eb   : > { %4384 = vmatpush3.msra.mxu0 %v6040_v11 }
 0x2ec   : > { %4385 = vmatprep.subr.mxu0 %v5812_v4 }
 0x2ed   : > { %4386 = vmatpush3.msra.mxu0 %v6061_v18 }
 0x2ee   : > { %4387 = vmatprep.subr.mxu0 %v5812_v4 }
 0x2ef   : > { %4388 = vmatpush3.msra.mxu0 %v6079_v24 }
 0x2f0   : > { %4389 = vmatprep.subr.mxu0 %v5812_v4 }
 0x2f1   : > { %4390 = vmatpush3.msra.mxu0 %v6100_v31 }
 0x2f2   : > { %4391 = vmatprep.subr.mxu0 %v5812_v4 }
 0x2f3   : > { %4392 = vmatpush3.msra.mxu0 %v6120_v37 }
 0x2f4   : > { %4393 = vmatprep.subr.mxu0 %v5812_v4 }
 0x2f5   : > { %4394 = vmatpush3.msra.mxu0 %v6144_v44 }
 0x2f6   : > { %4395 = vmatprep.subr.mxu0 %v5812_v4 }
 0x2f7   : > { %4396 = vmatpush3.msra.mxu0 %v6163_v49 }
 0x2f8   : > { %4397 = vmatprep.subr.mxu0 %v5812_v4 }
 0x2f9   : > { %4398 = vmatpush3.msra.mxu0 %v6181_v54 }
 0x2fa   : > { %4399 = vmatprep.subr.mxu0 %v5812_v4 }
 0x2fb   : > { %4400 = vmatpush3.msra.mxu0 %v6287_v53 }
 0x2fc   : > { %4401 = vmatprep.subr.mxu0 %v5812_v4 }
 0x2fd   : > { %4402 = vmatpush3.msra.mxu0 %v6291_v56 }
 0x2fe   : > { %4403 = vmatprep.subr.mxu0 %v5812_v4 }
 0x2ff   : > { %4404 = vmatpush3.msra.mxu0 %v6295_v57 }
 0x300   : > { %4405 = vmatprep.subr.mxu0 %v5812_v4 }
 0x301   : > { %4406 = vmatpush3.msra.mxu0 %v6297_v58 }
 0x302   : > { %4407 = vmatprep.subr.mxu0 %v5812_v4 }
 0x303   : > { %4408 = vmatpush3.msra.mxu0 %v6304_v59 }
 0x304   : > { %4409 = vmatprep.subr.mxu0 %v5812_v4 }
 0x305   : > { %4410 = vmatpush3.msra.mxu0 %v6308_v60 }
 0x306   : > { %4411 = vmatprep.subr.mxu0 %v5812_v4 }
 0x307   : > { %4412 = vmatpush3.msra.mxu0 %v6312_v61 }
 0x308   : > { %4451 = vmatprep.subr.mxu0 %v5812_v4 }
 0x3a8   : > { %v1173_v29 = vpop.f32.mrf.mxu0 }
 0x3a9   : > { %v1174_v30 = vadd.f32 %v1173_v29, %v1106_v27 }
 0x3aa   : > { %v4345_v32 = vpop.f32.mrf.mxu0 }
 0x3ab   : > { %5497 = vtanh.f32 %v1174_v30  ;;  %v1836_v32 = vld [vmem:[#allocation3 + $0xc] sm:$0x1] }
 0x3b8   : > { %v5498_v33 = vpop.eup %5497 }
 0x3b9   : > { %1178 = vst [vmem:[#allocation4 + $0x2] sm:$0x1] %v5498_v33  ;;  %4379 = vmatmul.mubr.f32.vlgmr.msra.gmra.mxu1 %v5498_v33 }
 0x3ba   : > { %4417 = vmatpush3.msra.mxu1 %v6038_v10  ;;  %4448 = vmatprep.mubr.msk.f32.mxu1 %vm5813_vm9, %v5812_v4 }
 0x3bb   : > { %4418 = vmatprep.subr.mxu1 %v5812_v4 }
 0x3bc   : > { %4419 = vmatpush3.msra.mxu1 %v6040_v11 }
 0x3bd   : > { %4420 = vmatprep.subr.mxu1 %v5812_v4 }
 0x3be   : > { %4421 = vmatpush3.msra.mxu1 %v6061_v18 }
 0x3bf   : > { %4422 = vmatprep.subr.mxu1 %v5812_v4 }
 0x3c0   : > { %4423 = vmatpush3.msra.mxu1 %v6079_v24 }
 0x3c1   : > { %4424 = vmatprep.subr.mxu1 %v5812_v4 }
 0x3c2   : > { %4425 = vmatpush3.msra.mxu1 %v6100_v31 }
 0x3c3   : > { %4426 = vmatprep.subr.mxu1 %v5812_v4 }
 0x3c4   : > { %4427 = vmatpush3.msra.mxu1 %v6120_v37 }
 0x3c5   : > { %4428 = vmatprep.subr.mxu1 %v5812_v4 }
 0x3c6   : > { %4429 = vmatpush3.msra.mxu1 %v6144_v44 }
 0x3c7   : > { %4430 = vmatprep.subr.mxu1 %v5812_v4 }
 0x3c8   : > { %4431 = vmatpush3.msra.mxu1 %v6163_v49 }
 0x3c9   : > { %4432 = vmatprep.subr.mxu1 %v5812_v4 }
 0x3ca   : > { %4433 = vmatpush3.msra.mxu1 %v6181_v54 }
 0x3cb   : > { %4434 = vmatprep.subr.mxu1 %v5812_v4 }
 0x3cc   : > { %4435 = vmatpush3.msra.mxu1 %v6287_v53 }
 0x3cd   : > { %4436 = vmatprep.subr.mxu1 %v5812_v4 }
 0x3ce   : > { %4437 = vmatpush3.msra.mxu1 %v6291_v56 }
 0x3cf   : > { %4438 = vmatprep.subr.mxu1 %v5812_v4 }
 0x3d0   : > { %4439 = vmatpush3.msra.mxu1 %v6295_v57 }
 0x3d1   : > { %4440 = vmatprep.subr.mxu1 %v5812_v4 }
 0x3d2   : > { %4441 = vmatpush3.msra.mxu1 %v6297_v58 }
 0x3d3   : > { %4442 = vmatprep.subr.mxu1 %v5812_v4 }
 0x3d4   : > { %4443 = vmatpush3.msra.mxu1 %v6304_v59 }
 0x3d5   : > { %4444 = vmatprep.subr.mxu1 %v5812_v4 }
 0x3d6   : > { %4445 = vmatpush3.msra.mxu1 %v6308_v60 }
 0x3d7   : > { %4446 = vmatprep.subr.mxu1 %v5812_v4 }
 0x3d8   : > { %4447 = vmatpush3.msra.mxu1 %v6312_v61 }
 0x3d9   : > { %4486 = vmatprep.subr.mxu1 %v5812_v4 }
 0x479   : > { %v1246_v35 = vpop.f32.mrf.mxu1 }
 0x47a   : > { %v1247_v36 = vadd.f32 %v1246_v35, %v1179_v34 }
 0x47b   : > { %v4380_v38 = vpop.f32.mrf.mxu1 }
 0x47c   : > { %5499 = vtanh.f32 %v1247_v36  ;;  %v1909_v38 = vld [vmem:[#allocation3 + $0xd] sm:$0x1] }
 0x489   : > { %v5500_v39 = vpop.eup %5499 }
 0x48a   : > { %1251 = vst [vmem:[#allocation4 + $0x3] sm:$0x1] %v5500_v39  ;;  %4414 = vmatmul.mubr.f32.vlgmr.msra.gmra.mxu0 %v5500_v39 }
 0x48b   : > { %4452 = vmatpush3.msra.mxu0 %v6038_v10  ;;  %4483 = vmatprep.mubr.msk.f32.mxu0 %vm5813_vm9, %v5812_v4  ;;  %v1252_v10 = vld [vmem:[#allocation3 + $0x4] sm:$0x1] }
 0x48c   : > { %4453 = vmatprep.subr.mxu0 %v5812_v4 }
 0x48d   : > { %4454 = vmatpush3.msra.mxu0 %v6040_v11 }
 0x48e   : > { %4455 = vmatprep.subr.mxu0 %v5812_v4 }
 0x48f   : > { %4456 = vmatpush3.msra.mxu0 %v6061_v18 }
 0x490   : > { %4457 = vmatprep.subr.mxu0 %v5812_v4 }
 0x491   : > { %4458 = vmatpush3.msra.mxu0 %v6079_v24 }
 0x492   : > { %4459 = vmatprep.subr.mxu0 %v5812_v4 }
 0x493   : > { %4460 = vmatpush3.msra.mxu0 %v6100_v31 }
 0x494   : > { %4461 = vmatprep.subr.mxu0 %v5812_v4 }
 0x495   : > { %4462 = vmatpush3.msra.mxu0 %v6120_v37 }
 0x496   : > { %4463 = vmatprep.subr.mxu0 %v5812_v4 }
 0x497   : > { %4464 = vmatpush3.msra.mxu0 %v6144_v44 }
 0x498   : > { %4465 = vmatprep.subr.mxu0 %v5812_v4 }
 0x499   : > { %4466 = vmatpush3.msra.mxu0 %v6163_v49 }
 0x49a   : > { %4467 = vmatprep.subr.mxu0 %v5812_v4 }
 0x49b   : > { %4468 = vmatpush3.msra.mxu0 %v6181_v54 }
 0x49c   : > { %4469 = vmatprep.subr.mxu0 %v5812_v4 }
 0x49d   : > { %4470 = vmatpush3.msra.mxu0 %v6287_v53 }
 0x49e   : > { %4471 = vmatprep.subr.mxu0 %v5812_v4 }
 0x49f   : > { %4472 = vmatpush3.msra.mxu0 %v6291_v56 }
 0x4a0   : > { %4473 = vmatprep.subr.mxu0 %v5812_v4 }
 0x4a1   : > { %4474 = vmatpush3.msra.mxu0 %v6295_v57 }
 0x4a2   : > { %4475 = vmatprep.subr.mxu0 %v5812_v4 }
 0x4a3   : > { %4476 = vmatpush3.msra.mxu0 %v6297_v58 }
 0x4a4   : > { %4477 = vmatprep.subr.mxu0 %v5812_v4 }
 0x4a5   : > { %4478 = vmatpush3.msra.mxu0 %v6304_v59 }
 0x4a6   : > { %4479 = vmatprep.subr.mxu0 %v5812_v4 }
 0x4a7   : > { %4480 = vmatpush3.msra.mxu0 %v6308_v60 }
 0x4a8   : > { %4481 = vmatprep.subr.mxu0 %v5812_v4 }
 0x4a9   : > { %4482 = vmatpush3.msra.mxu0 %v6312_v61 }
 0x4aa   : > { %4521 = vmatprep.subr.mxu0 %v5812_v4 }
 0x54a   : > { %v1319_v11 = vpop.f32.mrf.mxu0 }
 0x54b   : > { %v1320_v18 = vadd.f32 %v1319_v11, %v1252_v10 }
 0x54c   : > { %v4415_v40 = vpop.f32.mrf.mxu0 }
 0x54d   : > { %5501 = vtanh.f32 %v1320_v18  ;;  %v1982_v40 = vld [vmem:[#allocation3 + $0xe] sm:$0x1] }
 0x55a   : > { %v5502_v41 = vpop.eup %5501 }
 0x55b   : > { %1324 = vst [vmem:[#allocation4 + $0x4] sm:$0x1] %v5502_v41  ;;  %4449 = vmatmul.mubr.f32.vlgmr.msra.gmra.mxu1 %v5502_v41 }
 0x55c   : > { %4487 = vmatpush3.msra.mxu1 %v6525_v42  ;;  %4518 = vmatprep.mubr.msk.f32.mxu1 %vm5813_vm9, %v5812_v4 }
 0x55d   : > { %4488 = vmatprep.subr.mxu1 %v5812_v4 }
 0x55e   : > { %4489 = vmatpush3.msra.mxu1 %v6531_v43 }
 0x55f   : > { %4490 = vmatprep.subr.mxu1 %v5812_v4 }
 0x560   : > { %4491 = vmatpush3.msra.mxu1 %v6535_v45 }
 0x561   : > { %4492 = vmatprep.subr.mxu1 %v5812_v4 }
 0x562   : > { %4493 = vmatpush3.msra.mxu1 %v6079_v24  ;;  %v1325_v24 = vld [vmem:[#allocation3 + $0x5] sm:$0x1] }
 0x563   : > { %4494 = vmatprep.subr.mxu1 %v5812_v4 }
 0x564   : > { %4495 = vmatpush3.msra.mxu1 %v6100_v31 }
 0x565   : > { %4496 = vmatprep.subr.mxu1 %v5812_v4 }
 0x566   : > { %4497 = vmatpush3.msra.mxu1 %v6120_v37 }
 0x567   : > { %4498 = vmatprep.subr.mxu1 %v5812_v4 }
 0x568   : > { %4499 = vmatpush3.msra.mxu1 %v6144_v44 }
 0x569   : > { %4500 = vmatprep.subr.mxu1 %v5812_v4 }
 0x56a   : > { %4501 = vmatpush3.msra.mxu1 %v6163_v49 }
 0x56b   : > { %4502 = vmatprep.subr.mxu1 %v5812_v4 }
 0x56c   : > { %4503 = vmatpush3.msra.mxu1 %v6181_v54 }
 0x56d   : > { %4504 = vmatprep.subr.mxu1 %v5812_v4 }
 0x56e   : > { %4505 = vmatpush3.msra.mxu1 %v6287_v53 }
 0x56f   : > { %4506 = vmatprep.subr.mxu1 %v5812_v4 }
 0x570   : > { %4507 = vmatpush3.msra.mxu1 %v6291_v56 }
 0x571   : > { %4508 = vmatprep.subr.mxu1 %v5812_v4 }
 0x572   : > { %4509 = vmatpush3.msra.mxu1 %v6295_v57 }
 0x573   : > { %4510 = vmatprep.subr.mxu1 %v5812_v4 }
 0x574   : > { %4511 = vmatpush3.msra.mxu1 %v6297_v58 }
 0x575   : > { %4512 = vmatprep.subr.mxu1 %v5812_v4 }
 0x576   : > { %4513 = vmatpush3.msra.mxu1 %v6304_v59 }
 0x577   : > { %4514 = vmatprep.subr.mxu1 %v5812_v4 }
 0x578   : > { %4515 = vmatpush3.msra.mxu1 %v6308_v60 }
 0x579   : > { %4516 = vmatprep.subr.mxu1 %v5812_v4 }
 0x57a   : > { %4517 = vmatpush3.msra.mxu1 %v6312_v61 }
 0x57b   : > { %4556 = vmatprep.subr.mxu1 %v5812_v4 }
 0x61b   : > { %v1392_v31 = vpop.f32.mrf.mxu1 }
 0x61c   : > { %v1393_v37 = vadd.f32 %v1392_v31, %v1325_v24 }
 0x61d   : > { %v4450_v46 = vpop.f32.mrf.mxu1 }
 0x61e   : > { %5503 = vtanh.f32 %v1393_v37  ;;  %v2055_v46 = vld [vmem:[#allocation3 + $0xf] sm:$0x1] }
 0x62b   : > { %v5504_v47 = vpop.eup %5503 }
 0x62c   : > { %1397 = vst [vmem:[#allocation4 + $0x5] sm:$0x1] %v5504_v47  ;;  %4484 = vmatmul.mubr.f32.vlgmr.msra.gmra.mxu0 %v5504_v47 }
 0x62d   : > { %4522 = vmatpush3.msra.mxu0 %v6525_v42  ;;  %4553 = vmatprep.mubr.msk.f32.mxu0 %vm5813_vm9, %v5812_v4 }
 0x62e   : > { %4523 = vmatprep.subr.mxu0 %v5812_v4 }
 0x62f   : > { %4524 = vmatpush3.msra.mxu0 %v6531_v43 }
 0x630   : > { %4525 = vmatprep.subr.mxu0 %v5812_v4 }
 0x631   : > { %4526 = vmatpush3.msra.mxu0 %v6535_v45 }
 0x632   : > { %4527 = vmatprep.subr.mxu0 %v5812_v4 }
 0x633   : > { %4528 = vmatpush3.msra.mxu0 %v6573_v48 }
 0x634   : > { %4529 = vmatprep.subr.mxu0 %v5812_v4 }
 0x635   : > { %4530 = vmatpush3.msra.mxu0 %v6577_v50 }
 0x636   : > { %4531 = vmatprep.subr.mxu0 %v5812_v4 }
 0x637   : > { %4532 = vmatpush3.msra.mxu0 %v6581_v51 }
 0x638   : > { %4533 = vmatprep.subr.mxu0 %v5812_v4 }
 0x639   : > { %4534 = vmatpush3.msra.mxu0 %v6144_v44  ;;  %v1398_v44 = vld [vmem:[#allocation3 + $0x6] sm:$0x1] }
 0x63a   : > { %4535 = vmatprep.subr.mxu0 %v5812_v4 }
 0x63b   : > { %4536 = vmatpush3.msra.mxu0 %v6163_v49 }
 0x63c   : > { %4537 = vmatprep.subr.mxu0 %v5812_v4 }
 0x63d   : > { %4538 = vmatpush3.msra.mxu0 %v6181_v54 }
 0x63e   : > { %4539 = vmatprep.subr.mxu0 %v5812_v4 }
 0x63f   : > { %4540 = vmatpush3.msra.mxu0 %v6287_v53 }
 0x640   : > { %4541 = vmatprep.subr.mxu0 %v5812_v4 }
 0x641   : > { %4542 = vmatpush3.msra.mxu0 %v6291_v56 }
 0x642   : > { %4543 = vmatprep.subr.mxu0 %v5812_v4 }
 0x643   : > { %4544 = vmatpush3.msra.mxu0 %v6295_v57 }
 0x644   : > { %4545 = vmatprep.subr.mxu0 %v5812_v4 }
 0x645   : > { %4546 = vmatpush3.msra.mxu0 %v6297_v58 }
 0x646   : > { %4547 = vmatprep.subr.mxu0 %v5812_v4 }
 0x647   : > { %4548 = vmatpush3.msra.mxu0 %v6304_v59 }
 0x648   : > { %4549 = vmatprep.subr.mxu0 %v5812_v4 }
 0x649   : > { %4550 = vmatpush3.msra.mxu0 %v6308_v60 }
 0x64a   : > { %4551 = vmatprep.subr.mxu0 %v5812_v4 }
 0x64b   : > { %4552 = vmatpush3.msra.mxu0 %v6312_v61 }
 0x64c   : > { %4591 = vmatprep.subr.mxu0 %v5812_v4 }
 0x6ec   : > { %v1465_v49 = vpop.f32.mrf.mxu0 }
 0x6ed   : > { %v1466_v54 = vadd.f32 %v1465_v49, %v1398_v44 }
 0x6ee   : > { %v4485_v52 = vpop.f32.mrf.mxu0 }
 0x6ef   : > { %5505 = vtanh.f32 %v1466_v54  ;;  %v2128_v52 = vld [vmem:[#allocation3 + $0x10] sm:$0x1] }
 0x6fc   : > { %v5506_v28 = vpop.eup %5505 }
 0x6fd   : > { %1470 = vst [vmem:[#allocation4 + $0x6] sm:$0x1] %v5506_v28  ;;  %4519 = vmatmul.mubr.f32.vlgmr.msra.gmra.mxu1 %v5506_v28 }
 0x6fe   : > { %4557 = vmatpush3.msra.mxu1 %v6525_v42  ;;  %4588 = vmatprep.mubr.msk.f32.mxu1 %vm5813_vm9, %v5812_v4 }
 0x6ff   : > { %4558 = vmatprep.subr.mxu1 %v5812_v4 }
 0x700   : > { %4559 = vmatpush3.msra.mxu1 %v6531_v43 }
 0x701   : > { %4560 = vmatprep.subr.mxu1 %v5812_v4 }
 0x702   : > { %4561 = vmatpush3.msra.mxu1 %v6535_v45 }
 0x703   : > { %4562 = vmatprep.subr.mxu1 %v5812_v4 }
 0x704   : > { %4563 = vmatpush3.msra.mxu1 %v6573_v48 }
 0x705   : > { %4564 = vmatprep.subr.mxu1 %v5812_v4 }
 0x706   : > { %4565 = vmatpush3.msra.mxu1 %v6577_v50 }
 0x707   : > { %4566 = vmatprep.subr.mxu1 %v5812_v4 }
 0x708   : > { %4567 = vmatpush3.msra.mxu1 %v6581_v51 }
 0x709   : > { %4568 = vmatprep.subr.mxu1 %v5812_v4 }
 0x70a   : > { %4569 = vmatpush3.msra.mxu1 %v6619_v55 }
 0x70b   : > { %4570 = vmatprep.subr.mxu1 %v5812_v4 }
 0x70c   : > { %4571 = vmatpush3.msra.mxu1 %v6623_v62 }
 0x70d   : > { %4572 = vmatprep.subr.mxu1 %v5812_v4 }
 0x70e   : > { %4573 = vmatpush3.msra.mxu1 %v6627_v63 }
 0x70f   : > { %4574 = vmatprep.subr.mxu1 %v5812_v4 }
 0x710   : > { %4575 = vmatpush3.msra.mxu1 %v6287_v53 }
 0x711   : > { %4576 = vmatprep.subr.mxu1 %v5812_v4 }
 0x712   : > { %4577 = vmatpush3.msra.mxu1 %v6291_v56 }
 0x713   : > { %4578 = vmatprep.subr.mxu1 %v5812_v4 }
 0x714   : > { %4579 = vmatpush3.msra.mxu1 %v6295_v57 }
 0x715   : > { %4580 = vmatprep.subr.mxu1 %v5812_v4 }
 0x716   : > { %4581 = vmatpush3.msra.mxu1 %v6297_v58 }
 0x717   : > { %4582 = vmatprep.subr.mxu1 %v5812_v4 }
 0x718   : > { %4583 = vmatpush3.msra.mxu1 %v6304_v59 }
 0x719   : > { %4584 = vmatprep.subr.mxu1 %v5812_v4 }
 0x71a   : > { %4585 = vmatpush3.msra.mxu1 %v6308_v60 }
 0x71b   : > { %4586 = vmatprep.subr.mxu1 %v5812_v4 }
 0x71c   : > { %4587 = vmatpush3.msra.mxu1 %v6312_v61 }
 0x71d   : > { %4626 = vmatprep.subr.mxu1 %v5812_v4 }
 0x7bd   : > { %v1538_v1 = vpop.f32.mrf.mxu1 }
 0x7be   : > { %v1539_v2 = vadd.f32 %v1538_v1, %v1471_v0 }
 0x7bf   : > { %v4520_v3 = vpop.f32.mrf.mxu1 }
 0x7c0   : > { %5507 = vtanh.f32 %v1539_v2 }
 0x7cd   : > { %v5508_v5 = vpop.eup %5507 }
 0x7ce   : > { %1543 = vst [vmem:[#allocation4 + $0x7] sm:$0x1] %v5508_v5  ;;  %4554 = vmatmul.mubr.f32.vlgmr.msra.gmra.mxu0 %v5508_v5 }
 0x7cf   : > { %4592 = vmatpush3.msra.mxu0 %v6525_v42  ;;  %4623 = vmatprep.mubr.msk.f32.mxu0 %vm5813_vm9, %v5812_v4 }
 0x7d0   : > { %4593 = vmatprep.subr.mxu0 %v5812_v4 }
 0x7d1   : > { %4594 = vmatpush3.msra.mxu0 %v6531_v43 }
 0x7d2   : > { %4595 = vmatprep.subr.mxu0 %v5812_v4 }
 0x7d3   : > { %4596 = vmatpush3.msra.mxu0 %v6535_v45 }
 0x7d4   : > { %4597 = vmatprep.subr.mxu0 %v5812_v4 }
 0x7d5   : > { %4598 = vmatpush3.msra.mxu0 %v6573_v48 }
 0x7d6   : > { %4599 = vmatprep.subr.mxu0 %v5812_v4 }
 0x7d7   : > { %4600 = vmatpush3.msra.mxu0 %v6577_v50 }
 0x7d8   : > { %4601 = vmatprep.subr.mxu0 %v5812_v4 }
 0x7d9   : > { %4602 = vmatpush3.msra.mxu0 %v6581_v51 }
 0x7da   : > { %4603 = vmatprep.subr.mxu0 %v5812_v4 }
 0x7db   : > { %4604 = vmatpush3.msra.mxu0 %v6619_v55 }
 0x7dc   : > { %4605 = vmatprep.subr.mxu0 %v5812_v4 }
 0x7dd   : > { %4606 = vmatpush3.msra.mxu0 %v6623_v62 }
 0x7de   : > { %4607 = vmatprep.subr.mxu0 %v5812_v4 }
 0x7df   : > { %4608 = vmatpush3.msra.mxu0 %v6627_v63 }
 0x7e0   : > { %4609 = vmatprep.subr.mxu0 %v5812_v4 }
 0x7e1   : > { %4610 = vmatpush3.msra.mxu0 %v6287_v53 }
 0x7e2   : > { %4611 = vmatprep.subr.mxu0 %v5812_v4 }
 0x7e3   : > { %4612 = vmatpush3.msra.mxu0 %v6291_v56 }
 0x7e4   : > { %4613 = vmatprep.subr.mxu0 %v5812_v4 }
 0x7e5   : > { %4614 = vmatpush3.msra.mxu0 %v6295_v57 }
 0x7e6   : > { %4615 = vmatprep.subr.mxu0 %v5812_v4 }
 0x7e7   : > { %4616 = vmatpush3.msra.mxu0 %v6297_v58 }
 0x7e8   : > { %4617 = vmatprep.subr.mxu0 %v5812_v4 }
 0x7e9   : > { %4618 = vmatpush3.msra.mxu0 %v6304_v59 }
 0x7ea   : > { %4619 = vmatprep.subr.mxu0 %v5812_v4 }
 0x7eb   : > { %4620 = vmatpush3.msra.mxu0 %v6308_v60 }
 0x7ec   : > { %4621 = vmatprep.subr.mxu0 %v5812_v4 }
 0x7ed   : > { %4622 = vmatpush3.msra.mxu0 %v6312_v61 }
 0x7ee   : > { %4661 = vmatprep.subr.mxu0 %v5812_v4 }
 0x88e   : > { %v1611_v7 = vpop.f32.mrf.mxu0 }
 0x88f   : > { %v1612_v8 = vadd.f32 %v1611_v7, %v1544_v6  ;;  %v6999_v6 = vld [vmem:[#allocation12 + $0x78] sm:$0xff]  ;;  %v7005_v7 = vld [vmem:[#allocation12 + $0x70] sm:$0xff] }
 0x890   : > { %v4555_v9 = vpop.f32.mrf.mxu0 }
 0x891   : > { %5509 = vtanh.f32 %v1612_v8  ;;  %v7009_v8 = vld [vmem:[#allocation12 + $0x68] sm:$0xff] }
 0x89e   : > { %v5510_v12 = vpop.eup %5509 }
 0x89f   : > { %1616 = vst [vmem:[#allocation4 + $0x8] sm:$0x1] %v5510_v12  ;;  %4589 = vmatmul.mubr.f32.vlgmr.msra.gmra.mxu1 %v5510_v12 }
 0x8a0   : > { %4627 = vmatpush3.msra.mxu1 %v6525_v42  ;;  %4658 = vmatprep.mubr.msk.f32.mxu1 %vm5813_vm9, %v5812_v4 }
 0x8a1   : > { %4628 = vmatprep.subr.mxu1 %v5812_v4 }
 0x8a2   : > { %4629 = vmatpush3.msra.mxu1 %v6531_v43 }
 0x8a3   : > { %4630 = vmatprep.subr.mxu1 %v5812_v4 }
 0x8a4   : > { %4631 = vmatpush3.msra.mxu1 %v6535_v45 }
 0x8a5   : > { %4632 = vmatprep.subr.mxu1 %v5812_v4 }
 0x8a6   : > { %4633 = vmatpush3.msra.mxu1 %v6573_v48 }
 0x8a7   : > { %4634 = vmatprep.subr.mxu1 %v5812_v4 }
 0x8a8   : > { %4635 = vmatpush3.msra.mxu1 %v6577_v50 }
 0x8a9   : > { %4636 = vmatprep.subr.mxu1 %v5812_v4 }
 0x8aa   : > { %4637 = vmatpush3.msra.mxu1 %v6581_v51 }
 0x8ab   : > { %4638 = vmatprep.subr.mxu1 %v5812_v4 }
 0x8ac   : > { %4639 = vmatpush3.msra.mxu1 %v6619_v55 }
 0x8ad   : > { %4640 = vmatprep.subr.mxu1 %v5812_v4 }
 0x8ae   : > { %4641 = vmatpush3.msra.mxu1 %v6623_v62 }
 0x8af   : > { %4642 = vmatprep.subr.mxu1 %v5812_v4 }
 0x8b0   : > { %4643 = vmatpush3.msra.mxu1 %v6627_v63 }
 0x8b1   : > { %4644 = vmatprep.subr.mxu1 %v5812_v4 }
 0x8b2   : > { %4645 = vmatpush3.msra.mxu1 %v6287_v53  ;;  %v1617_v53 = vld [vmem:[#allocation3 + $0x9] sm:$0x1] }
 0x8b3   : > { %4646 = vmatprep.subr.mxu1 %v5812_v4 }
 0x8b4   : > { %4647 = vmatpush3.msra.mxu1 %v6291_v56 }
 0x8b5   : > { %4648 = vmatprep.subr.mxu1 %v5812_v4 }
 0x8b6   : > { %4649 = vmatpush3.msra.mxu1 %v6295_v57 }
 0x8b7   : > { %4650 = vmatprep.subr.mxu1 %v5812_v4 }
 0x8b8   : > { %4651 = vmatpush3.msra.mxu1 %v6297_v58 }
 0x8b9   : > { %4652 = vmatprep.subr.mxu1 %v5812_v4 }
 0x8ba   : > { %4653 = vmatpush3.msra.mxu1 %v6304_v59 }
 0x8bb   : > { %4654 = vmatprep.subr.mxu1 %v5812_v4 }
 0x8bc   : > { %4655 = vmatpush3.msra.mxu1 %v6308_v60 }
 0x8bd   : > { %4656 = vmatprep.subr.mxu1 %v5812_v4 }
 0x8be   : > { %4657 = vmatpush3.msra.mxu1 %v6312_v61 }
 0x8bf   : > { %4696 = vmatprep.subr.mxu1 %v5812_v4 }
 0x95f   : > { %v1684_v13 = vpop.f32.mrf.mxu1 }
 0x960   : > { %v1685_v14 = vadd.f32 %v1684_v13, %v1617_v53  ;;  %v7047_v53 = vld [vmem:[#allocation12 + $0x60] sm:$0xff]  ;;  %v7051_v13 = vld [vmem:[#allocation12 + $0x58] sm:$0xff] }
 0x961   : > { %v4590_v15 = vpop.f32.mrf.mxu1 }
 0x962   : > { %5511 = vtanh.f32 %v1685_v14  ;;  %v7055_v14 = vld [vmem:[#allocation12 + $0x50] sm:$0xff] }
 0x96f   : > { %v5512_v16 = vpop.eup %5511 }
 0x970   : > { %1689 = vst [vmem:[#allocation4 + $0x9] sm:$0x1] %v5512_v16  ;;  %4624 = vmatmul.mubr.f32.vlgmr.msra.gmra.mxu0 %v5512_v16 }
 0x971   : > { %4662 = vmatpush3.msra.mxu0 %v6525_v42  ;;  %4693 = vmatprep.mubr.msk.f32.mxu0 %vm5813_vm9, %v5812_v4 }
 0x972   : > { %4663 = vmatprep.subr.mxu0 %v5812_v4 }
 0x973   : > { %4664 = vmatpush3.msra.mxu0 %v6531_v43 }
 0x974   : > { %4665 = vmatprep.subr.mxu0 %v5812_v4 }
 0x975   : > { %4666 = vmatpush3.msra.mxu0 %v6535_v45 }
 0x976   : > { %4667 = vmatprep.subr.mxu0 %v5812_v4 }
 0x977   : > { %4668 = vmatpush3.msra.mxu0 %v6573_v48 }
 0x978   : > { %4669 = vmatprep.subr.mxu0 %v5812_v4 }
 0x979   : > { %4670 = vmatpush3.msra.mxu0 %v6577_v50 }
 0x97a   : > { %4671 = vmatprep.subr.mxu0 %v5812_v4 }
 0x97b   : > { %4672 = vmatpush3.msra.mxu0 %v6581_v51 }
 0x97c   : > { %4673 = vmatprep.subr.mxu0 %v5812_v4 }
 0x97d   : > { %4674 = vmatpush3.msra.mxu0 %v6619_v55 }
 0x97e   : > { %4675 = vmatprep.subr.mxu0 %v5812_v4 }
 0x97f   : > { %4676 = vmatpush3.msra.mxu0 %v6623_v62 }
 0x980   : > { %4677 = vmatprep.subr.mxu0 %v5812_v4 }
 0x981   : > { %4678 = vmatpush3.msra.mxu0 %v6627_v63 }
 0x982   : > { %4679 = vmatprep.subr.mxu0 %v5812_v4 }
 0x983   : > { %4680 = vmatpush3.msra.mxu0 %v6733_v17 }
 0x984   : > { %4681 = vmatprep.subr.mxu0 %v5812_v4 }
 0x985   : > { %4682 = vmatpush3.msra.mxu0 %v6291_v56  ;;  %v1690_v56 = vld [vmem:[#allocation3 + $0xa] sm:$0x1] }
 0x986   : > { %4683 = vmatprep.subr.mxu0 %v5812_v4 }
 0x987   : > { %4684 = vmatpush3.msra.mxu0 %v6295_v57 }
 0x988   : > { %4685 = vmatprep.subr.mxu0 %v5812_v4 }
 0x989   : > { %4686 = vmatpush3.msra.mxu0 %v6297_v58 }
 0x98a   : > { %4687 = vmatprep.subr.mxu0 %v5812_v4 }
 0x98b   : > { %4688 = vmatpush3.msra.mxu0 %v6304_v59  ;;  %v6771_v59 = vld [vmem:[#allocation12 + $0x28] sm:$0xff] }
 0x98c   : > { %4689 = vmatprep.subr.mxu0 %v5812_v4 }
 0x98d   : > { %4690 = vmatpush3.msra.mxu0 %v6308_v60  ;;  %v6775_v60 = vld [vmem:[#allocation12 + $0x20] sm:$0xff] }
 0x98e   : > { %4691 = vmatprep.subr.mxu0 %v5812_v4 }
 0x98f   : > { %4692 = vmatpush3.msra.mxu0 %v6312_v61  ;;  %v6779_v61 = vld [vmem:[#allocation12 + $0x18] sm:$0xff] }
 0x990   : > { %4731 = vmatprep.subr.mxu0 %v5812_v4 }
 0xa30   : > { %v1757_v57 = vpop.f32.mrf.mxu0 }
 0xa31   : > { %v1758_v19 = vadd.f32 %v1757_v57, %v1690_v56  ;;  %v7093_v56 = vld [vmem:[#allocation12 + $0x48] sm:$0xff]  ;;  %v7097_v57 = vld [vmem:[#allocation12 + $0x40] sm:$0xff] }
 0xa32   : > { %v4625_v20 = vpop.f32.mrf.mxu0 }
 0xa33   : > { %5513 = vtanh.f32 %v1758_v19  ;;  %v7101_v19 = vld [vmem:[#allocation12 + $0x38] sm:$0xff]  ;;  %v2420_v20 = vld [vmem:[#allocation3 + $0x14] sm:$0x1] }
 0xa40   : > { %v5514_v58 = vpop.eup %5513 }
 0xa41   : > { %1762 = vst [vmem:[#allocation4 + $0xa] sm:$0x1] %v5514_v58  ;;  %4659 = vmatmul.mubr.f32.vlgmr.msra.gmra.mxu1 %v5514_v58 }
 0xa42   : > { %4697 = vmatpush3.msra.mxu1 %v6525_v42  ;;  %4728 = vmatprep.mubr.msk.f32.mxu1 %vm5813_vm9, %v5812_v4 }
 0xa43   : > { %4698 = vmatprep.subr.mxu1 %v5812_v4 }
 0xa44   : > { %4699 = vmatpush3.msra.mxu1 %v6531_v43 }
 0xa45   : > { %4700 = vmatprep.subr.mxu1 %v5812_v4 }
 0xa46   : > { %4701 = vmatpush3.msra.mxu1 %v6535_v45 }
 0xa47   : > { %4702 = vmatprep.subr.mxu1 %v5812_v4 }
 0xa48   : > { %4703 = vmatpush3.msra.mxu1 %v6573_v48 }
 0xa49   : > { %4704 = vmatprep.subr.mxu1 %v5812_v4 }
 0xa4a   : > { %4705 = vmatpush3.msra.mxu1 %v6577_v50 }
 0xa4b   : > { %4706 = vmatprep.subr.mxu1 %v5812_v4 }
 0xa4c   : > { %4707 = vmatpush3.msra.mxu1 %v6581_v51 }
 0xa4d   : > { %4708 = vmatprep.subr.mxu1 %v5812_v4 }
 0xa4e   : > { %4709 = vmatpush3.msra.mxu1 %v6619_v55 }
 0xa4f   : > { %4710 = vmatprep.subr.mxu1 %v5812_v4 }
 0xa50   : > { %4711 = vmatpush3.msra.mxu1 %v6623_v62 }
 0xa51   : > { %4712 = vmatprep.subr.mxu1 %v5812_v4 }
 0xa52   : > { %4713 = vmatpush3.msra.mxu1 %v6627_v63 }
 0xa53   : > { %4714 = vmatprep.subr.mxu1 %v5812_v4 }
 0xa54   : > { %4715 = vmatpush3.msra.mxu1 %v6733_v17 }
 0xa55   : > { %4716 = vmatprep.subr.mxu1 %v5812_v4 }
 0xa56   : > { %4717 = vmatpush3.msra.mxu1 %v6771_v59 }
 0xa57   : > { %4718 = vmatprep.subr.mxu1 %v5812_v4 }
 0xa58   : > { %4719 = vmatpush3.msra.mxu1 %v6775_v60 }
 0xa59   : > { %4720 = vmatprep.subr.mxu1 %v5812_v4 }
 0xa5a   : > { %4721 = vmatpush3.msra.mxu1 %v6779_v61 }
 0xa5b   : > { %4722 = vmatprep.subr.mxu1 %v5812_v4 }
 0xa5c   : > { %4723 = vmatpush3.msra.mxu1 %v6783_v21 }
 0xa5d   : > { %4724 = vmatprep.subr.mxu1 %v5812_v4 }
 0xa5e   : > { %4725 = vmatpush3.msra.mxu1 %v6787_v22 }
 0xa5f   : > { %4726 = vmatprep.subr.mxu1 %v5812_v4 }
 0xa60   : > { %4727 = vmatpush3.msra.mxu1 %v6791_v23 }
 0xa61   : > { %4766 = vmatprep.subr.mxu1 %v5812_v4 }
 0xb01   : > { %v1830_v26 = vpop.f32.mrf.mxu1 }
 0xb02   : > { %v1831_v27 = vadd.f32 %v1830_v26, %v1763_v25 }
 0xb03   : > { %v4660_v29 = vpop.f32.mrf.mxu1 }
 0xb04   : > { %5515 = vtanh.f32 %v1831_v27  ;;  %v2493_v29 = vld [vmem:[#allocation3 + $0x15] sm:$0x1] }
 0xb11   : > { %v5516_v30 = vpop.eup %5515 }
 0xb12   : > { %1835 = vst [vmem:[#allocation4 + $0xb] sm:$0x1] %v5516_v30  ;;  %4694 = vmatmul.mubr.f32.vlgmr.msra.gmra.mxu0 %v5516_v30 }
 0xb13   : > { %4732 = vmatpush3.msra.mxu0 %v6525_v42  ;;  %4763 = vmatprep.mubr.msk.f32.mxu0 %vm5813_vm9, %v5812_v4 }
 0xb14   : > { %4733 = vmatprep.subr.mxu0 %v5812_v4 }
 0xb15   : > { %4734 = vmatpush3.msra.mxu0 %v6531_v43 }
 0xb16   : > { %4735 = vmatprep.subr.mxu0 %v5812_v4 }
 0xb17   : > { %4736 = vmatpush3.msra.mxu0 %v6535_v45 }
 0xb18   : > { %4737 = vmatprep.subr.mxu0 %v5812_v4 }
 0xb19   : > { %4738 = vmatpush3.msra.mxu0 %v6573_v48 }
 0xb1a   : > { %4739 = vmatprep.subr.mxu0 %v5812_v4 }
 0xb1b   : > { %4740 = vmatpush3.msra.mxu0 %v6577_v50 }
 0xb1c   : > { %4741 = vmatprep.subr.mxu0 %v5812_v4 }
 0xb1d   : > { %4742 = vmatpush3.msra.mxu0 %v6581_v51 }
 0xb1e   : > { %4743 = vmatprep.subr.mxu0 %v5812_v4 }
 0xb1f   : > { %4744 = vmatpush3.msra.mxu0 %v6619_v55 }
 0xb20   : > { %4745 = vmatprep.subr.mxu0 %v5812_v4 }
 0xb21   : > { %4746 = vmatpush3.msra.mxu0 %v6623_v62 }
 0xb22   : > { %4747 = vmatprep.subr.mxu0 %v5812_v4 }
 0xb23   : > { %4748 = vmatpush3.msra.mxu0 %v6627_v63 }
 0xb24   : > { %4749 = vmatprep.subr.mxu0 %v5812_v4 }
 0xb25   : > { %4750 = vmatpush3.msra.mxu0 %v6733_v17 }
 0xb26   : > { %4751 = vmatprep.subr.mxu0 %v5812_v4 }
 0xb27   : > { %4752 = vmatpush3.msra.mxu0 %v6771_v59 }
 0xb28   : > { %4753 = vmatprep.subr.mxu0 %v5812_v4 }
 0xb29   : > { %4754 = vmatpush3.msra.mxu0 %v6775_v60 }
 0xb2a   : > { %4755 = vmatprep.subr.mxu0 %v5812_v4 }
 0xb2b   : > { %4756 = vmatpush3.msra.mxu0 %v6779_v61 }
 0xb2c   : > { %4757 = vmatprep.subr.mxu0 %v5812_v4 }
 0xb2d   : > { %4758 = vmatpush3.msra.mxu0 %v6783_v21 }
 0xb2e   : > { %4759 = vmatprep.subr.mxu0 %v5812_v4 }
 0xb2f   : > { %4760 = vmatpush3.msra.mxu0 %v6787_v22 }
 0xb30   : > { %4761 = vmatprep.subr.mxu0 %v5812_v4 }
 0xb31   : > { %4762 = vmatpush3.msra.mxu0 %v6791_v23 }
 0xb32   : > { %4801 = vmatprep.subr.mxu0 %v5812_v4 }
 0xbd2   : > { %v1903_v33 = vpop.f32.mrf.mxu0 }
 0xbd3   : > { %v1904_v34 = vadd.f32 %v1903_v33, %v1836_v32 }
 0xbd4   : > { %v4695_v35 = vpop.f32.mrf.mxu0 }
 0xbd5   : > { %5517 = vtanh.f32 %v1904_v34 }
 0xbe2   : > { %v5518_v36 = vpop.eup %5517 }
 0xbe3   : > { %1908 = vst [vmem:[#allocation4 + $0xc] sm:$0x1] %v5518_v36  ;;  %4729 = vmatmul.mubr.f32.vlgmr.msra.gmra.mxu1 %v5518_v36 }
 0xbe4   : > { %4767 = vmatpush3.msra.mxu1 %v6525_v42  ;;  %4798 = vmatprep.mubr.msk.f32.mxu1 %vm5813_vm9, %v5812_v4 }
 0xbe5   : > { %4768 = vmatprep.subr.mxu1 %v5812_v4 }
 0xbe6   : > { %4769 = vmatpush3.msra.mxu1 %v6531_v43 }
 0xbe7   : > { %4770 = vmatprep.subr.mxu1 %v5812_v4 }
 0xbe8   : > { %4771 = vmatpush3.msra.mxu1 %v6535_v45 }
 0xbe9   : > { %4772 = vmatprep.subr.mxu1 %v5812_v4 }
 0xbea   : > { %4773 = vmatpush3.msra.mxu1 %v6573_v48 }
 0xbeb   : > { %4774 = vmatprep.subr.mxu1 %v5812_v4 }
 0xbec   : > { %4775 = vmatpush3.msra.mxu1 %v6577_v50 }
 0xbed   : > { %4776 = vmatprep.subr.mxu1 %v5812_v4 }
 0xbee   : > { %4777 = vmatpush3.msra.mxu1 %v6581_v51 }
 0xbef   : > { %4778 = vmatprep.subr.mxu1 %v5812_v4 }
 0xbf0   : > { %4779 = vmatpush3.msra.mxu1 %v6619_v55 }
 0xbf1   : > { %4780 = vmatprep.subr.mxu1 %v5812_v4 }
 0xbf2   : > { %4781 = vmatpush3.msra.mxu1 %v6623_v62 }
 0xbf3   : > { %4782 = vmatprep.subr.mxu1 %v5812_v4 }
 0xbf4   : > { %4783 = vmatpush3.msra.mxu1 %v6627_v63 }
 0xbf5   : > { %4784 = vmatprep.subr.mxu1 %v5812_v4 }
 0xbf6   : > { %4785 = vmatpush3.msra.mxu1 %v6733_v17 }
 0xbf7   : > { %4786 = vmatprep.subr.mxu1 %v5812_v4 }
 0xbf8   : > { %4787 = vmatpush3.msra.mxu1 %v6771_v59 }
 0xbf9   : > { %4788 = vmatprep.subr.mxu1 %v5812_v4 }
 0xbfa   : > { %4789 = vmatpush3.msra.mxu1 %v6775_v60 }
 0xbfb   : > { %4790 = vmatprep.subr.mxu1 %v5812_v4 }
 0xbfc   : > { %4791 = vmatpush3.msra.mxu1 %v6779_v61 }
 0xbfd   : > { %4792 = vmatprep.subr.mxu1 %v5812_v4 }
 0xbfe   : > { %4793 = vmatpush3.msra.mxu1 %v6783_v21 }
 0xbff   : > { %4794 = vmatprep.subr.mxu1 %v5812_v4 }
 0xc00   : > { %4795 = vmatpush3.msra.mxu1 %v6787_v22 }
 0xc01   : > { %4796 = vmatprep.subr.mxu1 %v5812_v4 }
 0xc02   : > { %4797 = vmatpush3.msra.mxu1 %v6791_v23 }
 0xc03   : > { %4836 = vmatprep.subr.mxu1 %v5812_v4 }
 0xca3   : > { %v1976_v39 = vpop.f32.mrf.mxu1 }
 0xca4   : > { %v1977_v10 = vadd.f32 %v1976_v39, %v1909_v38 }
 0xca5   : > { %v4730_v11 = vpop.f32.mrf.mxu1 }
 0xca6   : > { %5519 = vtanh.f32 %v1977_v10  ;;  %v7207_v10 = vld [vmem:[#allocation12 + $0x30] sm:$0xff] }
 0xcb3   : > { %v5520_v18 = vpop.eup %5519 }
 0xcb4   : > { %1981 = vst [vmem:[#allocation4 + $0xd] sm:$0x1] %v5520_v18  ;;  %4764 = vmatmul.mubr.f32.vlgmr.msra.gmra.mxu0 %v5520_v18 }
 0xcb5   : > { %4802 = vmatpush3.msra.mxu0 %v6525_v42  ;;  %4833 = vmatprep.mubr.msk.f32.mxu0 %vm5813_vm9, %v5812_v4 }
 0xcb6   : > { %4803 = vmatprep.subr.mxu0 %v5812_v4 }
 0xcb7   : > { %4804 = vmatpush3.msra.mxu0 %v6531_v43 }
 0xcb8   : > { %4805 = vmatprep.subr.mxu0 %v5812_v4 }
 0xcb9   : > { %4806 = vmatpush3.msra.mxu0 %v6535_v45 }
 0xcba   : > { %4807 = vmatprep.subr.mxu0 %v5812_v4 }
 0xcbb   : > { %4808 = vmatpush3.msra.mxu0 %v6573_v48 }
 0xcbc   : > { %4809 = vmatprep.subr.mxu0 %v5812_v4 }
 0xcbd   : > { %4810 = vmatpush3.msra.mxu0 %v6577_v50 }
 0xcbe   : > { %4811 = vmatprep.subr.mxu0 %v5812_v4 }
 0xcbf   : > { %4812 = vmatpush3.msra.mxu0 %v6581_v51 }
 0xcc0   : > { %4813 = vmatprep.subr.mxu0 %v5812_v4 }
 0xcc1   : > { %4814 = vmatpush3.msra.mxu0 %v6619_v55 }
 0xcc2   : > { %4815 = vmatprep.subr.mxu0 %v5812_v4 }
 0xcc3   : > { %4816 = vmatpush3.msra.mxu0 %v6623_v62 }
 0xcc4   : > { %4817 = vmatprep.subr.mxu0 %v5812_v4 }
 0xcc5   : > { %4818 = vmatpush3.msra.mxu0 %v6627_v63 }
 0xcc6   : > { %4819 = vmatprep.subr.mxu0 %v5812_v4 }
 0xcc7   : > { %4820 = vmatpush3.msra.mxu0 %v6733_v17 }
 0xcc8   : > { %4821 = vmatprep.subr.mxu0 %v5812_v4 }
 0xcc9   : > { %4822 = vmatpush3.msra.mxu0 %v6771_v59 }
 0xcca   : > { %4823 = vmatprep.subr.mxu0 %v5812_v4 }
 0xccb   : > { %4824 = vmatpush3.msra.mxu0 %v6775_v60 }
 0xccc   : > { %4825 = vmatprep.subr.mxu0 %v5812_v4 }
 0xccd   : > { %4826 = vmatpush3.msra.mxu0 %v6779_v61 }
 0xcce   : > { %4827 = vmatprep.subr.mxu0 %v5812_v4 }
 0xccf   : > { %4828 = vmatpush3.msra.mxu0 %v6783_v21 }
 0xcd0   : > { %4829 = vmatprep.subr.mxu0 %v5812_v4 }
 0xcd1   : > { %4830 = vmatpush3.msra.mxu0 %v6787_v22 }
 0xcd2   : > { %4831 = vmatprep.subr.mxu0 %v5812_v4 }
 0xcd3   : > { %4832 = vmatpush3.msra.mxu0 %v6791_v23 }
 0xcd4   : > { %4871 = vmatprep.subr.mxu0 %v5812_v4 }
 0xd74   : > { %v2049_v41 = vpop.f32.mrf.mxu0 }
 0xd75   : > { %v2050_v24 = vadd.f32 %v2049_v41, %v1982_v40  ;;  %v7257_v40 = vld [vmem:[#allocation12 + $0x10] sm:$0xff]  ;;  %v7261_v41 = vld [vmem:[#allocation12 + $0x8] sm:$0xff] }
 0xd76   : > { %v4765_v31 = vpop.f32.mrf.mxu0 }
 0xd77   : > { %5521 = vtanh.f32 %v2050_v24  ;;  %v7265_v24 = vld [vmem:[#allocation12] sm:$0xff]  ;;  %v2712_v31 = vld [vmem:[#allocation3 + $0x18] sm:$0x1] }
 0xd84   : > { %v5522_v37 = vpop.eup %5521 }
 0xd85   : > { %2054 = vst [vmem:[#allocation4 + $0xe] sm:$0x1] %v5522_v37  ;;  %4799 = vmatmul.mubr.f32.vlgmr.msra.gmra.mxu1 %v5522_v37 }
 0xd86   : > { %4837 = vmatpush3.msra.mxu1 %v6525_v42  ;;  %4868 = vmatprep.mubr.msk.f32.mxu1 %vm5813_vm9, %v5812_v4 }
 0xd87   : > { %4838 = vmatprep.subr.mxu1 %v5812_v4 }
 0xd88   : > { %4839 = vmatpush3.msra.mxu1 %v6531_v43 }
 0xd89   : > { %4840 = vmatprep.subr.mxu1 %v5812_v4 }
 0xd8a   : > { %4841 = vmatpush3.msra.mxu1 %v6535_v45 }
 0xd8b   : > { %4842 = vmatprep.subr.mxu1 %v5812_v4 }
 0xd8c   : > { %4843 = vmatpush3.msra.mxu1 %v6573_v48 }
 0xd8d   : > { %4844 = vmatprep.subr.mxu1 %v5812_v4 }
 0xd8e   : > { %4845 = vmatpush3.msra.mxu1 %v6577_v50 }
 0xd8f   : > { %4846 = vmatprep.subr.mxu1 %v5812_v4 }
 0xd90   : > { %4847 = vmatpush3.msra.mxu1 %v6581_v51 }
 0xd91   : > { %4848 = vmatprep.subr.mxu1 %v5812_v4 }
 0xd92   : > { %4849 = vmatpush3.msra.mxu1 %v6619_v55 }
 0xd93   : > { %4850 = vmatprep.subr.mxu1 %v5812_v4 }
 0xd94   : > { %4851 = vmatpush3.msra.mxu1 %v6623_v62 }
 0xd95   : > { %4852 = vmatprep.subr.mxu1 %v5812_v4 }
 0xd96   : > { %4853 = vmatpush3.msra.mxu1 %v6627_v63 }
 0xd97   : > { %4854 = vmatprep.subr.mxu1 %v5812_v4 }
 0xd98   : > { %4855 = vmatpush3.msra.mxu1 %v6733_v17 }
 0xd99   : > { %4856 = vmatprep.subr.mxu1 %v5812_v4 }
 0xd9a   : > { %4857 = vmatpush3.msra.mxu1 %v6771_v59 }
 0xd9b   : > { %4858 = vmatprep.subr.mxu1 %v5812_v4 }
 0xd9c   : > { %4859 = vmatpush3.msra.mxu1 %v6775_v60 }
 0xd9d   : > { %4860 = vmatprep.subr.mxu1 %v5812_v4 }
 0xd9e   : > { %4861 = vmatpush3.msra.mxu1 %v6779_v61 }
 0xd9f   : > { %4862 = vmatprep.subr.mxu1 %v5812_v4 }
 0xda0   : > { %4863 = vmatpush3.msra.mxu1 %v6783_v21 }
 0xda1   : > { %4864 = vmatprep.subr.mxu1 %v5812_v4 }
 0xda2   : > { %4865 = vmatpush3.msra.mxu1 %v6787_v22 }
 0xda3   : > { %4866 = vmatprep.subr.mxu1 %v5812_v4 }
 0xda4   : > { %4867 = vmatpush3.msra.mxu1 %v6791_v23 }
 0xda5   : > { %4906 = vmatprep.subr.mxu1 %v5812_v4 }
 0xe45   : > { %v2122_v47 = vpop.f32.mrf.mxu1 }
 0xe46   : > { %v2123_v44 = vadd.f32 %v2122_v47, %v2055_v46 }
 0xe47   : > { %v4800_v49 = vpop.f32.mrf.mxu1 }
 0xe48   : > { %5523 = vtanh.f32 %v2123_v44  ;;  %v2785_v49 = vld [vmem:[#allocation3 + $0x19] sm:$0x1] }
 0xe55   : > { %v5524_v54 = vpop.eup %5523 }
 0xe56   : > { %2127 = vst [vmem:[#allocation4 + $0xf] sm:$0x1] %v5524_v54  ;;  %4834 = vmatmul.mubr.f32.vlgmr.msra.gmra.mxu0 %v5524_v54 }
 0xe57   : > { %4872 = vmatpush3.msra.mxu0 %v6525_v42  ;;  %4903 = vmatprep.mubr.msk.f32.mxu0 %vm5813_vm9, %v5812_v4 }
 0xe58   : > { %4873 = vmatprep.subr.mxu0 %v5812_v4 }
 0xe59   : > { %4874 = vmatpush3.msra.mxu0 %v6531_v43 }
 0xe5a   : > { %4875 = vmatprep.subr.mxu0 %v5812_v4 }
 0xe5b   : > { %4876 = vmatpush3.msra.mxu0 %v6535_v45 }
 0xe5c   : > { %4877 = vmatprep.subr.mxu0 %v5812_v4 }
 0xe5d   : > { %4878 = vmatpush3.msra.mxu0 %v6573_v48 }
 0xe5e   : > { %4879 = vmatprep.subr.mxu0 %v5812_v4 }
 0xe5f   : > { %4880 = vmatpush3.msra.mxu0 %v6577_v50 }
 0xe60   : > { %4881 = vmatprep.subr.mxu0 %v5812_v4 }
 0xe61   : > { %4882 = vmatpush3.msra.mxu0 %v6581_v51 }
 0xe62   : > { %4883 = vmatprep.subr.mxu0 %v5812_v4 }
 0xe63   : > { %4884 = vmatpush3.msra.mxu0 %v6619_v55 }
 0xe64   : > { %4885 = vmatprep.subr.mxu0 %v5812_v4 }
 0xe65   : > { %4886 = vmatpush3.msra.mxu0 %v6623_v62 }
 0xe66   : > { %4887 = vmatprep.subr.mxu0 %v5812_v4 }
 0xe67   : > { %4888 = vmatpush3.msra.mxu0 %v6627_v63 }
 0xe68   : > { %4889 = vmatprep.subr.mxu0 %v5812_v4 }
 0xe69   : > { %4890 = vmatpush3.msra.mxu0 %v6733_v17 }
 0xe6a   : > { %4891 = vmatprep.subr.mxu0 %v5812_v4 }
 0xe6b   : > { %4892 = vmatpush3.msra.mxu0 %v6771_v59 }
 0xe6c   : > { %4893 = vmatprep.subr.mxu0 %v5812_v4 }
 0xe6d   : > { %4894 = vmatpush3.msra.mxu0 %v6775_v60 }
 0xe6e   : > { %4895 = vmatprep.subr.mxu0 %v5812_v4 }
 0xe6f   : > { %4896 = vmatpush3.msra.mxu0 %v6779_v61 }
 0xe70   : > { %4897 = vmatprep.subr.mxu0 %v5812_v4 }
 0xe71   : > { %4898 = vmatpush3.msra.mxu0 %v6783_v21 }
 0xe72   : > { %4899 = vmatprep.subr.mxu0 %v5812_v4 }
 0xe73   : > { %4900 = vmatpush3.msra.mxu0 %v6787_v22 }
 0xe74   : > { %4901 = vmatprep.subr.mxu0 %v5812_v4 }
 0xe75   : > { %4902 = vmatpush3.msra.mxu0 %v6791_v23 }
 0xe76   : > { %4941 = vmatprep.subr.mxu0 %v5812_v4 }
 0xf16   : > { %v2195_v28 = vpop.f32.mrf.mxu0 }
 0xf17   : > { %v2196_v0 = vadd.f32 %v2195_v28, %v2128_v52 }
 0xf18   : > { %v4835_v1 = vpop.f32.mrf.mxu0 }
 0xf19   : > { %5525 = vtanh.f32 %v2196_v0  ;;  %v2858_v1 = vld [vmem:[#allocation3 + $0x1a] sm:$0x1] }
 0xf26   : > { %v5526_v2 = vpop.eup %5525 }
 0xf27   : > { %2200 = vst [vmem:[#allocation4 + $0x10] sm:$0x1] %v5526_v2  ;;  %4869 = vmatmul.mubr.f32.vlgmr.msra.gmra.mxu1 %v5526_v2 }
 0xf28   : > { %4907 = vmatpush3.msra.mxu1 %v6525_v42  ;;  %4938 = vmatprep.mubr.msk.f32.mxu1 %vm5813_vm9, %v5812_v4  ;;  %v2201_v42 = vld [vmem:[#allocation3 + $0x11] sm:$0x1] }
 0xf29   : > { %4908 = vmatprep.subr.mxu1 %v5812_v4 }
 0xf2a   : > { %4909 = vmatpush3.msra.mxu1 %v6531_v43 }
 0xf2b   : > { %4910 = vmatprep.subr.mxu1 %v5812_v4 }
 0xf2c   : > { %4911 = vmatpush3.msra.mxu1 %v6535_v45 }
 0xf2d   : > { %4912 = vmatprep.subr.mxu1 %v5812_v4 }
 0xf2e   : > { %4913 = vmatpush3.msra.mxu1 %v6573_v48 }
 0xf2f   : > { %4914 = vmatprep.subr.mxu1 %v5812_v4 }
 0xf30   : > { %4915 = vmatpush3.msra.mxu1 %v6577_v50 }
 0xf31   : > { %4916 = vmatprep.subr.mxu1 %v5812_v4 }
 0xf32   : > { %4917 = vmatpush3.msra.mxu1 %v6581_v51 }
 0xf33   : > { %4918 = vmatprep.subr.mxu1 %v5812_v4 }
 0xf34   : > { %4919 = vmatpush3.msra.mxu1 %v6619_v55 }
 0xf35   : > { %4920 = vmatprep.subr.mxu1 %v5812_v4 }
 0xf36   : > { %4921 = vmatpush3.msra.mxu1 %v6623_v62 }
 0xf37   : > { %4922 = vmatprep.subr.mxu1 %v5812_v4 }
 0xf38   : > { %4923 = vmatpush3.msra.mxu1 %v6627_v63 }
 0xf39   : > { %4924 = vmatprep.subr.mxu1 %v5812_v4 }
 0xf3a   : > { %4925 = vmatpush3.msra.mxu1 %v6733_v17 }
 0xf3b   : > { %4926 = vmatprep.subr.mxu1 %v5812_v4 }
 0xf3c   : > { %4927 = vmatpush3.msra.mxu1 %v6771_v59 }
 0xf3d   : > { %4928 = vmatprep.subr.mxu1 %v5812_v4 }
 0xf3e   : > { %4929 = vmatpush3.msra.mxu1 %v6775_v60 }
 0xf3f   : > { %4930 = vmatprep.subr.mxu1 %v5812_v4 }
 0xf40   : > { %4931 = vmatpush3.msra.mxu1 %v6779_v61 }
 0xf41   : > { %4932 = vmatprep.subr.mxu1 %v5812_v4 }
 0xf42   : > { %4933 = vmatpush3.msra.mxu1 %v6783_v21 }
 0xf43   : > { %4934 = vmatprep.subr.mxu1 %v5812_v4 }
 0xf44   : > { %4935 = vmatpush3.msra.mxu1 %v6787_v22 }
 0xf45   : > { %4936 = vmatprep.subr.mxu1 %v5812_v4 }
 0xf46   : > { %4937 = vmatpush3.msra.mxu1 %v6791_v23 }
 0xf47   : > { %4976 = vmatprep.subr.mxu1 %v5812_v4 }
 0xfe7   : > { %v2268_v43 = vpop.f32.mrf.mxu1 }
 0xfe8   : > { %v2269_v45 = vadd.f32 %v2268_v43, %v2201_v42 }
 0xfe9   : > { %v4870_v3 = vpop.f32.mrf.mxu1 }
 0xfea   : > { %5527 = vtanh.f32 %v2269_v45  ;;  %v2931_v3 = vld [vmem:[#allocation3 + $0x1b] sm:$0x1] }
 0xff7   : > { %v5528_v5 = vpop.eup %5527 }
 0xff8   : > { %2273 = vst [vmem:[#allocation4 + $0x11] sm:$0x1] %v5528_v5  ;;  %4904 = vmatmul.mubr.f32.vlgmr.msra.gmra.mxu0 %v5528_v5 }
 0xff9   : > { %4942 = vmatpush3.msra.mxu0 %v6999_v6  ;;  %4973 = vmatprep.mubr.msk.f32.mxu0 %vm5813_vm9, %v5812_v4 }
 0xffa   : > { %4943 = vmatprep.subr.mxu0 %v5812_v4 }
 0xffb   : > { %4944 = vmatpush3.msra.mxu0 %v7005_v7 }
 0xffc   : > { %4945 = vmatprep.subr.mxu0 %v5812_v4 }
 0xffd   : > { %4946 = vmatpush3.msra.mxu0 %v7009_v8 }
 0xffe   : > { %4947 = vmatprep.subr.mxu0 %v5812_v4 }
 0xfff   : > { %4948 = vmatpush3.msra.mxu0 %v6573_v48  ;;  %v2274_v48 = vld [vmem:[#allocation3 + $0x12] sm:$0x1] }
0x1000   : > { %4949 = vmatprep.subr.mxu0 %v5812_v4 }
0x1001   : > { %4950 = vmatpush3.msra.mxu0 %v6577_v50 }
0x1002   : > { %4951 = vmatprep.subr.mxu0 %v5812_v4 }
0x1003   : > { %4952 = vmatpush3.msra.mxu0 %v6581_v51 }
0x1004   : > { %4953 = vmatprep.subr.mxu0 %v5812_v4 }
0x1005   : > { %4954 = vmatpush3.msra.mxu0 %v6619_v55 }
0x1006   : > { %4955 = vmatprep.subr.mxu0 %v5812_v4 }
0x1007   : > { %4956 = vmatpush3.msra.mxu0 %v6623_v62 }
0x1008   : > { %4957 = vmatprep.subr.mxu0 %v5812_v4 }
0x1009   : > { %4958 = vmatpush3.msra.mxu0 %v6627_v63 }
0x100a   : > { %4959 = vmatprep.subr.mxu0 %v5812_v4 }
0x100b   : > { %4960 = vmatpush3.msra.mxu0 %v6733_v17 }
0x100c   : > { %4961 = vmatprep.subr.mxu0 %v5812_v4 }
0x100d   : > { %4962 = vmatpush3.msra.mxu0 %v6771_v59 }
0x100e   : > { %4963 = vmatprep.subr.mxu0 %v5812_v4 }
0x100f   : > { %4964 = vmatpush3.msra.mxu0 %v6775_v60 }
0x1010   : > { %4965 = vmatprep.subr.mxu0 %v5812_v4 }
0x1011   : > { %4966 = vmatpush3.msra.mxu0 %v6779_v61 }
0x1012   : > { %4967 = vmatprep.subr.mxu0 %v5812_v4 }
0x1013   : > { %4968 = vmatpush3.msra.mxu0 %v6783_v21 }
0x1014   : > { %4969 = vmatprep.subr.mxu0 %v5812_v4 }
0x1015   : > { %4970 = vmatpush3.msra.mxu0 %v6787_v22 }
0x1016   : > { %4971 = vmatprep.subr.mxu0 %v5812_v4 }
0x1017   : > { %4972 = vmatpush3.msra.mxu0 %v6791_v23 }
0x1018   : > { %5011 = vmatprep.subr.mxu0 %v5812_v4 }
0x10b8   : > { %v2341_v50 = vpop.f32.mrf.mxu0 }
0x10b9   : > { %v2342_v51 = vadd.f32 %v2341_v50, %v2274_v48 }
0x10ba   : > { %v4905_v9 = vpop.f32.mrf.mxu0 }
0x10bb   : > { %5529 = vtanh.f32 %v2342_v51  ;;  %v3004_v9 = vld [vmem:[#allocation3 + $0x1c] sm:$0x1] }
0x10c8   : > { %v5530_v12 = vpop.eup %5529 }
0x10c9   : > { %2346 = vst [vmem:[#allocation4 + $0x12] sm:$0x1] %v5530_v12  ;;  %4939 = vmatmul.mubr.f32.vlgmr.msra.gmra.mxu1 %v5530_v12 }
0x10ca   : > { %4977 = vmatpush3.msra.mxu1 %v6999_v6  ;;  %5008 = vmatprep.mubr.msk.f32.mxu1 %vm5813_vm9, %v5812_v4 }
0x10cb   : > { %4978 = vmatprep.subr.mxu1 %v5812_v4 }
0x10cc   : > { %4979 = vmatpush3.msra.mxu1 %v7005_v7 }
0x10cd   : > { %4980 = vmatprep.subr.mxu1 %v5812_v4 }
0x10ce   : > { %4981 = vmatpush3.msra.mxu1 %v7009_v8 }
0x10cf   : > { %4982 = vmatprep.subr.mxu1 %v5812_v4 }
0x10d0   : > { %4983 = vmatpush3.msra.mxu1 %v7047_v53 }
0x10d1   : > { %4984 = vmatprep.subr.mxu1 %v5812_v4 }
0x10d2   : > { %4985 = vmatpush3.msra.mxu1 %v7051_v13 }
0x10d3   : > { %4986 = vmatprep.subr.mxu1 %v5812_v4 }
0x10d4   : > { %4987 = vmatpush3.msra.mxu1 %v7055_v14 }
0x10d5   : > { %4988 = vmatprep.subr.mxu1 %v5812_v4 }
0x10d6   : > { %4989 = vmatpush3.msra.mxu1 %v6619_v55  ;;  %v2347_v55 = vld [vmem:[#allocation3 + $0x13] sm:$0x1] }
0x10d7   : > { %4990 = vmatprep.subr.mxu1 %v5812_v4 }
0x10d8   : > { %4991 = vmatpush3.msra.mxu1 %v6623_v62 }
0x10d9   : > { %4992 = vmatprep.subr.mxu1 %v5812_v4 }
0x10da   : > { %4993 = vmatpush3.msra.mxu1 %v6627_v63 }
0x10db   : > { %4994 = vmatprep.subr.mxu1 %v5812_v4 }
0x10dc   : > { %4995 = vmatpush3.msra.mxu1 %v6733_v17 }
0x10dd   : > { %4996 = vmatprep.subr.mxu1 %v5812_v4 }
0x10de   : > { %4997 = vmatpush3.msra.mxu1 %v6771_v59 }
0x10df   : > { %4998 = vmatprep.subr.mxu1 %v5812_v4 }
0x10e0   : > { %4999 = vmatpush3.msra.mxu1 %v6775_v60 }
0x10e1   : > { %5000 = vmatprep.subr.mxu1 %v5812_v4 }
0x10e2   : > { %5001 = vmatpush3.msra.mxu1 %v6779_v61 }
0x10e3   : > { %5002 = vmatprep.subr.mxu1 %v5812_v4 }
0x10e4   : > { %5003 = vmatpush3.msra.mxu1 %v6783_v21 }
0x10e5   : > { %5004 = vmatprep.subr.mxu1 %v5812_v4 }
0x10e6   : > { %5005 = vmatpush3.msra.mxu1 %v6787_v22 }
0x10e7   : > { %5006 = vmatprep.subr.mxu1 %v5812_v4 }
0x10e8   : > { %5007 = vmatpush3.msra.mxu1 %v6791_v23 }
0x10e9   : > { %5046 = vmatprep.subr.mxu1 %v5812_v4 }
0x1189   : > { %v2414_v62 = vpop.f32.mrf.mxu1 }
0x118a   : > { %v2415_v63 = vadd.f32 %v2414_v62, %v2347_v55 }
0x118b   : > { %v4940_v15 = vpop.f32.mrf.mxu1 }
0x118c   : > { %5531 = vtanh.f32 %v2415_v63  ;;  %v3320_v15 = vld [vmem:[#allocation13 + $0x70] sm:$0xff] }
0x1199   : > { %v5532_v16 = vpop.eup %5531 }
0x119a   : > { %2419 = vst [vmem:[#allocation4 + $0x13] sm:$0x1] %v5532_v16  ;;  %4974 = vmatmul.mubr.f32.vlgmr.msra.gmra.mxu0 %v5532_v16  ;;  %v3302_v16 = vld [vmem:[#allocation4] sm:$0xff] }
0x119b   : > { %5012 = vmatpush3.msra.mxu0 %v6999_v6  ;;  %5043 = vmatprep.mubr.msk.f32.mxu0 %vm5813_vm9, %v5812_v4 }
0x119c   : > { %5013 = vmatprep.subr.mxu0 %v5812_v4 }
0x119d   : > { %5014 = vmatpush3.msra.mxu0 %v7005_v7 }
0x119e   : > { %5015 = vmatprep.subr.mxu0 %v5812_v4 }
0x119f   : > { %5016 = vmatpush3.msra.mxu0 %v7009_v8 }
0x11a0   : > { %5017 = vmatprep.subr.mxu0 %v5812_v4 }
0x11a1   : > { %5018 = vmatpush3.msra.mxu0 %v7047_v53 }
0x11a2   : > { %5019 = vmatprep.subr.mxu0 %v5812_v4 }
0x11a3   : > { %5020 = vmatpush3.msra.mxu0 %v7051_v13 }
0x11a4   : > { %5021 = vmatprep.subr.mxu0 %v5812_v4 }
0x11a5   : > { %5022 = vmatpush3.msra.mxu0 %v7055_v14 }
0x11a6   : > { %5023 = vmatprep.subr.mxu0 %v5812_v4 }
0x11a7   : > { %5024 = vmatpush3.msra.mxu0 %v7093_v56 }
0x11a8   : > { %5025 = vmatprep.subr.mxu0 %v5812_v4 }
0x11a9   : > { %5026 = vmatpush3.msra.mxu0 %v7097_v57 }
0x11aa   : > { %5027 = vmatprep.subr.mxu0 %v5812_v4 }
0x11ab   : > { %5028 = vmatpush3.msra.mxu0 %v7101_v19 }
0x11ac   : > { %5029 = vmatprep.subr.mxu0 %v5812_v4 }
0x11ad   : > { %5030 = vmatpush3.msra.mxu0 %v6733_v17 }
0x11ae   : > { %5031 = vmatprep.subr.mxu0 %v5812_v4 }
0x11af   : > { %5032 = vmatpush3.msra.mxu0 %v6771_v59 }
0x11b0   : > { %5033 = vmatprep.subr.mxu0 %v5812_v4 }
0x11b1   : > { %5034 = vmatpush3.msra.mxu0 %v6775_v60 }
0x11b2   : > { %5035 = vmatprep.subr.mxu0 %v5812_v4 }
0x11b3   : > { %5036 = vmatpush3.msra.mxu0 %v6779_v61 }
0x11b4   : > { %5037 = vmatprep.subr.mxu0 %v5812_v4 }
0x11b5   : > { %5038 = vmatpush3.msra.mxu0 %v6783_v21 }
0x11b6   : > { %5039 = vmatprep.subr.mxu0 %v5812_v4 }
0x11b7   : > { %5040 = vmatpush3.msra.mxu0 %v6787_v22 }
0x11b8   : > { %5041 = vmatprep.subr.mxu0 %v5812_v4 }
0x11b9   : > { %5042 = vmatpush3.msra.mxu0 %v6791_v23 }
0x11ba   : > { %5081 = vmatprep.subr.mxu0 %v5812_v4 }
0x125a   : > { %v2487_v58 = vpop.f32.mrf.mxu0 }
0x125b   : > { %v2488_v25 = vadd.f32 %v2487_v58, %v2420_v20  ;;  %v3315_v20 = vld [vmem:[#allocation13 + $0x48] sm:$0xff]  ;;  %v3314_v58 = vld [vmem:[#allocation13 + $0x40] sm:$0xff] }
0x125c   : > { %v4975_v26 = vpop.f32.mrf.mxu0 }
0x125d   : > { %5533 = vtanh.f32 %v2488_v25  ;;  %v3313_v25 = vld [vmem:[#allocation13 + $0x38] sm:$0xff]  ;;  %v3312_v26 = vld [vmem:[#allocation13 + $0x30] sm:$0xff] }
0x126a   : > { %v5534_v27 = vpop.eup %5533 }
0x126b   : > { %2492 = vst [vmem:[#allocation4 + $0x14] sm:$0x1] %v5534_v27  ;;  %5009 = vmatmul.mubr.f32.vlgmr.msra.gmra.mxu1 %v5534_v27  ;;  %v3311_v27 = vld [vmem:[#allocation13 + $0x28] sm:$0xff] }
0x126c   : > { %5047 = vmatpush3.msra.mxu1 %v6999_v6  ;;  %5078 = vmatprep.mubr.msk.f32.mxu1 %vm5813_vm9, %v5812_v4 }
0x126d   : > { %5048 = vmatprep.subr.mxu1 %v5812_v4 }
0x126e   : > { %5049 = vmatpush3.msra.mxu1 %v7005_v7 }
0x126f   : > { %5050 = vmatprep.subr.mxu1 %v5812_v4 }
0x1270   : > { %5051 = vmatpush3.msra.mxu1 %v7009_v8 }
0x1271   : > { %5052 = vmatprep.subr.mxu1 %v5812_v4 }
0x1272   : > { %5053 = vmatpush3.msra.mxu1 %v7047_v53 }
0x1273   : > { %5054 = vmatprep.subr.mxu1 %v5812_v4 }
0x1274   : > { %5055 = vmatpush3.msra.mxu1 %v7051_v13 }
0x1275   : > { %5056 = vmatprep.subr.mxu1 %v5812_v4 }
0x1276   : > { %5057 = vmatpush3.msra.mxu1 %v7055_v14 }
0x1277   : > { %5058 = vmatprep.subr.mxu1 %v5812_v4 }
0x1278   : > { %5059 = vmatpush3.msra.mxu1 %v7093_v56 }
0x1279   : > { %5060 = vmatprep.subr.mxu1 %v5812_v4 }
0x127a   : > { %5061 = vmatpush3.msra.mxu1 %v7097_v57 }
0x127b   : > { %5062 = vmatprep.subr.mxu1 %v5812_v4 }
0x127c   : > { %5063 = vmatpush3.msra.mxu1 %v7101_v19 }
0x127d   : > { %5064 = vmatprep.subr.mxu1 %v5812_v4 }
0x127e   : > { %5065 = vmatpush3.msra.mxu1 %v6733_v17 }
0x127f   : > { %5066 = vmatprep.subr.mxu1 %v5812_v4 }
0x1280   : > { %5067 = vmatpush3.msra.mxu1 %v6771_v59 }
0x1281   : > { %5068 = vmatprep.subr.mxu1 %v5812_v4 }
0x1282   : > { %5069 = vmatpush3.msra.mxu1 %v6775_v60 }
0x1283   : > { %5070 = vmatprep.subr.mxu1 %v5812_v4 }
0x1284   : > { %5071 = vmatpush3.msra.mxu1 %v6779_v61 }
0x1285   : > { %5072 = vmatprep.subr.mxu1 %v5812_v4 }
0x1286   : > { %5073 = vmatpush3.msra.mxu1 %v6783_v21 }
0x1287   : > { %5074 = vmatprep.subr.mxu1 %v5812_v4 }
0x1288   : > { %5075 = vmatpush3.msra.mxu1 %v6787_v22 }
0x1289   : > { %5076 = vmatprep.subr.mxu1 %v5812_v4 }
0x128a   : > { %5077 = vmatpush3.msra.mxu1 %v6791_v23 }
0x128b   : > { %5116 = vmatprep.subr.mxu1 %v5812_v4 }
0x132b   : > { %v2560_v30 = vpop.f32.mrf.mxu1 }
0x132c   : > { %v2561_v32 = vadd.f32 %v2560_v30, %v2493_v29  ;;  %v3310_v29 = vld [vmem:[#allocation13 + $0x20] sm:$0xff]  ;;  %v3309_v30 = vld [vmem:[#allocation13 + $0x18] sm:$0xff] }
0x132d   : > { %v5010_v33 = vpop.f32.mrf.mxu1 }
0x132e   : > { %5535 = vtanh.f32 %v2561_v32  ;;  %v3308_v32 = vld [vmem:[#allocation13 + $0x10] sm:$0xff]  ;;  %v3307_v33 = vld [vmem:[#allocation13 + $0x8] sm:$0xff] }
0x133b   : > { %v5536_v34 = vpop.eup %5535 }
0x133c   : > { %2565 = vst [vmem:[#allocation4 + $0x15] sm:$0x1] %v5536_v34  ;;  %5044 = vmatmul.mubr.f32.vlgmr.msra.gmra.mxu0 %v5536_v34  ;;  %v3306_v34 = vld [vmem:[#allocation13] sm:$0xff] }
0x133d   : > { %5082 = vmatpush3.msra.mxu0 %v6999_v6  ;;  %5113 = vmatprep.mubr.msk.f32.mxu0 %vm5813_vm9, %v5812_v4 }
0x133e   : > { %5083 = vmatprep.subr.mxu0 %v5812_v4 }
0x133f   : > { %5084 = vmatpush3.msra.mxu0 %v7005_v7 }
0x1340   : > { %5085 = vmatprep.subr.mxu0 %v5812_v4 }
0x1341   : > { %5086 = vmatpush3.msra.mxu0 %v7009_v8 }
0x1342   : > { %5087 = vmatprep.subr.mxu0 %v5812_v4 }
0x1343   : > { %5088 = vmatpush3.msra.mxu0 %v7047_v53 }
0x1344   : > { %5089 = vmatprep.subr.mxu0 %v5812_v4 }
0x1345   : > { %5090 = vmatpush3.msra.mxu0 %v7051_v13 }
0x1346   : > { %5091 = vmatprep.subr.mxu0 %v5812_v4 }
0x1347   : > { %5092 = vmatpush3.msra.mxu0 %v7055_v14 }
0x1348   : > { %5093 = vmatprep.subr.mxu0 %v5812_v4 }
0x1349   : > { %5094 = vmatpush3.msra.mxu0 %v7093_v56 }
0x134a   : > { %5095 = vmatprep.subr.mxu0 %v5812_v4 }
0x134b   : > { %5096 = vmatpush3.msra.mxu0 %v7097_v57 }
0x134c   : > { %5097 = vmatprep.subr.mxu0 %v5812_v4 }
0x134d   : > { %5098 = vmatpush3.msra.mxu0 %v7101_v19 }
0x134e   : > { %5099 = vmatprep.subr.mxu0 %v5812_v4 }
0x134f   : > { %5100 = vmatpush3.msra.mxu0 %v6733_v17  ;;  %v2566_v17 = vld [vmem:[#allocation3 + $0x16] sm:$0x1] }
0x1350   : > { %5101 = vmatprep.subr.mxu0 %v5812_v4 }
0x1351   : > { %5102 = vmatpush3.msra.mxu0 %v6771_v59 }
0x1352   : > { %5103 = vmatprep.subr.mxu0 %v5812_v4 }
0x1353   : > { %5104 = vmatpush3.msra.mxu0 %v6775_v60 }
0x1354   : > { %5105 = vmatprep.subr.mxu0 %v5812_v4 }
0x1355   : > { %5106 = vmatpush3.msra.mxu0 %v6779_v61 }
0x1356   : > { %5107 = vmatprep.subr.mxu0 %v5812_v4 }
0x1357   : > { %5108 = vmatpush3.msra.mxu0 %v6783_v21 }
0x1358   : > { %5109 = vmatprep.subr.mxu0 %v5812_v4 }
0x1359   : > { %5110 = vmatpush3.msra.mxu0 %v6787_v22 }
0x135a   : > { %5111 = vmatprep.subr.mxu0 %v5812_v4 }
0x135b   : > { %5112 = vmatpush3.msra.mxu0 %v6791_v23 }
0x135c   : > { %5151 = vmatprep.subr.mxu0 %v5812_v4 }
0x13fc   : > { %v2633_v35 = vpop.f32.mrf.mxu0 }
0x13fd   : > { %v2634_v36 = vadd.f32 %v2633_v35, %v2566_v17  ;;  %v3303_v17 = vld [vmem:[#allocation4 + $0x8] sm:$0xff] }
0x13fe   : > { %v5045_v38 = vpop.f32.mrf.mxu0 }
0x13ff   : > { %5537 = vtanh.f32 %v2634_v36  ;;  %v3150_v36 = vld [vmem:[#allocation3 + $0x1e] sm:$0x1] }
0x140c   : > { %v5538_v39 = vpop.eup %5537 }
0x140d   : > { %2638 = vst [vmem:[#allocation4 + $0x16] sm:$0x1] %v5538_v39  ;;  %5079 = vmatmul.mubr.f32.vlgmr.msra.gmra.mxu1 %v5538_v39 }
0x140e   : > { %5117 = vmatpush3.msra.mxu1 %v6999_v6  ;;  %5148 = vmatprep.mubr.msk.f32.mxu1 %vm5813_vm9, %v5812_v4 }
0x140f   : > { %5118 = vmatprep.subr.mxu1 %v5812_v4 }
0x1410   : > { %5119 = vmatpush3.msra.mxu1 %v7005_v7 }
0x1411   : > { %5120 = vmatprep.subr.mxu1 %v5812_v4 }
0x1412   : > { %5121 = vmatpush3.msra.mxu1 %v7009_v8 }
0x1413   : > { %5122 = vmatprep.subr.mxu1 %v5812_v4 }
0x1414   : > { %5123 = vmatpush3.msra.mxu1 %v7047_v53 }
0x1415   : > { %5124 = vmatprep.subr.mxu1 %v5812_v4 }
0x1416   : > { %5125 = vmatpush3.msra.mxu1 %v7051_v13 }
0x1417   : > { %5126 = vmatprep.subr.mxu1 %v5812_v4 }
0x1418   : > { %5127 = vmatpush3.msra.mxu1 %v7055_v14 }
0x1419   : > { %5128 = vmatprep.subr.mxu1 %v5812_v4 }
0x141a   : > { %5129 = vmatpush3.msra.mxu1 %v7093_v56 }
0x141b   : > { %5130 = vmatprep.subr.mxu1 %v5812_v4 }
0x141c   : > { %5131 = vmatpush3.msra.mxu1 %v7097_v57 }
0x141d   : > { %5132 = vmatprep.subr.mxu1 %v5812_v4 }
0x141e   : > { %5133 = vmatpush3.msra.mxu1 %v7101_v19 }
0x141f   : > { %5134 = vmatprep.subr.mxu1 %v5812_v4 }
0x1420   : > { %5135 = vmatpush3.msra.mxu1 %v7207_v10 }
0x1421   : > { %5136 = vmatprep.subr.mxu1 %v5812_v4 }
0x1422   : > { %5137 = vmatpush3.msra.mxu1 %v6771_v59  ;;  %v2639_v59 = vld [vmem:[#allocation3 + $0x17] sm:$0x1] }
0x1423   : > { %5138 = vmatprep.subr.mxu1 %v5812_v4 }
0x1424   : > { %5139 = vmatpush3.msra.mxu1 %v6775_v60 }
0x1425   : > { %5140 = vmatprep.subr.mxu1 %v5812_v4 }
0x1426   : > { %5141 = vmatpush3.msra.mxu1 %v6779_v61 }
0x1427   : > { %5142 = vmatprep.subr.mxu1 %v5812_v4 }
0x1428   : > { %5143 = vmatpush3.msra.mxu1 %v6783_v21  ;;  %v7245_v21 = vld [vmem:[#allocation12 + $0x28] sm:$0xff] }
0x1429   : > { %5144 = vmatprep.subr.mxu1 %v5812_v4 }
0x142a   : > { %5145 = vmatpush3.msra.mxu1 %v6787_v22  ;;  %v7249_v22 = vld [vmem:[#allocation12 + $0x20] sm:$0xff] }
0x142b   : > { %5146 = vmatprep.subr.mxu1 %v5812_v4 }
0x142c   : > { %5147 = vmatpush3.msra.mxu1 %v6791_v23  ;;  %v7253_v23 = vld [vmem:[#allocation12 + $0x18] sm:$0xff] }
0x142d   : > { %5186 = vmatprep.subr.mxu1 %v5812_v4 }
0x14cd   : > { %v2706_v60 = vpop.f32.mrf.mxu1 }
0x14ce   : > { %v2707_v11 = vadd.f32 %v2706_v60, %v2639_v59  ;;  %v3575_v60 = vld [vmem:[%s7514_s6] ss:$0 sm:$0xff] }
0x14cf   : > { %v5080_v18 = vpop.f32.mrf.mxu1 }
0x14d0   : > { %5539 = vtanh.f32 %v2707_v11 }
0x14dd   : > { %v5540_v61 = vpop.eup %5539 }
0x14de   : > { %2711 = vst [vmem:[#allocation4 + $0x17] sm:$0x1] %v5540_v61  ;;  %5114 = vmatmul.mubr.f32.vlgmr.msra.gmra.mxu0 %v5540_v61 }
0x14df   : > { %5152 = vmatpush3.msra.mxu0 %v6999_v6  ;;  %5183 = vmatprep.mubr.msk.f32.mxu0 %vm5813_vm9, %v5812_v4 }
0x14e0   : > { %5153 = vmatprep.subr.mxu0 %v5812_v4 }
0x14e1   : > { %5154 = vmatpush3.msra.mxu0 %v7005_v7 }
0x14e2   : > { %5155 = vmatprep.subr.mxu0 %v5812_v4 }
0x14e3   : > { %5156 = vmatpush3.msra.mxu0 %v7009_v8 }
0x14e4   : > { %5157 = vmatprep.subr.mxu0 %v5812_v4 }
0x14e5   : > { %5158 = vmatpush3.msra.mxu0 %v7047_v53  ;;  %v3304_v35 = vld [vmem:[#allocation4 + $0x10] sm:$0xff] }
0x14e6   : > { %5159 = vmatprep.subr.mxu0 %v5812_v4 }
0x14e7   : > { %5160 = vmatpush3.msra.mxu0 %v7051_v13 }
0x14e8   : > { %5161 = vmatprep.subr.mxu0 %v5812_v4 }
0x14e9   : > { %5162 = vmatpush3.msra.mxu0 %v7055_v14 }
0x14ea   : > { %5163 = vmatprep.subr.mxu0 %v5812_v4 }
0x14eb   : > { %5164 = vmatpush3.msra.mxu0 %v7093_v56 }
0x14ec   : > { %5165 = vmatprep.subr.mxu0 %v5812_v4 }
0x14ed   : > { %5166 = vmatpush3.msra.mxu0 %v7097_v57 }
0x14ee   : > { %5167 = vmatprep.subr.mxu0 %v5812_v4 }
0x14ef   : > { %5168 = vmatpush3.msra.mxu0 %v7101_v19 }
0x14f0   : > { %5169 = vmatprep.subr.mxu0 %v5812_v4 }
0x14f1   : > { %5170 = vmatpush3.msra.mxu0 %v7207_v10 }
0x14f2   : > { %5171 = vmatprep.subr.mxu0 %v5812_v4 }
0x14f3   : > { %5172 = vmatpush3.msra.mxu0 %v7245_v21 }
0x14f4   : > { %5173 = vmatprep.subr.mxu0 %v5812_v4 }
0x14f5   : > { %5174 = vmatpush3.msra.mxu0 %v7249_v22 }
0x14f6   : > { %5175 = vmatprep.subr.mxu0 %v5812_v4 }
0x14f7   : > { %5176 = vmatpush3.msra.mxu0 %v7253_v23 }
0x14f8   : > { %5177 = vmatprep.subr.mxu0 %v5812_v4 }
0x14f9   : > { %5178 = vmatpush3.msra.mxu0 %v7257_v40 }
0x14fa   : > { %5179 = vmatprep.subr.mxu0 %v5812_v4 }
0x14fb   : > { %5180 = vmatpush3.msra.mxu0 %v7261_v41 }
0x14fc   : > { %5181 = vmatprep.subr.mxu0 %v5812_v4 }
0x14fd   : > { %5182 = vmatpush3.msra.mxu0 %v7265_v24 }
0x14fe   : > { %5221 = vmatprep.subr.mxu0 %v5812_v4 }
0x159e   : > { %v2779_v37 = vpop.f32.mrf.mxu0 }
0x159f   : > { %v2780_v46 = vadd.f32 %v2779_v37, %v2712_v31 }
0x15a0   : > { %v5115_v47 = vpop.f32.mrf.mxu0 }
0x15a1   : > { %5541 = vtanh.f32 %v2780_v46 }
0x15ae   : > { %v5542_v44 = vpop.eup %5541 }
0x15af   : > { %2784 = vst [vmem:[#allocation4 + $0x18] sm:$0x1] %v5542_v44  ;;  %5149 = vmatmul.mubr.f32.vlgmr.msra.gmra.mxu1 %v5542_v44 }
0x15b0   : > { %5187 = vmatpush3.msra.mxu1 %v6999_v6  ;;  %5218 = vmatprep.mubr.msk.f32.mxu1 %vm5813_vm9, %v5812_v4 }
0x15b1   : > { %5188 = vmatprep.subr.mxu1 %v5812_v4 }
0x15b2   : > { %5189 = vmatpush3.msra.mxu1 %v7005_v7 }
0x15b3   : > { %5190 = vmatprep.subr.mxu1 %v5812_v4 }
0x15b4   : > { %5191 = vmatpush3.msra.mxu1 %v7009_v8 }
0x15b5   : > { %5192 = vmatprep.subr.mxu1 %v5812_v4 }
0x15b6   : > { %5193 = vmatpush3.msra.mxu1 %v7047_v53 }
0x15b7   : > { %5194 = vmatprep.subr.mxu1 %v5812_v4 }
0x15b8   : > { %5195 = vmatpush3.msra.mxu1 %v7051_v13 }
0x15b9   : > { %5196 = vmatprep.subr.mxu1 %v5812_v4 }
0x15ba   : > { %5197 = vmatpush3.msra.mxu1 %v7055_v14 }
0x15bb   : > { %5198 = vmatprep.subr.mxu1 %v5812_v4 }
0x15bc   : > { %5199 = vmatpush3.msra.mxu1 %v7093_v56 }
0x15bd   : > { %5200 = vmatprep.subr.mxu1 %v5812_v4 }
0x15be   : > { %5201 = vmatpush3.msra.mxu1 %v7097_v57 }
0x15bf   : > { %5202 = vmatprep.subr.mxu1 %v5812_v4 }
0x15c0   : > { %5203 = vmatpush3.msra.mxu1 %v7101_v19 }
0x15c1   : > { %5204 = vmatprep.subr.mxu1 %v5812_v4 }
0x15c2   : > { %5205 = vmatpush3.msra.mxu1 %v7207_v10 }
0x15c3   : > { %5206 = vmatprep.subr.mxu1 %v5812_v4 }
0x15c4   : > { %5207 = vmatpush3.msra.mxu1 %v7245_v21 }
0x15c5   : > { %5208 = vmatprep.subr.mxu1 %v5812_v4 }
0x15c6   : > { %5209 = vmatpush3.msra.mxu1 %v7249_v22 }
0x15c7   : > { %5210 = vmatprep.subr.mxu1 %v5812_v4 }
0x15c8   : > { %5211 = vmatpush3.msra.mxu1 %v7253_v23 }
0x15c9   : > { %5212 = vmatprep.subr.mxu1 %v5812_v4 }
0x15ca   : > { %5213 = vmatpush3.msra.mxu1 %v7257_v40 }
0x15cb   : > { %5214 = vmatprep.subr.mxu1 %v5812_v4 }
0x15cc   : > { %5215 = vmatpush3.msra.mxu1 %v7261_v41 }
0x15cd   : > { %5216 = vmatprep.subr.mxu1 %v5812_v4 }
0x15ce   : > { %5217 = vmatpush3.msra.mxu1 %v7265_v24 }
0x15cf   : > { %5256 = vmatprep.subr.mxu1 %v5812_v4 }
0x166f   : > { %v2852_v54 = vpop.f32.mrf.mxu1 }
0x1670   : > { %v2853_v52 = vadd.f32 %v2852_v54, %v2785_v49 }
0x1671   : > { %v5150_v28 = vpop.f32.mrf.mxu1 }
0x1672   : > { %5543 = vtanh.f32 %v2853_v52 }
0x167f   : > { %v5544_v0 = vpop.eup %5543 }
0x1680   : > { %2857 = vst [vmem:[#allocation4 + $0x19] sm:$0x1] %v5544_v0  ;;  %5184 = vmatmul.mubr.f32.vlgmr.msra.gmra.mxu0 %v5544_v0 }
0x1681   : > { %5222 = vmatpush3.msra.mxu0 %v6999_v6  ;;  %5253 = vmatprep.mubr.msk.f32.mxu0 %vm5813_vm9, %v5812_v4 }
0x1682   : > { %5223 = vmatprep.subr.mxu0 %v5812_v4 }
0x1683   : > { %5224 = vmatpush3.msra.mxu0 %v7005_v7 }
0x1684   : > { %5225 = vmatprep.subr.mxu0 %v5812_v4 }
0x1685   : > { %5226 = vmatpush3.msra.mxu0 %v7009_v8 }
0x1686   : > { %5227 = vmatprep.subr.mxu0 %v5812_v4 }
0x1687   : > { %5228 = vmatpush3.msra.mxu0 %v7047_v53 }
0x1688   : > { %5229 = vmatprep.subr.mxu0 %v5812_v4 }
0x1689   : > { %5230 = vmatpush3.msra.mxu0 %v7051_v13 }
0x168a   : > { %5231 = vmatprep.subr.mxu0 %v5812_v4 }
0x168b   : > { %5232 = vmatpush3.msra.mxu0 %v7055_v14 }
0x168c   : > { %5233 = vmatprep.subr.mxu0 %v5812_v4 }
0x168d   : > { %5234 = vmatpush3.msra.mxu0 %v7093_v56 }
0x168e   : > { %5235 = vmatprep.subr.mxu0 %v5812_v4 }
0x168f   : > { %5236 = vmatpush3.msra.mxu0 %v7097_v57 }
0x1690   : > { %5237 = vmatprep.subr.mxu0 %v5812_v4 }
0x1691   : > { %5238 = vmatpush3.msra.mxu0 %v7101_v19 }
0x1692   : > { %5239 = vmatprep.subr.mxu0 %v5812_v4 }
0x1693   : > { %5240 = vmatpush3.msra.mxu0 %v7207_v10 }
0x1694   : > { %5241 = vmatprep.subr.mxu0 %v5812_v4 }
0x1695   : > { %5242 = vmatpush3.msra.mxu0 %v7245_v21 }
0x1696   : > { %5243 = vmatprep.subr.mxu0 %v5812_v4 }
0x1697   : > { %5244 = vmatpush3.msra.mxu0 %v7249_v22 }
0x1698   : > { %5245 = vmatprep.subr.mxu0 %v5812_v4 }
0x1699   : > { %5246 = vmatpush3.msra.mxu0 %v7253_v23 }
0x169a   : > { %5247 = vmatprep.subr.mxu0 %v5812_v4 }
0x169b   : > { %5248 = vmatpush3.msra.mxu0 %v7257_v40 }
0x169c   : > { %5249 = vmatprep.subr.mxu0 %v5812_v4 }
0x169d   : > { %5250 = vmatpush3.msra.mxu0 %v7261_v41 }
0x169e   : > { %5251 = vmatprep.subr.mxu0 %v5812_v4 }
0x169f   : > { %5252 = vmatpush3.msra.mxu0 %v7265_v24 }
0x16a0   : > { %5291 = vmatprep.subr.mxu0 %v5812_v4 }
0x1740   : > { %v2925_v2 = vpop.f32.mrf.mxu0 }
0x1741   : > { %v2926_v42 = vadd.f32 %v2925_v2, %v2858_v1 }
0x1742   : > { %v5185_v43 = vpop.f32.mrf.mxu0 }
0x1743   : > { %5545 = vtanh.f32 %v2926_v42 }
0x1750   : > { %v5546_v45 = vpop.eup %5545 }
0x1751   : > { %2930 = vst [vmem:[#allocation4 + $0x1a] sm:$0x1] %v5546_v45  ;;  %5219 = vmatmul.mubr.f32.vlgmr.msra.gmra.mxu1 %v5546_v45 }
0x1752   : > { %5257 = vmatpush3.msra.mxu1 %v6999_v6  ;;  %5288 = vmatprep.mubr.msk.f32.mxu1 %vm5813_vm9, %v5812_v4 }
0x1753   : > { %5258 = vmatprep.subr.mxu1 %v5812_v4 }
0x1754   : > { %5259 = vmatpush3.msra.mxu1 %v7005_v7 }
0x1755   : > { %5260 = vmatprep.subr.mxu1 %v5812_v4 }
0x1756   : > { %5261 = vmatpush3.msra.mxu1 %v7009_v8 }
0x1757   : > { %5262 = vmatprep.subr.mxu1 %v5812_v4 }
0x1758   : > { %5263 = vmatpush3.msra.mxu1 %v7047_v53 }
0x1759   : > { %5264 = vmatprep.subr.mxu1 %v5812_v4 }
0x175a   : > { %5265 = vmatpush3.msra.mxu1 %v7051_v13 }
0x175b   : > { %5266 = vmatprep.subr.mxu1 %v5812_v4 }
0x175c   : > { %5267 = vmatpush3.msra.mxu1 %v7055_v14 }
0x175d   : > { %5268 = vmatprep.subr.mxu1 %v5812_v4 }
0x175e   : > { %5269 = vmatpush3.msra.mxu1 %v7093_v56 }
0x175f   : > { %5270 = vmatprep.subr.mxu1 %v5812_v4 }
0x1760   : > { %5271 = vmatpush3.msra.mxu1 %v7097_v57 }
0x1761   : > { %5272 = vmatprep.subr.mxu1 %v5812_v4 }
0x1762   : > { %5273 = vmatpush3.msra.mxu1 %v7101_v19 }
0x1763   : > { %5274 = vmatprep.subr.mxu1 %v5812_v4 }
0x1764   : > { %5275 = vmatpush3.msra.mxu1 %v7207_v10 }
0x1765   : > { %5276 = vmatprep.subr.mxu1 %v5812_v4 }
0x1766   : > { %5277 = vmatpush3.msra.mxu1 %v7245_v21 }
0x1767   : > { %5278 = vmatprep.subr.mxu1 %v5812_v4 }
0x1768   : > { %5279 = vmatpush3.msra.mxu1 %v7249_v22 }
0x1769   : > { %5280 = vmatprep.subr.mxu1 %v5812_v4 }
0x176a   : > { %5281 = vmatpush3.msra.mxu1 %v7253_v23 }
0x176b   : > { %5282 = vmatprep.subr.mxu1 %v5812_v4 }
0x176c   : > { %5283 = vmatpush3.msra.mxu1 %v7257_v40 }
0x176d   : > { %5284 = vmatprep.subr.mxu1 %v5812_v4 }
0x176e   : > { %5285 = vmatpush3.msra.mxu1 %v7261_v41 }
0x176f   : > { %5286 = vmatprep.subr.mxu1 %v5812_v4 }
0x1770   : > { %5287 = vmatpush3.msra.mxu1 %v7265_v24 }
0x1771   : > { %5326 = vmatprep.subr.mxu1 %v5812_v4 }
0x1811   : > { %v2998_v5 = vpop.f32.mrf.mxu1 }
0x1812   : > { %v2999_v48 = vadd.f32 %v2998_v5, %v2931_v3 }
0x1813   : > { %v5220_v50 = vpop.f32.mrf.mxu1 }
0x1814   : > { %5547 = vtanh.f32 %v2999_v48 }
0x1821   : > { %v5548_v51 = vpop.eup %5547 }
0x1822   : > { %3003 = vst [vmem:[#allocation4 + $0x1b] sm:$0x1] %v5548_v51  ;;  %5254 = vmatmul.mubr.f32.vlgmr.msra.gmra.mxu0 %v5548_v51 }
0x1823   : > { %5292 = vmatpush3.msra.mxu0 %v6999_v6  ;;  %5323 = vmatprep.mubr.msk.f32.mxu0 %vm5813_vm9, %v5812_v4 }
0x1824   : > { %5293 = vmatprep.subr.mxu0 %v5812_v4 }
0x1825   : > { %5294 = vmatpush3.msra.mxu0 %v7005_v7 }
0x1826   : > { %5295 = vmatprep.subr.mxu0 %v5812_v4 }
0x1827   : > { %5296 = vmatpush3.msra.mxu0 %v7009_v8 }
0x1828   : > { %5297 = vmatprep.subr.mxu0 %v5812_v4 }
0x1829   : > { %5298 = vmatpush3.msra.mxu0 %v7047_v53 }
0x182a   : > { %5299 = vmatprep.subr.mxu0 %v5812_v4 }
0x182b   : > { %5300 = vmatpush3.msra.mxu0 %v7051_v13 }
0x182c   : > { %5301 = vmatprep.subr.mxu0 %v5812_v4 }
0x182d   : > { %5302 = vmatpush3.msra.mxu0 %v7055_v14 }
0x182e   : > { %5303 = vmatprep.subr.mxu0 %v5812_v4 }
0x182f   : > { %5304 = vmatpush3.msra.mxu0 %v7093_v56 }
0x1830   : > { %5305 = vmatprep.subr.mxu0 %v5812_v4 }
0x1831   : > { %5306 = vmatpush3.msra.mxu0 %v7097_v57 }
0x1832   : > { %5307 = vmatprep.subr.mxu0 %v5812_v4 }
0x1833   : > { %5308 = vmatpush3.msra.mxu0 %v7101_v19 }
0x1834   : > { %5309 = vmatprep.subr.mxu0 %v5812_v4 }
0x1835   : > { %5310 = vmatpush3.msra.mxu0 %v7207_v10 }
0x1836   : > { %5311 = vmatprep.subr.mxu0 %v5812_v4 }
0x1837   : > { %5312 = vmatpush3.msra.mxu0 %v7245_v21 }
0x1838   : > { %5313 = vmatprep.subr.mxu0 %v5812_v4 }
0x1839   : > { %5314 = vmatpush3.msra.mxu0 %v7249_v22 }
0x183a   : > { %5315 = vmatprep.subr.mxu0 %v5812_v4 }
0x183b   : > { %5316 = vmatpush3.msra.mxu0 %v7253_v23 }
0x183c   : > { %5317 = vmatprep.subr.mxu0 %v5812_v4 }
0x183d   : > { %5318 = vmatpush3.msra.mxu0 %v7257_v40 }
0x183e   : > { %5319 = vmatprep.subr.mxu0 %v5812_v4 }
0x183f   : > { %5320 = vmatpush3.msra.mxu0 %v7261_v41 }
0x1840   : > { %5321 = vmatprep.subr.mxu0 %v5812_v4 }
0x1841   : > { %5322 = vmatpush3.msra.mxu0 %v7265_v24 }
0x18e2   : > { %v3071_v12 = vpop.f32.mrf.mxu0 }
0x18e3   : > { %v3072_v55 = vadd.f32 %v3071_v12, %v3004_v9 }
0x18e4   : > { %v5255_v62 = vpop.f32.mrf.mxu0 }
0x18e5   : > { %5549 = vtanh.f32 %v3072_v55 }
0x18f2   : > { %v5550_v63 = vpop.eup %5549 }
0x18f3   : > { %3076 = vst [vmem:[#allocation4 + $0x1c] sm:$0x1] %v5550_v63  ;;  %5289 = vmatmul.mubr.f32.vlgmr.msra.gmra.mxu1 %v5550_v63 }
0x18f4   : > { %5327 = vmatpush3.msra.mxu1 %v6999_v6  ;;  %5358 = vmatprep.mubr.msk.f32.mxu1 %vm5813_vm9, %v5812_v4  ;;  %v3321_v6 = vld [vmem:[#allocation13 + $0x78] sm:$0xff] }
0x18f5   : > { %5328 = vmatprep.subr.mxu1 %v5812_v4  ;;  %5361 = vmatprep.subr.mxu0 %v3321_v6 }
0x18f6   : > { %5329 = vmatpush3.msra.mxu1 %v7005_v7  ;;  %v3077_v7 = vld [vmem:[#allocation3 + $0x1d] sm:$0x1] }
0x18f7   : > { %5330 = vmatprep.subr.mxu1 %v5812_v4 }
0x18f8   : > { %5331 = vmatpush3.msra.mxu1 %v7009_v8 }
0x18f9   : > { %5332 = vmatprep.subr.mxu1 %v5812_v4 }
0x18fa   : > { %5333 = vmatpush3.msra.mxu1 %v7047_v53 }
0x18fb   : > { %5334 = vmatprep.subr.mxu1 %v5812_v4 }
0x18fc   : > { %5335 = vmatpush3.msra.mxu1 %v7051_v13 }
0x18fd   : > { %5336 = vmatprep.subr.mxu1 %v5812_v4 }
0x18fe   : > { %5337 = vmatpush3.msra.mxu1 %v7055_v14 }
0x18ff   : > { %5338 = vmatprep.subr.mxu1 %v5812_v4 }
0x1900   : > { %5339 = vmatpush3.msra.mxu1 %v7093_v56  ;;  %v3319_v56 = vld [vmem:[#allocation13 + $0x68] sm:$0xff] }
0x1901   : > { %5340 = vmatprep.subr.mxu1 %v5812_v4 }
0x1902   : > { %5341 = vmatpush3.msra.mxu1 %v7097_v57  ;;  %v3317_v57 = vld [vmem:[#allocation13 + $0x58] sm:$0xff] }
0x1903   : > { %5342 = vmatprep.subr.mxu1 %v5812_v4 }
0x1904   : > { %5343 = vmatpush3.msra.mxu1 %v7101_v19  ;;  %v3316_v19 = vld [vmem:[#allocation13 + $0x50] sm:$0xff] }
0x1905   : > { %5344 = vmatprep.subr.mxu1 %v5812_v4 }
0x1906   : > { %5345 = vmatpush3.msra.mxu1 %v7207_v10 }
0x1907   : > { %5346 = vmatprep.subr.mxu1 %v5812_v4 }
0x1908   : > { %5347 = vmatpush3.msra.mxu1 %v7245_v21 }
0x1909   : > { %5348 = vmatprep.subr.mxu1 %v5812_v4 }
0x190a   : > { %5349 = vmatpush3.msra.mxu1 %v7249_v22  ;;  %v3223_v22 = vld [vmem:[#allocation3 + $0x1f] sm:$0x1] }
0x190b   : > { %5350 = vmatprep.subr.mxu1 %v5812_v4 }
0x190c   : > { %5351 = vmatpush3.msra.mxu1 %v7253_v23 }
0x190d   : > { %5352 = vmatprep.subr.mxu1 %v5812_v4 }
0x190e   : > { %5353 = vmatpush3.msra.mxu1 %v7257_v40 }
0x190f   : > { %5354 = vmatprep.subr.mxu1 %v5812_v4 }
0x1910   : > { %5355 = vmatpush3.msra.mxu1 %v7261_v41 }
0x1911   : > { %5356 = vmatprep.subr.mxu1 %v5812_v4  ;;  %v3318_v4 = vld [vmem:[#allocation13 + $0x60] sm:$0xff] }
0x1912   : > { %5357 = vmatpush3.msra.mxu1 %v7265_v24 }
0x19b3   : > { %v3144_v8 = vpop.f32.mrf.mxu1 }
0x19b4   : > { %v3145_v53 = vadd.f32 %v3144_v8, %v3077_v7 }
0x19b5   : > { %v5290_v13 = vpop.f32.mrf.mxu1 }
0x19b6   : > { %5551 = vtanh.f32 %v3145_v53 }
0x19c3   : > { %v5552_v14 = vpop.eup %5551 }
0x19c4   : > { %3149 = vst [vmem:[#allocation4 + $0x1d] sm:$0x1] %v5552_v14  ;;  %5324 = vmatmul.mubr.f32.vlgmr.msra.gmra.mxu0 %v5552_v14 }
0x19c5   : > { %5362 = vmatpush3.msra.mxu0 %v3321_v6  ;;  %5393 = vmatprep.mubr.f32.mxu0 %v3302_v16 }
0x19c6   : > { %5363 = vmatprep.subr.mxu0 %v3320_v15 }
0x19c7   : > { %5364 = vmatpush3.msra.mxu0 %v3320_v15 }
0x19c8   : > { %5365 = vmatprep.subr.mxu0 %v3319_v56 }
0x19c9   : > { %5366 = vmatpush3.msra.mxu0 %v3319_v56 }
0x19ca   : > { %5367 = vmatprep.subr.mxu0 %v3318_v4 }
0x19cb   : > { %5368 = vmatpush3.msra.mxu0 %v3318_v4 }
0x19cc   : > { %5369 = vmatprep.subr.mxu0 %v3317_v57 }
0x19cd   : > { %5370 = vmatpush3.msra.mxu0 %v3317_v57 }
0x19ce   : > { %5371 = vmatprep.subr.mxu0 %v3316_v19 }
0x19cf   : > { %5372 = vmatpush3.msra.mxu0 %v3316_v19 }
0x19d0   : > { %5373 = vmatprep.subr.mxu0 %v3315_v20 }
0x19d1   : > { %5374 = vmatpush3.msra.mxu0 %v3315_v20 }
0x19d2   : > { %5375 = vmatprep.subr.mxu0 %v3314_v58 }
0x19d3   : > { %5376 = vmatpush3.msra.mxu0 %v3314_v58 }
0x19d4   : > { %5377 = vmatprep.subr.mxu0 %v3313_v25 }
0x19d5   : > { %5378 = vmatpush3.msra.mxu0 %v3313_v25 }
0x19d6   : > { %5379 = vmatprep.subr.mxu0 %v3312_v26 }
0x19d7   : > { %5380 = vmatpush3.msra.mxu0 %v3312_v26 }
0x19d8   : > { %5381 = vmatprep.subr.mxu0 %v3311_v27 }
0x19d9   : > { %5382 = vmatpush3.msra.mxu0 %v3311_v27 }
0x19da   : > { %5383 = vmatprep.subr.mxu0 %v3310_v29 }
0x19db   : > { %5384 = vmatpush3.msra.mxu0 %v3310_v29 }
0x19dc   : > { %5385 = vmatprep.subr.mxu0 %v3309_v30 }
0x19dd   : > { %5386 = vmatpush3.msra.mxu0 %v3309_v30 }
0x19de   : > { %5387 = vmatprep.subr.mxu0 %v3308_v32 }
0x19df   : > { %5388 = vmatpush3.msra.mxu0 %v3308_v32 }
0x19e0   : > { %5389 = vmatprep.subr.mxu0 %v3307_v33 }
0x19e1   : > { %5390 = vmatpush3.msra.mxu0 %v3307_v33 }
0x19e2   : > { %5391 = vmatprep.subr.mxu0 %v3306_v34 }
0x19e3   : > { %5392 = vmatpush3.msra.mxu0 %v3306_v34 }
0x19e4   : > { %5394 = vmatmul.mubr.f32.vlgmr.msra.gmra.mxu0 %v3303_v17 }
0x19e5   : > { %5396 = vmatprep.mubr.f32.mxu0 %v3304_v35 }
0x1a84   : > { %v3217_v38 = vpop.f32.mrf.mxu0 }
0x1a85   : > { %v3218_v39 = vadd.f32 %v3217_v38, %v3150_v36 }
0x1a86   : > { %v5325_v10 = vpop.f32.mrf.mxu0 }
0x1a87   : > { %5553 = vtanh.f32 %v3218_v39 }
0x1a94   : > { %v5554_v59 = vpop.eup %5553 }
0x1a95   : > { %3222 = vst [vmem:[#allocation4 + $0x1e] sm:$0x1] %v5554_v59  ;;  %5359 = vmatmul.mubr.f32.vlgmr.msra.gmra.mxu1 %v5554_v59 }
0x1aa4   : > { %v5395_v11 = vpop.f32.mrf.mxu0 }
0x1aa5   : > { %v3401_v18 = vadd.f32 %v5395_v11, %v3575_v60 }
0x1aa6   : > { %v3395_v61 = vpop.f32.mrf.mxu0 }
0x1aa7   : > { %3415 = vst [vmem:[%s5998_s11 + $0x8] sm:$0xff] %v3401_v18  ;;  %v3396_v21 = vadd.f32 %v3575_v60, %v3395_v61 }
0x1aa9   : > { %3414 = vst [vmem:[%s5998_s11] sm:$0xff] %v3396_v21 }
0x1b55   : > { %v3290_v23 = vpop.f32.mrf.mxu1 }
0x1b56   : > { %v3291_v40 = vadd.f32 %v3290_v23, %v3223_v22 }
0x1b57   : > { %v5360_v41 = vpop.f32.mrf.mxu1 }
0x1b58   : > { %5555 = vtanh.f32 %v3291_v40 }
0x1b65   : > { %v5556_v24 = vpop.eup %5555 }
0x1b66   : > { %3295 = vst [vmem:[#allocation4 + $0x1f] sm:$0x1] %v5556_v24 }
0x1b6d   : > { %v3300_v31 = vld [vmem:[%s3299_s10] sm:$0x1] }
0x1b6e   : > { %v3305_v37 = vld [vmem:[#allocation4 + $0x18] sm:$0xff]  ;;  %3301 = vst [vmem:[#allocation2] sm:$0x1] %v3300_v31 }
0x1b6f   : > { %5397 = vmatmul.mubr.f32.gmra.mxu0 %v3305_v37 }
0x1c2f   : > { %v5398_v46 = vpop.f32.mrf.mxu0 }
0x1c30   : > { %v3411_v47 = vadd.f32 %v5398_v46, %v3575_v60  ;;  %3421 = sbr.rel (%p3576_p13) target bundleno = 7223 (0x1c37), region = 72 }
0x1c31   : > { %v3405_v44 = vpop.f32.mrf.mxu0 }
0x1c32   : > { %3417 = vst [vmem:[%s5998_s11 + $0x18] sm:$0xff] %v3411_v47  ;;  %v3406_v49 = vadd.f32 %v3575_v60, %v3405_v44 }
0x1c34   : > { %3416 = vst [vmem:[%s5998_s11 + $0x10] sm:$0xff] %v3406_v49 }
0x1c35   : > { %v3422_v54 = vld [vmem:[#allocation2] sm:$0x1] }
0x1c36   : > { %3423 = vst [vmem:[#allocation16] sm:$0x1] %v3422_v54 }
0x1c37 PF: > { %s3584_s25 = sshll.u32 %s5892_s0, 9  ;;  %s3438_s24 = sshll.u32 %s5998_s11, 4  ;;  %s7453_s24 = int_to_ptr.vmem [resolvable:$true] %s3438_s24 }
0x1c38   : > { %s7450_s26 = scalar_lea.hbm %s7516_s8, %s3584_s25  ;;  %s7525_s23 = sand.u32 1, %s5795_s13  }
0x1c39   : > { %s7457_s19 = scalar_lea.sflag [#allocation9], %s7525_s23  ;;  %s5701_s27 = scalar_lea.vmem %s7453_s24, 512 }
0x1c3a   : > { %p5702_p0 = scmp.ne.s32.totalorder %s7453_s24, %s5701_s27  ;;  %s5814_s28 = smov [#allocation15]  }
0x1c3b   : > { %s5705_s18 = sshll.u32 %s5814_s28, 4  ;;  %s5706_s18 = int_to_ptr.vmem [resolvable:$false] %s5705_s18 }
0x1c3c   : > { %p5703_p8 = pnand %p5702_p0, %p5911_p5  ;;  %s5707_s29 = scalar_lea.vmem %s5706_s18, 1024 }
0x1c3d   : > { %p5708_p12 = scmp.lt.s32.totalorder %s7453_s24, %s5706_s18  ;;  %p5709_p1 = scmp.lt.s32.totalorder %s5707_s29, %s5701_s27 }
0x1c3e   : > { %p5704_p9 = pneg %p5703_p8 }
0x1c3f   : > { %p5710_p3 = por %p5709_p1, %p5708_p12 }
0x1c41   : > { %p5711_p4 = pnand %p5710_p3, %p5704_p9 }
0x1c43   : > { %5714 = shalt.err (!%p5711_p4)
}
0x1c44   : > { %s5715_s11 = scalar_lea.hbm %s7450_s26, 512  ;;  %s5719_s30 = scalar_lea.hbm %s7516_s8, 1536 }
0x1c45   : > { %p5716_p7 = scmp.ne.s32.totalorder %s7450_s26, %s5715_s11  ;;  %p5720_p10 = scmp.lt.s32.totalorder %s7450_s26, %s7516_s8 }
0x1c46   : > { %p5721_p13 = scmp.lt.s32.totalorder %s5719_s30, %s5715_s11 }
0x1c47   : > { %p5717_p2 = pnand %p5716_p7, %p5911_p5 }
0x1c48   : > { %p5722_p0 = por %p5721_p13, %p5720_p10 }
0x1c49   : > { %p5718_p11 = pneg %p5717_p2 }
0x1c4b   : > { %p5723_p8 = pnand %p5722_p0, %p5718_p11 }
0x1c4d   : > { %5726 = shalt.err (!%p5723_p8)
}
0x1c4e   : > { %s5815_s27 = smov 128   ;;  %s5816_s28 = smov 8  }
0x1c4f   : > { %5415 = dma.vmem_to_hbm [thread:$0]  (%p5911_p5), %s7453_s24, 512, %s7450_s26, %s7457_s19, %s5815_s27, %s5815_s27, %s5816_s28  }
0x1c50   : > { %s5817_s18 = smov [#allocation16]   ;;  %p7526_p12 = scmp.eq.s32.totalorder %s5892_s0, 2 }
0x1c51   : > { %s3452_s29 = sshll.u32 %s5817_s18, 4  ;;  %s3453_s29 = int_to_ptr.vmem [resolvable:$true] %s3452_s29 }
0x1c52   : > { %s5727_s10 = scalar_lea.vmem %s3453_s29, 16  ;;  %s5733_s11 = scalar_lea.vmem %s3453_s29, 32 }
0x1c53   : > { %p5728_p9 = scmp.ne.s32.totalorder %s3453_s29, %s5727_s10  ;;  %p5734_p4 = scmp.lt.s32.totalorder %s3453_s29, %s3453_s29 }
0x1c54   : > { %p5735_p7 = scmp.lt.s32.totalorder %s5733_s11, %s5727_s10 }
0x1c55   : > { %p5729_p1 = pnand %p5728_p9, %p7526_p12 }
0x1c56   : > { %p5736_p2 = por %p5735_p7, %p5734_p4 }
0x1c57   : > { %p5730_p3 = pneg %p5729_p1 }
0x1c59   : > { %p5737_p11 = pnand %p5736_p2, %p5730_p3 }
0x1c5b   : > { %5740 = shalt.err (!%p5737_p11)
}
0x1c5c   : > { %p7527_p10 = pmov %p7526_p12 }
0x1c5e   : > { %5417 = dma.vmem_to_hbm [thread:$0]  (%p7527_p10), %s3453_s29, 16, %s7517_s9, [#allocation17]  }
0x1c5f   : > { %p7528_p5 = pmov %p7527_p10 }
0x1c61   : > { %5782 = dma.done.wait (%p7528_p5), [#allocation17], 16   ;;  %p7529_p13 = pmov %p7528_p5 }
0x1c63   : > { %5784 = vsyncadd (%p7529_p13), [#allocation17], 4294967280 }
0x1c64 PF: > { %p5448_p0 = scmp.ge.s32.totalorder %s5803_s15, 2  ;;  %s3468_s21 = sand.u32 1, %s5791_s12  }
0x1c65   : > { %s3469_s26 = scalar_lea.sflag [#allocation9], %s3468_s21 }
0x1c66   : > { %p5435_p8 = pnand %p5448_p0, %p5915_p6 }
0x1c68   : > { %p5436_p9 = pneg %p5435_p8 }
0x1c6a   : > { %5786 = dma.done.wait (%p5436_p9), %s3469_s26, 512  }
0x1c6b   : > { %5788 = vsyncadd (%p5436_p9), %s3469_s26, 4294966784  ;;  %p28_p12 = scmp.ge.s32.totalorder %s5896_s17, 5   ;;  %s7530_s12 = smov %s5795_s13 }
0x1c6c   : > { %s7531_s13 = smov %s5799_s14  ;;  %s7532_s14 = smov %s5907_s20 }
0x1c6d   : > { %s7533_s15 = smov %s5896_s17  ;;  %30 = sbr.rel (!%p28_p12) target bundleno = 12 (0xc), region = 114 }
0x1c72   :  { %3474 = vsyncpa [#allocation8], 1 }
0x1c73   :  { %3476 = vsyncpa [#allocation8 + $0x1], 1 }
0x1c74   :  { %3477 = vsyncpa [#allocation11], 1 }
0x1c75   :  { %3478 = vsyncpa [#allocation14], 1 }
0x1c76   :  { %3479 = vsyncpa [#allocation9], 1 }
0x1c77   :  { %3481 = vsyncpa [#allocation9 + $0x1], 1 }
0x1c78   :  { %3482 = vsyncpa [#allocation17], 1 }

</bundles_post_ra>
